<compile_context>
chip_gen: v5e
topology: v5e:2x2
jax: 0.10.0
libtpu: 0.0.40
codegen_flags: <defaults>
</compile_context>

<pallas_src>
from collections import namedtuple

import numpy as np
import jax
import jax.numpy as jnp
from jax.experimental import pallas as pl
from jax.experimental.pallas import tpu as pltpu

NEG_SLOPE = 0.1      # nn.LeakyReLU(0.1)
CPAD = 128           # one full lane group


# --------------------------------------------------------------------------
# Parameter init (PyTorch layouts: conv weight (Cout, Cin, kh, kw))
# --------------------------------------------------------------------------
def init_params(key):
    ks = jax.random.split(key, 10)

    def conv_w(k_, cout, cin, ksz):
        fan_in = cin * ksz * ksz
        return jax.random.normal(k_, (cout, cin, ksz, ksz), jnp.float32) / (fan_in ** 0.5)

    def bias(k_, n):
        return 0.01 * jax.random.normal(k_, (n,), jnp.float32)

    return {
        "c1_w": conv_w(ks[0], 10, 3, 3),  "c1_b": bias(ks[1], 10),
        "c2_w": conv_w(ks[2], 16, 10, 3), "c2_b": bias(ks[3], 16),
        "c3_w": conv_w(ks[4], 32, 16, 3), "c3_b": bias(ks[5], 32),
        "o1_w": conv_w(ks[6], 1, 32, 1),  "o1_b": bias(ks[7], 1),
        "o2_w": conv_w(ks[8], 14, 32, 1), "o2_b": bias(ks[9], 14),
    }


# --------------------------------------------------------------------------
# Static geometry (flat, "overlapped" layouts; all row strides valid)
# --------------------------------------------------------------------------
Geom = namedtuple("Geom", "H1 W1 HP WP H2 W2 H3 W3 L1 Lp L2p M2 M3")


def _rup8(v):
    return (v + 7) // 8 * 8


def _geom(H, W):
    H1, W1 = H - 2, W - 2                              # conv1 (VALID 3x3)
    HP, WP = (H1 - 1) // 2 + 1, (W1 - 1) // 2 + 1      # MaxPool(3, s=2, p=1)
    H2, W2 = HP - 2, WP - 2                            # conv2
    H3, W3 = H2 - 2, W2 - 2                            # conv3 / heads
    assert H3 >= 1 and W3 >= 1, "input too small for PNet"
    L1 = H1 * W1
    Lp = _rup8(L1)                                     # conv1 rows (flat, stride W1)
    M3 = _rup8((H3 - 1) * WP + W3)                     # conv3 / head rows (stride WP)
    M2 = _rup8(max((H2 - 1) * WP + W2, 2 * WP + 2 + M3))   # conv2 rows (stride WP)
    L2p = _rup8(max(HP * WP, 2 * WP + 2 + M2))         # pool rows (stride WP)
    return Geom(H1, W1, HP, WP, H2, W2, H3, W3, L1, Lp, L2p, M2, M3)


def _pick_btile(N):
    # Stack up to 8 images into the matmul M dimension, but keep >= 2 grid
    # steps so both v7x TensorCores stay busy.
    for b in (8, 4, 2, 1):
        if N % b == 0 and N // b >= 2:
            return b
    return 1


# --------------------------------------------------------------------------
# Weight / constant packing (wrapper side, trace-time)
# --------------------------------------------------------------------------
def _pack_conv1(w, b):
    """(10,3,3,3) -> (128,128) bf16; row = tap*3 + cin (tap = kh*3+kw)."""
    cout, cin, kh, kw = w.shape
    wm = jnp.transpose(w, (2, 3, 1, 0)).reshape(kh * kw * cin, cout)
    wm = jnp.pad(wm, ((0, CPAD - kh * kw * cin), (0, CPAD - cout)))
    bm = jnp.pad(b, (0, CPAD - cout))
    return wm.astype(jnp.bfloat16), bm.astype(jnp.float32)


def _pack_taps(w, b):
    """(Cout,Cin,3,3) -> (9,128,128) bf16 per-tap matrices, bias -> (128,) f32."""
    cout, cin, kh, kw = w.shape
    wm = jnp.transpose(w, (2, 3, 1, 0)).reshape(kh * kw, cin, cout)
    wm = jnp.pad(wm, ((0, 0), (0, CPAD - cin), (0, CPAD - cout)))
    bm = jnp.pad(b, (0, CPAD - cout))
    return wm.astype(jnp.bfloat16), bm.astype(jnp.float32)


def _pack_head(o1_w, o1_b, o2_w, o2_b):
    """Fused 1x1 heads: lane 0 = classifier, lanes 1..14 = regressor."""
    w = jnp.concatenate([o1_w, o2_w], axis=0)[:, :, 0, 0]      # (15, 32)
    wh = jnp.pad(jnp.transpose(w, (1, 0)), ((0, CPAD - 32), (0, CPAD - 15)))
    bh = jnp.pad(jnp.concatenate([o1_b, o2_b]), (0, CPAD - 15))
    return wh.astype(jnp.bfloat16), bh.astype(jnp.float32)


def _build_pool_sel(g):
    """(9, L2p, Lp) bf16 clamped 0/1 selection matrices for MaxPool(3,2,p=1).

    sel[t, p*WP+q, r*W1+c] = 1 with r = clip(2p+dr, 0, H1-1),
    c = clip(2q+dc, 0, W1-1); clipping duplicates an in-window element, so
    max over the 9 picks is the exact padded max-pool (no -inf padding)."""
    sel = np.zeros((9, g.L2p, g.Lp), np.float32)
    t = 0
    for dr in (-1, 0, 1):
        for dc in (-1, 0, 1):
            for p in range(g.HP):
                for q in range(g.WP):
                    r = min(max(2 * p + dr, 0), g.H1 - 1)
                    c = min(max(2 * q + dc, 0), g.W1 - 1)
                    sel[t, p * g.WP + q, r * g.W1 + c] = 1.0
            t += 1
    return jnp.asarray(sel, jnp.bfloat16)


def _im2col_conv1(x_nchw, g):
    """(N,3,H,W) f32 -> (N*Lp, 128) bf16 flat im2col slab (lane = tap*3+cin)."""
    N = x_nchw.shape[0]
    taps = []
    for kh in range(3):
        for kw in range(3):
            taps.append(x_nchw[:, :, kh:kh + g.H1, kw:kw + g.W1])
    xt = jnp.concatenate(taps, axis=1)                     # (N, 27, H1, W1)
    xt = jnp.transpose(xt, (0, 2, 3, 1)).reshape(N, g.L1, 27)
    xt = jnp.pad(xt, ((0, 0), (0, g.Lp - g.L1), (0, CPAD - 27)))
    return xt.reshape(N * g.Lp, CPAD).astype(jnp.bfloat16)


# --------------------------------------------------------------------------
# The fused PNet Pallas kernel
# --------------------------------------------------------------------------
def _build_pnet_call(N, B, g):
    K = 3
    f32, bf16 = jnp.float32, jnp.bfloat16
    Lp, L2p, M2, M3, WP = g.Lp, g.L2p, g.M2, g.M3, g.WP

    def kernel(x_ref, w1_ref, sel_ref, w2_ref, w3_ref, wh_ref, b_ref,
               o_ref, a1, a2, a3, a4):
        def leaky(v):
            return jnp.where(v > 0, v, NEG_SLOPE * v)

        bias1 = b_ref[0:1, :]
        bias2 = b_ref[1:2, :]
        bias3 = b_ref[2:3, :]
        biash = b_ref[3:4, :]

        # ---- Conv1(3x3) + LeakyReLU: ONE batch-stacked im2col matmul ----
        c1 = jnp.dot(x_ref[...], w1_ref[...], preferred_element_type=f32)
        a1[...] = leaky(c1 + bias1).astype(bf16)           # (B*Lp, 128) bf16

        for b in range(B):                                  # static unroll
            a1v = a1[pl.ds(b * Lp, Lp), :]                  # (Lp, 128) bf16

            # ---- MaxPool(3, s=2, p=1) + LeakyReLU: max of 9 selection picks ----
            pooled = jnp.dot(sel_ref[0], a1v, preferred_element_type=f32)
            for t in range(1, 9):
                pooled = jnp.maximum(
                    pooled, jnp.dot(sel_ref[t], a1v, preferred_element_type=f32))
            a2[pl.ds(b * L2p, L2p), :] = leaky(pooled).astype(bf16)

            # ---- Conv2(3x3) + LeakyReLU: 9 whole-plane tap matmuls ----
            acc2 = jnp.zeros((M2, CPAD), f32)
            for kh in range(K):
                for kw in range(K):
                    lhs = a2[pl.ds(b * L2p + kh * WP + kw, M2), :]
                    acc2 = acc2 + jnp.dot(lhs, w2_ref[kh * K + kw],
                                          preferred_element_type=f32)
            a3[pl.ds(b * M2, M2), :] = leaky(acc2 + bias2).astype(bf16)

            # ---- Conv3(3x3) + LeakyReLU: 9 whole-plane tap matmuls ----
            acc3 = jnp.zeros((M3, CPAD), f32)
            for kh in range(K):
                for kw in range(K):
                    lhs = a3[pl.ds(b * M2 + kh * WP + kw, M3), :]
                    acc3 = acc3 + jnp.dot(lhs, w3_ref[kh * K + kw],
                                          preferred_element_type=f32)
            a4[pl.ds(b * M3, M3), :] = leaky(acc3 + bias3).astype(bf16)

        # ---- Fused 1x1 heads: one batch-stacked matmul; lane 0 = sigmoid ----
        h = jnp.dot(a4[...], wh_ref[...], preferred_element_type=f32) + biash
        lane = jax.lax.broadcasted_iota(jnp.int32, (B * M3, CPAD), 1)
        sig = 1.0 / (1.0 + jnp.exp(-h))
        o_ref[...] = jnp.where(lane == 0, sig, h)           # (B*M3, 128) f32

    # Cost estimate with REAL channel counts (not the 128-lane padding).
    flops = 2 * N * (g.L1 * 27 * 10
                     + g.H2 * g.W2 * 90 * 16
                     + g.H3 * g.W3 * 144 * 32
                     + g.H3 * g.W3 * 32 * 15)
    cost = pl.CostEstimate(
        flops=int(flops),
        transcendentals=int(N * g.H3 * g.W3),
        bytes_accessed=int(N * (Lp * CPAD * 2 + M3 * CPAD * 4)
                           + 9 * L2p * Lp * 2
                           + 20 * CPAD * CPAD * 2 + 4 * CPAD * 4),
    )

    return pl.pallas_call(
        kernel,
        out_shape=jax.ShapeDtypeStruct((N * M3, CPAD), jnp.float32),
        grid=(N // B,),
        in_specs=[
            pl.BlockSpec((B * Lp, CPAD), lambda n: (n, 0)),      # im2col input
            pl.BlockSpec((CPAD, CPAD), lambda n: (0, 0)),        # conv1 weight
            pl.BlockSpec((9, L2p, Lp), lambda n: (0, 0, 0)),     # pool selections
            pl.BlockSpec((9, CPAD, CPAD), lambda n: (0, 0, 0)),  # conv2 taps
            pl.BlockSpec((9, CPAD, CPAD), lambda n: (0, 0, 0)),  # conv3 taps
            pl.BlockSpec((CPAD, CPAD), lambda n: (0, 0)),        # fused head weight
            pl.BlockSpec((4, CPAD), lambda n: (0, 0)),           # stacked biases
        ],
        out_specs=pl.BlockSpec((B * M3, CPAD), lambda n: (n, 0)),
        scratch_shapes=[
            pltpu.VMEM((B * Lp, CPAD), jnp.bfloat16),   # conv1 out (flat, stride W1)
            pltpu.VMEM((B * L2p, CPAD), jnp.bfloat16),  # pool out  (flat, stride WP)
            pltpu.VMEM((B * M2, CPAD), jnp.bfloat16),   # conv2 out (flat, stride WP)
            pltpu.VMEM((B * M3, CPAD), jnp.bfloat16),   # conv3 out (flat, stride WP)
        ],
        compiler_params=pltpu.CompilerParams(dimension_semantics=("parallel",)),
        cost_estimate=cost,
    )


# --------------------------------------------------------------------------
# Public forward (matches PNet.forward semantics; NCHW in / NCHW out)
# --------------------------------------------------------------------------
def pnet_forward(params, x):
    N, C, H, W = x.shape
    assert C == 3
    g = _geom(H, W)
    B = _pick_btile(N)
    n1 = params["o1_w"].shape[0]          # 1
    n2 = params["o2_w"].shape[0]          # 14

    w1p, b1 = _pack_conv1(params["c1_w"], params["c1_b"])
    w2, b2 = _pack_taps(params["c2_w"], params["c2_b"])
    w3, b3 = _pack_taps(params["c3_w"], params["c3_b"])
    wh, bh = _pack_head(params["o1_w"], params["o1_b"],
                        params["o2_w"], params["o2_b"])
    b_all = jnp.stack([b1, b2, b3, bh], axis=0)            # (4, 128) f32

    sel = _build_pool_sel(g)                               # (9, L2p, Lp) bf16
    xt = _im2col_conv1(x, g)                               # (N*Lp, 128) bf16

    out = _build_pnet_call(N, B, g)(xt, w1p, sel, w2, w3, wh, b_all)

    out = out.reshape(N, g.M3, CPAD)[:, :g.H3 * g.WP, :]
    out = out.reshape(N, g.H3, g.WP, CPAD)[:, :, :g.W3, :]      # (N, H3, W3, 128)
    y1 = jnp.transpose(out[..., 0:n1], (0, 3, 1, 2))            # (N, 1, H3, W3)
    y2 = jnp.transpose(out[..., n1:n1 + n2], (0, 3, 1, 2))      # (N, 14, H3, W3)
    return y1, y2


# --------------------------------------------------------------------------
# Pure-JAX reference (mirrors the PyTorch module exactly, f32)
# --------------------------------------------------------------------------
def pnet_reference(params, x):
    def leaky(v):
        return jnp.where(v > 0, v, NEG_SLOPE * v)

    def conv(h, w, b):
        y = jax.lax.conv_general_dilated(
            h, w, window_strides=(1, 1), padding="VALID",
            dimension_numbers=("NCHW", "OIHW", "NCHW"))
        return y + b[None, :, None, None]

    h = leaky(conv(x, params["c1_w"], params["c1_b"]))
    h = jax.lax.reduce_window(h, -jnp.inf, jax.lax.max,
                              (1, 1, 3, 3), (1, 1, 2, 2),
                              ((0, 0), (0, 0), (1, 1), (1, 1)))
    h = leaky(h)
    h = leaky(conv(h, params["c2_w"], params["c2_b"]))
    h = leaky(conv(h, params["c3_w"], params["c3_b"]))
    y1 = 1.0 / (1.0 + jnp.exp(-conv(h, params["o1_w"], params["o1_b"])))
    y2 = conv(h, params["o2_w"], params["o2_b"])
    return y1, y2


if __name__ == "__main__":
    key = jax.random.PRNGKey(0)
    k_params, k_x = jax.random.split(key)

    params = init_params(k_params)
    x = jax.random.normal(k_x, (2, 3, 16, 16), dtype=jnp.float32)

    fwd = jax.jit(pnet_forward)
    y1, y2 = fwd(params, x)
    jax.block_until_ready((y1, y2))

    assert y1.shape == (2, 1, 3, 3), y1.shape
    assert y2.shape == (2, 14, 3, 3), y2.shape
    assert bool(jnp.all(jnp.isfinite(y1))) and bool(jnp.all(jnp.isfinite(y2)))
    assert bool(jnp.all((y1 >= 0.0) & (y1 <= 1.0)))       # sigmoid head

    # Compare against the pure-JAX/XLA reference (bf16 MXU operands -> loose tol).
    r1, r2 = jax.jit(pnet_reference)(params, x)
    err1 = float(jnp.max(jnp.abs(y1 - r1)))
    err2 = float(jnp.max(jnp.abs(y2 - r2)))
    assert err1 < 0.1, f"classifier head mismatch: max abs err {err1}"
    assert err2 < 0.2, f"regression head mismatch: max abs err {err2}"

    print("KERNEL_OK")
</pallas_src>

<mosaic_0001>
module attributes {stable_mosaic.version = 11 : i64} {
  func.func @kernel(%arg0: i32, %arg1: memref<200x128xbf16, #tpu.memory_space<vmem>>, %arg2: memref<128x128xbf16, #tpu.memory_space<vmem>>, %arg3: memref<9x56x200xbf16, #tpu.memory_space<vmem>>, %arg4: memref<9x128x128xbf16, #tpu.memory_space<vmem>>, %arg5: memref<9x128x128xbf16, #tpu.memory_space<vmem>>, %arg6: memref<128x128xbf16, #tpu.memory_space<vmem>>, %arg7: memref<4x128xf32, #tpu.memory_space<vmem>>, %arg8: memref<24x128xf32, #tpu.memory_space<vmem>>, %arg9: memref<200x128xbf16, #tpu.memory_space<vmem>>, %arg10: memref<56x128xbf16, #tpu.memory_space<vmem>>, %arg11: memref<40x128xbf16, #tpu.memory_space<vmem>>, %arg12: memref<24x128xbf16, #tpu.memory_space<vmem>>) attributes {dimension_semantics = [#tpu.dimension_semantics<parallel>], iteration_bounds = array<i64: 2>, scalar_prefetch = 0 : i64, scratch_operands = 4 : i64, tpu.core_type = #tpu.core_type<tc>, window_params = [{transform_indices = @transform_0, window_bounds = array<i64: 200, 128>}, {pipeline_mode = #tpu.pipeline_mode<synchronous>, transform_indices = @transform_1, window_bounds = array<i64: 128, 128>}, {pipeline_mode = #tpu.pipeline_mode<synchronous>, transform_indices = @transform_2, window_bounds = array<i64: 9, 56, 200>}, {pipeline_mode = #tpu.pipeline_mode<synchronous>, transform_indices = @transform_3, window_bounds = array<i64: 9, 128, 128>}, {pipeline_mode = #tpu.pipeline_mode<synchronous>, transform_indices = @transform_4, window_bounds = array<i64: 9, 128, 128>}, {pipeline_mode = #tpu.pipeline_mode<synchronous>, transform_indices = @transform_5, window_bounds = array<i64: 128, 128>}, {pipeline_mode = #tpu.pipeline_mode<synchronous>, transform_indices = @transform_6, window_bounds = array<i64: 4, 128>}, {transform_indices = @transform_7, window_bounds = array<i64: 24, 128>}]} {
    %c0 = arith.constant 0 : index
    %c0_0 = arith.constant 0 : index
    %0 = vector.load %arg7[%c0, %c0_0] : memref<4x128xf32, #tpu.memory_space<vmem>>, vector<1x128xf32>
    %c1 = arith.constant 1 : index
    %c0_1 = arith.constant 0 : index
    %1 = vector.load %arg7[%c1, %c0_1] : memref<4x128xf32, #tpu.memory_space<vmem>>, vector<1x128xf32>
    %c2 = arith.constant 2 : index
    %c0_2 = arith.constant 0 : index
    %2 = vector.load %arg7[%c2, %c0_2] : memref<4x128xf32, #tpu.memory_space<vmem>>, vector<1x128xf32>
    %c3 = arith.constant 3 : index
    %c0_3 = arith.constant 0 : index
    %3 = vector.load %arg7[%c3, %c0_3] : memref<4x128xf32, #tpu.memory_space<vmem>>, vector<1x128xf32>
    %c0_4 = arith.constant 0 : index
    %c0_5 = arith.constant 0 : index
    %4 = vector.load %arg1[%c0_4, %c0_5] : memref<200x128xbf16, #tpu.memory_space<vmem>>, vector<200x128xbf16>
    %c0_6 = arith.constant 0 : index
    %c0_7 = arith.constant 0 : index
    %5 = vector.load %arg2[%c0_6, %c0_7] : memref<128x128xbf16, #tpu.memory_space<vmem>>, vector<128x128xbf16>
    %cst = arith.constant dense<0.000000e+00> : vector<200x128xf32>
    %6 = tpu.matmul %4, %5, %cst {dimension_numbers = #tpu.dot_dimension_numbers<[1], [0], [0], [1], [0, 0, 1, 1], [], []>} : vector<200x128xbf16>, vector<128x128xbf16>, vector<200x128xf32> -> vector<200x128xf32>
    %7 = vector.broadcast %0 : vector<1x128xf32> to vector<200x128xf32>
    %8 = arith.addf %6, %7 : vector<200x128xf32>
    %cst_8 = arith.constant 0.000000e+00 : f32
    %9 = vector.broadcast %cst_8 : f32 to vector<200x128xf32>
    %10 = arith.cmpf ogt, %8, %9 : vector<200x128xf32>
    %cst_9 = arith.constant 1.000000e-01 : f32
    %11 = vector.broadcast %cst_9 : f32 to vector<200x128xf32>
    %12 = arith.mulf %11, %8 : vector<200x128xf32>
    %13 = arith.select %10, %8, %12 : vector<200x128xi1>, vector<200x128xf32>
    %14 = arith.truncf %13 : vector<200x128xf32> to vector<200x128xbf16>
    %c0_10 = arith.constant 0 : index
    %c0_11 = arith.constant 0 : index
    %15 = vector.load %arg9[%c0_10, %c0_11] : memref<200x128xbf16, #tpu.memory_space<vmem>>, vector<200x128xbf16>
    tpu.vector_store %arg9[%c0_10, %c0_11], %14 {strides = array<i32>} : memref<200x128xbf16, #tpu.memory_space<vmem>>, vector<200x128xbf16>,
    %c0_12 = arith.constant 0 : index
    %c0_13 = arith.constant 0 : index
    %16 = vector.load %arg9[%c0_12, %c0_13] : memref<200x128xbf16, #tpu.memory_space<vmem>>, vector<200x128xbf16>
    %c0_14 = arith.constant 0 : index
    %c0_15 = arith.constant 0 : index
    %c0_16 = arith.constant 0 : index
    %17 = vector.load %arg3[%c0_14, %c0_15, %c0_16] : memref<9x56x200xbf16, #tpu.memory_space<vmem>>, vector<1x56x200xbf16>
    %18 = vector.shape_cast %17 : vector<1x56x200xbf16> to vector<56x200xbf16>
    %cst_17 = arith.constant dense<0.000000e+00> : vector<56x128xf32>
    %19 = tpu.matmul %18, %16, %cst_17 {dimension_numbers = #tpu.dot_dimension_numbers<[1], [0], [0], [1], [0, 0, 1, 1], [], []>} : vector<56x200xbf16>, vector<200x128xbf16>, vector<56x128xf32> -> vector<56x128xf32>
    %c1_18 = arith.constant 1 : index
    %c0_19 = arith.constant 0 : index
    %c0_20 = arith.constant 0 : index
    %20 = vector.load %arg3[%c1_18, %c0_19, %c0_20] : memref<9x56x200xbf16, #tpu.memory_space<vmem>>, vector<1x56x200xbf16>
    %21 = vector.shape_cast %20 : vector<1x56x200xbf16> to vector<56x200xbf16>
    %cst_21 = arith.constant dense<0.000000e+00> : vector<56x128xf32>
    %22 = tpu.matmul %21, %16, %cst_21 {dimension_numbers = #tpu.dot_dimension_numbers<[1], [0], [0], [1], [0, 0, 1, 1], [], []>} : vector<56x200xbf16>, vector<200x128xbf16>, vector<56x128xf32> -> vector<56x128xf32>
    %23 = arith.maximumf %19, %22 : vector<56x128xf32>
    %c2_22 = arith.constant 2 : index
    %c0_23 = arith.constant 0 : index
    %c0_24 = arith.constant 0 : index
    %24 = vector.load %arg3[%c2_22, %c0_23, %c0_24] : memref<9x56x200xbf16, #tpu.memory_space<vmem>>, vector<1x56x200xbf16>
    %25 = vector.shape_cast %24 : vector<1x56x200xbf16> to vector<56x200xbf16>
    %cst_25 = arith.constant dense<0.000000e+00> : vector<56x128xf32>
    %26 = tpu.matmul %25, %16, %cst_25 {dimension_numbers = #tpu.dot_dimension_numbers<[1], [0], [0], [1], [0, 0, 1, 1], [], []>} : vector<56x200xbf16>, vector<200x128xbf16>, vector<56x128xf32> -> vector<56x128xf32>
    %27 = arith.maximumf %23, %26 : vector<56x128xf32>
    %c3_26 = arith.constant 3 : index
    %c0_27 = arith.constant 0 : index
    %c0_28 = arith.constant 0 : index
    %28 = vector.load %arg3[%c3_26, %c0_27, %c0_28] : memref<9x56x200xbf16, #tpu.memory_space<vmem>>, vector<1x56x200xbf16>
    %29 = vector.shape_cast %28 : vector<1x56x200xbf16> to vector<56x200xbf16>
    %cst_29 = arith.constant dense<0.000000e+00> : vector<56x128xf32>
    %30 = tpu.matmul %29, %16, %cst_29 {dimension_numbers = #tpu.dot_dimension_numbers<[1], [0], [0], [1], [0, 0, 1, 1], [], []>} : vector<56x200xbf16>, vector<200x128xbf16>, vector<56x128xf32> -> vector<56x128xf32>
    %31 = arith.maximumf %27, %30 : vector<56x128xf32>
    %c4 = arith.constant 4 : index
    %c0_30 = arith.constant 0 : index
    %c0_31 = arith.constant 0 : index
    %32 = vector.load %arg3[%c4, %c0_30, %c0_31] : memref<9x56x200xbf16, #tpu.memory_space<vmem>>, vector<1x56x200xbf16>
    %33 = vector.shape_cast %32 : vector<1x56x200xbf16> to vector<56x200xbf16>
    %cst_32 = arith.constant dense<0.000000e+00> : vector<56x128xf32>
    %34 = tpu.matmul %33, %16, %cst_32 {dimension_numbers = #tpu.dot_dimension_numbers<[1], [0], [0], [1], [0, 0, 1, 1], [], []>} : vector<56x200xbf16>, vector<200x128xbf16>, vector<56x128xf32> -> vector<56x128xf32>
    %35 = arith.maximumf %31, %34 : vector<56x128xf32>
    %c5 = arith.constant 5 : index
    %c0_33 = arith.constant 0 : index
    %c0_34 = arith.constant 0 : index
    %36 = vector.load %arg3[%c5, %c0_33, %c0_34] : memref<9x56x200xbf16, #tpu.memory_space<vmem>>, vector<1x56x200xbf16>
    %37 = vector.shape_cast %36 : vector<1x56x200xbf16> to vector<56x200xbf16>
    %cst_35 = arith.constant dense<0.000000e+00> : vector<56x128xf32>
    %38 = tpu.matmul %37, %16, %cst_35 {dimension_numbers = #tpu.dot_dimension_numbers<[1], [0], [0], [1], [0, 0, 1, 1], [], []>} : vector<56x200xbf16>, vector<200x128xbf16>, vector<56x128xf32> -> vector<56x128xf32>
    %39 = arith.maximumf %35, %38 : vector<56x128xf32>
    %c6 = arith.constant 6 : index
    %c0_36 = arith.constant 0 : index
    %c0_37 = arith.constant 0 : index
    %40 = vector.load %arg3[%c6, %c0_36, %c0_37] : memref<9x56x200xbf16, #tpu.memory_space<vmem>>, vector<1x56x200xbf16>
    %41 = vector.shape_cast %40 : vector<1x56x200xbf16> to vector<56x200xbf16>
    %cst_38 = arith.constant dense<0.000000e+00> : vector<56x128xf32>
    %42 = tpu.matmul %41, %16, %cst_38 {dimension_numbers = #tpu.dot_dimension_numbers<[1], [0], [0], [1], [0, 0, 1, 1], [], []>} : vector<56x200xbf16>, vector<200x128xbf16>, vector<56x128xf32> -> vector<56x128xf32>
    %43 = arith.maximumf %39, %42 : vector<56x128xf32>
    %c7 = arith.constant 7 : index
    %c0_39 = arith.constant 0 : index
    %c0_40 = arith.constant 0 : index
    %44 = vector.load %arg3[%c7, %c0_39, %c0_40] : memref<9x56x200xbf16, #tpu.memory_space<vmem>>, vector<1x56x200xbf16>
    %45 = vector.shape_cast %44 : vector<1x56x200xbf16> to vector<56x200xbf16>
    %cst_41 = arith.constant dense<0.000000e+00> : vector<56x128xf32>
    %46 = tpu.matmul %45, %16, %cst_41 {dimension_numbers = #tpu.dot_dimension_numbers<[1], [0], [0], [1], [0, 0, 1, 1], [], []>} : vector<56x200xbf16>, vector<200x128xbf16>, vector<56x128xf32> -> vector<56x128xf32>
    %47 = arith.maximumf %43, %46 : vector<56x128xf32>
    %c8 = arith.constant 8 : index
    %c0_42 = arith.constant 0 : index
    %c0_43 = arith.constant 0 : index
    %48 = vector.load %arg3[%c8, %c0_42, %c0_43] : memref<9x56x200xbf16, #tpu.memory_space<vmem>>, vector<1x56x200xbf16>
    %49 = vector.shape_cast %48 : vector<1x56x200xbf16> to vector<56x200xbf16>
    %cst_44 = arith.constant dense<0.000000e+00> : vector<56x128xf32>
    %50 = tpu.matmul %49, %16, %cst_44 {dimension_numbers = #tpu.dot_dimension_numbers<[1], [0], [0], [1], [0, 0, 1, 1], [], []>} : vector<56x200xbf16>, vector<200x128xbf16>, vector<56x128xf32> -> vector<56x128xf32>
    %51 = arith.maximumf %47, %50 : vector<56x128xf32>
    %cst_45 = arith.constant 0.000000e+00 : f32
    %52 = vector.broadcast %cst_45 : f32 to vector<56x128xf32>
    %53 = arith.cmpf ogt, %51, %52 : vector<56x128xf32>
    %cst_46 = arith.constant 1.000000e-01 : f32
    %54 = vector.broadcast %cst_46 : f32 to vector<56x128xf32>
    %55 = arith.mulf %54, %51 : vector<56x128xf32>
    %56 = arith.select %53, %51, %55 : vector<56x128xi1>, vector<56x128xf32>
    %57 = arith.truncf %56 : vector<56x128xf32> to vector<56x128xbf16>
    %c0_47 = arith.constant 0 : index
    %c0_48 = arith.constant 0 : index
    %58 = vector.load %arg10[%c0_47, %c0_48] : memref<56x128xbf16, #tpu.memory_space<vmem>>, vector<56x128xbf16>
    tpu.vector_store %arg10[%c0_47, %c0_48], %57 {strides = array<i32>} : memref<56x128xbf16, #tpu.memory_space<vmem>>, vector<56x128xbf16>,
    %cst_49 = arith.constant 0.000000e+00 : f32
    %59 = vector.broadcast %cst_49 : f32 to vector<40x128xf32>
    %c0_50 = arith.constant 0 : index
    %c0_51 = arith.constant 0 : index
    %60 = vector.load %arg10[%c0_50, %c0_51] : memref<56x128xbf16, #tpu.memory_space<vmem>>, vector<40x128xbf16>
    %c0_52 = arith.constant 0 : index
    %c0_53 = arith.constant 0 : index
    %c0_54 = arith.constant 0 : index
    %61 = vector.load %arg4[%c0_52, %c0_53, %c0_54] : memref<9x128x128xbf16, #tpu.memory_space<vmem>>, vector<1x128x128xbf16>
    %62 = vector.shape_cast %61 : vector<1x128x128xbf16> to vector<128x128xbf16>
    %cst_55 = arith.constant dense<0.000000e+00> : vector<40x128xf32>
    %63 = tpu.matmul %60, %62, %cst_55 {dimension_numbers = #tpu.dot_dimension_numbers<[1], [0], [0], [1], [0, 0, 1, 1], [], []>} : vector<40x128xbf16>, vector<128x128xbf16>, vector<40x128xf32> -> vector<40x128xf32>
    %64 = arith.addf %59, %63 : vector<40x128xf32>
    %c1_56 = arith.constant 1 : index
    %c0_57 = arith.constant 0 : index
    %65 = vector.load %arg10[%c1_56, %c0_57] : memref<56x128xbf16, #tpu.memory_space<vmem>>, vector<40x128xbf16>
    %c1_58 = arith.constant 1 : index
    %c0_59 = arith.constant 0 : index
    %c0_60 = arith.constant 0 : index
    %66 = vector.load %arg4[%c1_58, %c0_59, %c0_60] : memref<9x128x128xbf16, #tpu.memory_space<vmem>>, vector<1x128x128xbf16>
    %67 = vector.shape_cast %66 : vector<1x128x128xbf16> to vector<128x128xbf16>
    %cst_61 = arith.constant dense<0.000000e+00> : vector<40x128xf32>
    %68 = tpu.matmul %65, %67, %cst_61 {dimension_numbers = #tpu.dot_dimension_numbers<[1], [0], [0], [1], [0, 0, 1, 1], [], []>} : vector<40x128xbf16>, vector<128x128xbf16>, vector<40x128xf32> -> vector<40x128xf32>
    %69 = arith.addf %64, %68 : vector<40x128xf32>
    %c2_62 = arith.constant 2 : index
    %c0_63 = arith.constant 0 : index
    %70 = vector.load %arg10[%c2_62, %c0_63] : memref<56x128xbf16, #tpu.memory_space<vmem>>, vector<40x128xbf16>
    %c2_64 = arith.constant 2 : index
    %c0_65 = arith.constant 0 : index
    %c0_66 = arith.constant 0 : index
    %71 = vector.load %arg4[%c2_64, %c0_65, %c0_66] : memref<9x128x128xbf16, #tpu.memory_space<vmem>>, vector<1x128x128xbf16>
    %72 = vector.shape_cast %71 : vector<1x128x128xbf16> to vector<128x128xbf16>
    %cst_67 = arith.constant dense<0.000000e+00> : vector<40x128xf32>
    %73 = tpu.matmul %70, %72, %cst_67 {dimension_numbers = #tpu.dot_dimension_numbers<[1], [0], [0], [1], [0, 0, 1, 1], [], []>} : vector<40x128xbf16>, vector<128x128xbf16>, vector<40x128xf32> -> vector<40x128xf32>
    %74 = arith.addf %69, %73 : vector<40x128xf32>
    %c7_68 = arith.constant 7 : index
    %c0_69 = arith.constant 0 : index
    %75 = vector.load %arg10[%c7_68, %c0_69] : memref<56x128xbf16, #tpu.memory_space<vmem>>, vector<40x128xbf16>
    %c3_70 = arith.constant 3 : index
    %c0_71 = arith.constant 0 : index
    %c0_72 = arith.constant 0 : index
    %76 = vector.load %arg4[%c3_70, %c0_71, %c0_72] : memref<9x128x128xbf16, #tpu.memory_space<vmem>>, vector<1x128x128xbf16>
    %77 = vector.shape_cast %76 : vector<1x128x128xbf16> to vector<128x128xbf16>
    %cst_73 = arith.constant dense<0.000000e+00> : vector<40x128xf32>
    %78 = tpu.matmul %75, %77, %cst_73 {dimension_numbers = #tpu.dot_dimension_numbers<[1], [0], [0], [1], [0, 0, 1, 1], [], []>} : vector<40x128xbf16>, vector<128x128xbf16>, vector<40x128xf32> -> vector<40x128xf32>
    %79 = arith.addf %74, %78 : vector<40x128xf32>
    %c8_74 = arith.constant 8 : index
    %c0_75 = arith.constant 0 : index
    %80 = vector.load %arg10[%c8_74, %c0_75] : memref<56x128xbf16, #tpu.memory_space<vmem>>, vector<40x128xbf16>
    %c4_76 = arith.constant 4 : index
    %c0_77 = arith.constant 0 : index
    %c0_78 = arith.constant 0 : index
    %81 = vector.load %arg4[%c4_76, %c0_77, %c0_78] : memref<9x128x128xbf16, #tpu.memory_space<vmem>>, vector<1x128x128xbf16>
    %82 = vector.shape_cast %81 : vector<1x128x128xbf16> to vector<128x128xbf16>
    %cst_79 = arith.constant dense<0.000000e+00> : vector<40x128xf32>
    %83 = tpu.matmul %80, %82, %cst_79 {dimension_numbers = #tpu.dot_dimension_numbers<[1], [0], [0], [1], [0, 0, 1, 1], [], []>} : vector<40x128xbf16>, vector<128x128xbf16>, vector<40x128xf32> -> vector<40x128xf32>
    %84 = arith.addf %79, %83 : vector<40x128xf32>
    %c9 = arith.constant 9 : index
    %c0_80 = arith.constant 0 : index
    %85 = vector.load %arg10[%c9, %c0_80] : memref<56x128xbf16, #tpu.memory_space<vmem>>, vector<40x128xbf16>
    %c5_81 = arith.constant 5 : index
    %c0_82 = arith.constant 0 : index
    %c0_83 = arith.constant 0 : index
    %86 = vector.load %arg4[%c5_81, %c0_82, %c0_83] : memref<9x128x128xbf16, #tpu.memory_space<vmem>>, vector<1x128x128xbf16>
    %87 = vector.shape_cast %86 : vector<1x128x128xbf16> to vector<128x128xbf16>
    %cst_84 = arith.constant dense<0.000000e+00> : vector<40x128xf32>
    %88 = tpu.matmul %85, %87, %cst_84 {dimension_numbers = #tpu.dot_dimension_numbers<[1], [0], [0], [1], [0, 0, 1, 1], [], []>} : vector<40x128xbf16>, vector<128x128xbf16>, vector<40x128xf32> -> vector<40x128xf32>
    %89 = arith.addf %84, %88 : vector<40x128xf32>
    %c14 = arith.constant 14 : index
    %c0_85 = arith.constant 0 : index
    %90 = vector.load %arg10[%c14, %c0_85] : memref<56x128xbf16, #tpu.memory_space<vmem>>, vector<40x128xbf16>
    %c6_86 = arith.constant 6 : index
    %c0_87 = arith.constant 0 : index
    %c0_88 = arith.constant 0 : index
    %91 = vector.load %arg4[%c6_86, %c0_87, %c0_88] : memref<9x128x128xbf16, #tpu.memory_space<vmem>>, vector<1x128x128xbf16>
    %92 = vector.shape_cast %91 : vector<1x128x128xbf16> to vector<128x128xbf16>
    %cst_89 = arith.constant dense<0.000000e+00> : vector<40x128xf32>
    %93 = tpu.matmul %90, %92, %cst_89 {dimension_numbers = #tpu.dot_dimension_numbers<[1], [0], [0], [1], [0, 0, 1, 1], [], []>} : vector<40x128xbf16>, vector<128x128xbf16>, vector<40x128xf32> -> vector<40x128xf32>
    %94 = arith.addf %89, %93 : vector<40x128xf32>
    %c15 = arith.constant 15 : index
    %c0_90 = arith.constant 0 : index
    %95 = vector.load %arg10[%c15, %c0_90] : memref<56x128xbf16, #tpu.memory_space<vmem>>, vector<40x128xbf16>
    %c7_91 = arith.constant 7 : index
    %c0_92 = arith.constant 0 : index
    %c0_93 = arith.constant 0 : index
    %96 = vector.load %arg4[%c7_91, %c0_92, %c0_93] : memref<9x128x128xbf16, #tpu.memory_space<vmem>>, vector<1x128x128xbf16>
    %97 = vector.shape_cast %96 : vector<1x128x128xbf16> to vector<128x128xbf16>
    %cst_94 = arith.constant dense<0.000000e+00> : vector<40x128xf32>
    %98 = tpu.matmul %95, %97, %cst_94 {dimension_numbers = #tpu.dot_dimension_numbers<[1], [0], [0], [1], [0, 0, 1, 1], [], []>} : vector<40x128xbf16>, vector<128x128xbf16>, vector<40x128xf32> -> vector<40x128xf32>
    %99 = arith.addf %94, %98 : vector<40x128xf32>
    %c16 = arith.constant 16 : index
    %c0_95 = arith.constant 0 : index
    %100 = vector.load %arg10[%c16, %c0_95] : memref<56x128xbf16, #tpu.memory_space<vmem>>, vector<40x128xbf16>
    %c8_96 = arith.constant 8 : index
    %c0_97 = arith.constant 0 : index
    %c0_98 = arith.constant 0 : index
    %101 = vector.load %arg4[%c8_96, %c0_97, %c0_98] : memref<9x128x128xbf16, #tpu.memory_space<vmem>>, vector<1x128x128xbf16>
    %102 = vector.shape_cast %101 : vector<1x128x128xbf16> to vector<128x128xbf16>
    %cst_99 = arith.constant dense<0.000000e+00> : vector<40x128xf32>
    %103 = tpu.matmul %100, %102, %cst_99 {dimension_numbers = #tpu.dot_dimension_numbers<[1], [0], [0], [1], [0, 0, 1, 1], [], []>} : vector<40x128xbf16>, vector<128x128xbf16>, vector<40x128xf32> -> vector<40x128xf32>
    %104 = arith.addf %99, %103 : vector<40x128xf32>
    %105 = vector.broadcast %1 : vector<1x128xf32> to vector<40x128xf32>
    %106 = arith.addf %104, %105 : vector<40x128xf32>
    %cst_100 = arith.constant 0.000000e+00 : f32
    %107 = vector.broadcast %cst_100 : f32 to vector<40x128xf32>
    %108 = arith.cmpf ogt, %106, %107 : vector<40x128xf32>
    %cst_101 = arith.constant 1.000000e-01 : f32
    %109 = vector.broadcast %cst_101 : f32 to vector<40x128xf32>
    %110 = arith.mulf %109, %106 : vector<40x128xf32>
    %111 = arith.select %108, %106, %110 : vector<40x128xi1>, vector<40x128xf32>
    %112 = arith.truncf %111 : vector<40x128xf32> to vector<40x128xbf16>
    %c0_102 = arith.constant 0 : index
    %c0_103 = arith.constant 0 : index
    %113 = vector.load %arg11[%c0_102, %c0_103] : memref<40x128xbf16, #tpu.memory_space<vmem>>, vector<40x128xbf16>
    tpu.vector_store %arg11[%c0_102, %c0_103], %112 {strides = array<i32>} : memref<40x128xbf16, #tpu.memory_space<vmem>>, vector<40x128xbf16>,
    %cst_104 = arith.constant 0.000000e+00 : f32
    %114 = vector.broadcast %cst_104 : f32 to vector<24x128xf32>
    %c0_105 = arith.constant 0 : index
    %c0_106 = arith.constant 0 : index
    %115 = vector.load %arg11[%c0_105, %c0_106] : memref<40x128xbf16, #tpu.memory_space<vmem>>, vector<24x128xbf16>
    %c0_107 = arith.constant 0 : index
    %c0_108 = arith.constant 0 : index
    %c0_109 = arith.constant 0 : index
    %116 = vector.load %arg5[%c0_107, %c0_108, %c0_109] : memref<9x128x128xbf16, #tpu.memory_space<vmem>>, vector<1x128x128xbf16>
    %117 = vector.shape_cast %116 : vector<1x128x128xbf16> to vector<128x128xbf16>
    %cst_110 = arith.constant dense<0.000000e+00> : vector<24x128xf32>
    %118 = tpu.matmul %115, %117, %cst_110 {dimension_numbers = #tpu.dot_dimension_numbers<[1], [0], [0], [1], [0, 0, 1, 1], [], []>} : vector<24x128xbf16>, vector<128x128xbf16>, vector<24x128xf32> -> vector<24x128xf32>
    %119 = arith.addf %114, %118 : vector<24x128xf32>
    %c1_111 = arith.constant 1 : index
    %c0_112 = arith.constant 0 : index
    %120 = vector.load %arg11[%c1_111, %c0_112] : memref<40x128xbf16, #tpu.memory_space<vmem>>, vector<24x128xbf16>
    %c1_113 = arith.constant 1 : index
    %c0_114 = arith.constant 0 : index
    %c0_115 = arith.constant 0 : index
    %121 = vector.load %arg5[%c1_113, %c0_114, %c0_115] : memref<9x128x128xbf16, #tpu.memory_space<vmem>>, vector<1x128x128xbf16>
    %122 = vector.shape_cast %121 : vector<1x128x128xbf16> to vector<128x128xbf16>
    %cst_116 = arith.constant dense<0.000000e+00> : vector<24x128xf32>
    %123 = tpu.matmul %120, %122, %cst_116 {dimension_numbers = #tpu.dot_dimension_numbers<[1], [0], [0], [1], [0, 0, 1, 1], [], []>} : vector<24x128xbf16>, vector<128x128xbf16>, vector<24x128xf32> -> vector<24x128xf32>
    %124 = arith.addf %119, %123 : vector<24x128xf32>
    %c2_117 = arith.constant 2 : index
    %c0_118 = arith.constant 0 : index
    %125 = vector.load %arg11[%c2_117, %c0_118] : memref<40x128xbf16, #tpu.memory_space<vmem>>, vector<24x128xbf16>
    %c2_119 = arith.constant 2 : index
    %c0_120 = arith.constant 0 : index
    %c0_121 = arith.constant 0 : index
    %126 = vector.load %arg5[%c2_119, %c0_120, %c0_121] : memref<9x128x128xbf16, #tpu.memory_space<vmem>>, vector<1x128x128xbf16>
    %127 = vector.shape_cast %126 : vector<1x128x128xbf16> to vector<128x128xbf16>
    %cst_122 = arith.constant dense<0.000000e+00> : vector<24x128xf32>
    %128 = tpu.matmul %125, %127, %cst_122 {dimension_numbers = #tpu.dot_dimension_numbers<[1], [0], [0], [1], [0, 0, 1, 1], [], []>} : vector<24x128xbf16>, vector<128x128xbf16>, vector<24x128xf32> -> vector<24x128xf32>
    %129 = arith.addf %124, %128 : vector<24x128xf32>
    %c7_123 = arith.constant 7 : index
    %c0_124 = arith.constant 0 : index
    %130 = vector.load %arg11[%c7_123, %c0_124] : memref<40x128xbf16, #tpu.memory_space<vmem>>, vector<24x128xbf16>
    %c3_125 = arith.constant 3 : index
    %c0_126 = arith.constant 0 : index
    %c0_127 = arith.constant 0 : index
    %131 = vector.load %arg5[%c3_125, %c0_126, %c0_127] : memref<9x128x128xbf16, #tpu.memory_space<vmem>>, vector<1x128x128xbf16>
    %132 = vector.shape_cast %131 : vector<1x128x128xbf16> to vector<128x128xbf16>
    %cst_128 = arith.constant dense<0.000000e+00> : vector<24x128xf32>
    %133 = tpu.matmul %130, %132, %cst_128 {dimension_numbers = #tpu.dot_dimension_numbers<[1], [0], [0], [1], [0, 0, 1, 1], [], []>} : vector<24x128xbf16>, vector<128x128xbf16>, vector<24x128xf32> -> vector<24x128xf32>
    %134 = arith.addf %129, %133 : vector<24x128xf32>
    %c8_129 = arith.constant 8 : index
    %c0_130 = arith.constant 0 : index
    %135 = vector.load %arg11[%c8_129, %c0_130] : memref<40x128xbf16, #tpu.memory_space<vmem>>, vector<24x128xbf16>
    %c4_131 = arith.constant 4 : index
    %c0_132 = arith.constant 0 : index
    %c0_133 = arith.constant 0 : index
    %136 = vector.load %arg5[%c4_131, %c0_132, %c0_133] : memref<9x128x128xbf16, #tpu.memory_space<vmem>>, vector<1x128x128xbf16>
    %137 = vector.shape_cast %136 : vector<1x128x128xbf16> to vector<128x128xbf16>
    %cst_134 = arith.constant dense<0.000000e+00> : vector<24x128xf32>
    %138 = tpu.matmul %135, %137, %cst_134 {dimension_numbers = #tpu.dot_dimension_numbers<[1], [0], [0], [1], [0, 0, 1, 1], [], []>} : vector<24x128xbf16>, vector<128x128xbf16>, vector<24x128xf32> -> vector<24x128xf32>
    %139 = arith.addf %134, %138 : vector<24x128xf32>
    %c9_135 = arith.constant 9 : index
    %c0_136 = arith.constant 0 : index
    %140 = vector.load %arg11[%c9_135, %c0_136] : memref<40x128xbf16, #tpu.memory_space<vmem>>, vector<24x128xbf16>
    %c5_137 = arith.constant 5 : index
    %c0_138 = arith.constant 0 : index
    %c0_139 = arith.constant 0 : index
    %141 = vector.load %arg5[%c5_137, %c0_138, %c0_139] : memref<9x128x128xbf16, #tpu.memory_space<vmem>>, vector<1x128x128xbf16>
    %142 = vector.shape_cast %141 : vector<1x128x128xbf16> to vector<128x128xbf16>
    %cst_140 = arith.constant dense<0.000000e+00> : vector<24x128xf32>
    %143 = tpu.matmul %140, %142, %cst_140 {dimension_numbers = #tpu.dot_dimension_numbers<[1], [0], [0], [1], [0, 0, 1, 1], [], []>} : vector<24x128xbf16>, vector<128x128xbf16>, vector<24x128xf32> -> vector<24x128xf32>
    %144 = arith.addf %139, %143 : vector<24x128xf32>
    %c14_141 = arith.constant 14 : index
    %c0_142 = arith.constant 0 : index
    %145 = vector.load %arg11[%c14_141, %c0_142] : memref<40x128xbf16, #tpu.memory_space<vmem>>, vector<24x128xbf16>
    %c6_143 = arith.constant 6 : index
    %c0_144 = arith.constant 0 : index
    %c0_145 = arith.constant 0 : index
    %146 = vector.load %arg5[%c6_143, %c0_144, %c0_145] : memref<9x128x128xbf16, #tpu.memory_space<vmem>>, vector<1x128x128xbf16>
    %147 = vector.shape_cast %146 : vector<1x128x128xbf16> to vector<128x128xbf16>
    %cst_146 = arith.constant dense<0.000000e+00> : vector<24x128xf32>
    %148 = tpu.matmul %145, %147, %cst_146 {dimension_numbers = #tpu.dot_dimension_numbers<[1], [0], [0], [1], [0, 0, 1, 1], [], []>} : vector<24x128xbf16>, vector<128x128xbf16>, vector<24x128xf32> -> vector<24x128xf32>
    %149 = arith.addf %144, %148 : vector<24x128xf32>
    %c15_147 = arith.constant 15 : index
    %c0_148 = arith.constant 0 : index
    %150 = vector.load %arg11[%c15_147, %c0_148] : memref<40x128xbf16, #tpu.memory_space<vmem>>, vector<24x128xbf16>
    %c7_149 = arith.constant 7 : index
    %c0_150 = arith.constant 0 : index
    %c0_151 = arith.constant 0 : index
    %151 = vector.load %arg5[%c7_149, %c0_150, %c0_151] : memref<9x128x128xbf16, #tpu.memory_space<vmem>>, vector<1x128x128xbf16>
    %152 = vector.shape_cast %151 : vector<1x128x128xbf16> to vector<128x128xbf16>
    %cst_152 = arith.constant dense<0.000000e+00> : vector<24x128xf32>
    %153 = tpu.matmul %150, %152, %cst_152 {dimension_numbers = #tpu.dot_dimension_numbers<[1], [0], [0], [1], [0, 0, 1, 1], [], []>} : vector<24x128xbf16>, vector<128x128xbf16>, vector<24x128xf32> -> vector<24x128xf32>
    %154 = arith.addf %149, %153 : vector<24x128xf32>
    %c16_153 = arith.constant 16 : index
    %c0_154 = arith.constant 0 : index
    %155 = vector.load %arg11[%c16_153, %c0_154] : memref<40x128xbf16, #tpu.memory_space<vmem>>, vector<24x128xbf16>
    %c8_155 = arith.constant 8 : index
    %c0_156 = arith.constant 0 : index
    %c0_157 = arith.constant 0 : index
    %156 = vector.load %arg5[%c8_155, %c0_156, %c0_157] : memref<9x128x128xbf16, #tpu.memory_space<vmem>>, vector<1x128x128xbf16>
    %157 = vector.shape_cast %156 : vector<1x128x128xbf16> to vector<128x128xbf16>
    %cst_158 = arith.constant dense<0.000000e+00> : vector<24x128xf32>
    %158 = tpu.matmul %155, %157, %cst_158 {dimension_numbers = #tpu.dot_dimension_numbers<[1], [0], [0], [1], [0, 0, 1, 1], [], []>} : vector<24x128xbf16>, vector<128x128xbf16>, vector<24x128xf32> -> vector<24x128xf32>
    %159 = arith.addf %154, %158 : vector<24x128xf32>
    %160 = vector.broadcast %2 : vector<1x128xf32> to vector<24x128xf32>
    %161 = arith.addf %159, %160 : vector<24x128xf32>
    %cst_159 = arith.constant 0.000000e+00 : f32
    %162 = vector.broadcast %cst_159 : f32 to vector<24x128xf32>
    %163 = arith.cmpf ogt, %161, %162 : vector<24x128xf32>
    %cst_160 = arith.constant 1.000000e-01 : f32
    %164 = vector.broadcast %cst_160 : f32 to vector<24x128xf32>
    %165 = arith.mulf %164, %161 : vector<24x128xf32>
    %166 = arith.select %163, %161, %165 : vector<24x128xi1>, vector<24x128xf32>
    %167 = arith.truncf %166 : vector<24x128xf32> to vector<24x128xbf16>
    %c0_161 = arith.constant 0 : index
    %c0_162 = arith.constant 0 : index
    %168 = vector.load %arg12[%c0_161, %c0_162] : memref<24x128xbf16, #tpu.memory_space<vmem>>, vector<24x128xbf16>
    tpu.vector_store %arg12[%c0_161, %c0_162], %167 {strides = array<i32>} : memref<24x128xbf16, #tpu.memory_space<vmem>>, vector<24x128xbf16>,
    %c0_163 = arith.constant 0 : index
    %c0_164 = arith.constant 0 : index
    %169 = vector.load %arg12[%c0_163, %c0_164] : memref<24x128xbf16, #tpu.memory_space<vmem>>, vector<24x128xbf16>
    %c0_165 = arith.constant 0 : index
    %c0_166 = arith.constant 0 : index
    %170 = vector.load %arg6[%c0_165, %c0_166] : memref<128x128xbf16, #tpu.memory_space<vmem>>, vector<128x128xbf16>
    %cst_167 = arith.constant dense<0.000000e+00> : vector<24x128xf32>
    %171 = tpu.matmul %169, %170, %cst_167 {dimension_numbers = #tpu.dot_dimension_numbers<[1], [0], [0], [1], [0, 0, 1, 1], [], []>} : vector<24x128xbf16>, vector<128x128xbf16>, vector<24x128xf32> -> vector<24x128xf32>
    %172 = vector.broadcast %3 : vector<1x128xf32> to vector<24x128xf32>
    %173 = arith.addf %171, %172 : vector<24x128xf32>
    %174 = tpu.iota {dimensions = array<i32: 1>} : vector<24x128xi32>
    %cst_168 = arith.constant 0.000000e+00 : f32
    %175 = vector.broadcast %cst_168 : f32 to vector<24x128xf32>
    %176 = arith.subf %175, %173 : vector<24x128xf32>
    %177 = math.exp %176 : vector<24x128xf32>
    %cst_169 = arith.constant 1.000000e+00 : f32
    %178 = vector.broadcast %cst_169 : f32 to vector<24x128xf32>
    %179 = arith.addf %178, %177 : vector<24x128xf32>
    %cst_170 = arith.constant 1.000000e+00 : f32
    %180 = vector.broadcast %cst_170 : f32 to vector<24x128xf32>
    %181 = arith.divf %180, %179 : vector<24x128xf32>
    %c0_i32 = arith.constant 0 : i32
    %182 = vector.broadcast %c0_i32 : i32 to vector<24x128xi32>
    %183 = arith.cmpi eq, %174, %182 : vector<24x128xi32>
    %184 = arith.select %183, %181, %173 : vector<24x128xi1>, vector<24x128xf32>
    %c0_171 = arith.constant 0 : index
    %c0_172 = arith.constant 0 : index
    %185 = vector.load %arg8[%c0_171, %c0_172] : memref<24x128xf32, #tpu.memory_space<vmem>>, vector<24x128xf32>
    tpu.vector_store %arg8[%c0_171, %c0_172], %184 {strides = array<i32>} : memref<24x128xf32, #tpu.memory_space<vmem>>, vector<24x128xf32>,
    return
  }
  func.func @transform_0(%arg0: i32) -> (i32, i32) {
    %c0_i32 = arith.constant 0 : i32
    %c0_i32_0 = arith.constant 0 : i32
    return %arg0, %c0_i32 : i32, i32
  }
  func.func @transform_1(%arg0: i32) -> (i32, i32) {
    %c0_i32 = arith.constant 0 : i32
    %c0_i32_0 = arith.constant 0 : i32
    %c0_i32_1 = arith.constant 0 : i32
    return %c0_i32, %c0_i32_0 : i32, i32
  }
  func.func @transform_2(%arg0: i32) -> (i32, i32, i32) {
    %c0_i32 = arith.constant 0 : i32
    %c0_i32_0 = arith.constant 0 : i32
    %c0_i32_1 = arith.constant 0 : i32
    %c0_i32_2 = arith.constant 0 : i32
    return %c0_i32, %c0_i32_0, %c0_i32_1 : i32, i32, i32
  }
  func.func @transform_3(%arg0: i32) -> (i32, i32, i32) {
    %c0_i32 = arith.constant 0 : i32
    %c0_i32_0 = arith.constant 0 : i32
    %c0_i32_1 = arith.constant 0 : i32
    %c0_i32_2 = arith.constant 0 : i32
    return %c0_i32, %c0_i32_0, %c0_i32_1 : i32, i32, i32
  }
  func.func @transform_4(%arg0: i32) -> (i32, i32, i32) {
    %c0_i32 = arith.constant 0 : i32
    %c0_i32_0 = arith.constant 0 : i32
    %c0_i32_1 = arith.constant 0 : i32
    %c0_i32_2 = arith.constant 0 : i32
    return %c0_i32, %c0_i32_0, %c0_i32_1 : i32, i32, i32
  }
  func.func @transform_5(%arg0: i32) -> (i32, i32) {
    %c0_i32 = arith.constant 0 : i32
    %c0_i32_0 = arith.constant 0 : i32
    %c0_i32_1 = arith.constant 0 : i32
    return %c0_i32, %c0_i32_0 : i32, i32
  }
  func.func @transform_6(%arg0: i32) -> (i32, i32) {
    %c0_i32 = arith.constant 0 : i32
    %c0_i32_0 = arith.constant 0 : i32
    %c0_i32_1 = arith.constant 0 : i32
    return %c0_i32, %c0_i32_0 : i32, i32
  }
  func.func @transform_7(%arg0: i32) -> (i32, i32) {
    %c0_i32 = arith.constant 0 : i32
    %c0_i32_0 = arith.constant 0 : i32
    return %arg0, %c0_i32 : i32, i32
  }
}

</mosaic_0001>

<bundles_post_ra>
// kernel: pnet_forward.1
= control target key start
LH: loop header
LB: loop body
LE: loop exit
PB: predicated region body
PF: predicated region fallthrough
CT: control target
= control target key end

     0   :  { %s5798_s24 = smov 0   ;;  %s7347_s0 = inlined_call_operand.vmem [shape: bf16[400,128], index: 0, kind: input, shape index: {}]   ;;  %s7348_s1 = inlined_call_operand.vmem [shape: bf16[128,128], index: 1, kind: input, shape index: {}]   ;;  %s7349_s2 = inlined_call_operand.vmem [shape: bf16[9,56,200], index: 2, kind: input, shape index: {}]   ;;  %s7350_s3 = inlined_call_operand.vmem [shape: bf16[9,128,128], index: 3, kind: input, shape index: {}]   ;;  %s7351_s4 = inlined_call_operand.vmem [shape: bf16[9,128,128], index: 4, kind: input, shape index: {}]   ;;  %s7352_s5 = inlined_call_operand.vmem [shape: bf16[128,128], index: 5, kind: input, shape index: {}]   ;;  %s7353_s6 = inlined_call_operand.vmem [shape: f32[4,128], index: 6, kind: input, shape index: {}]   ;;  %s7354_s7 = inlined_call_operand.vmem [shape: f32[48,128], index: 7, kind: output, shape index: {}]  }
   0x1 LB: > { %s4035_s25 = sadd.s32 4294967295, %s5756_s24   ;;  %p4039_p0 = scmp.ge.s32.totalorder %s5756_s24, 1  ;;  %s5756_s24 = sphi %s5798_s24, %s17_s24  }
   0x2   : > { %p238_p1 = scmp.lt.s32.totalorder %s5756_s24, 3 }
   0x4   : > { %p239_p2 = pnand %p4039_p0, %p238_p1 }
   0x5   : > { %s270_s11 = smul.u32 (!%p239_p2), 25, %s4035_s25 }
   0x6   : > { %242 = sbr.rel (%p239_p2) target bundleno = 1585 (0x631), region = 48 }
   0x7   : > { %p271_p3 = scmp.lt.s32.totalorder (!%p239_p2), %s270_s11, 49  ;;  %s276_s26 = smul.u32 (!%p239_p2), 3, %s4035_s25 }
   0x9   : > { %p277_p4 = scmp.lt.s32.totalorder (!%p239_p2), %s276_s26, 5 }
   0xb   : > { %v5367_v0 = vld [vmem:[%s7348_s1 + $0x38] sm:$0xff]  ;;  %v5366_v1 = vld [vmem:[%s7348_s1 + $0x30] sm:$0xff]  ;;  %v5365_v2 = vld [vmem:[%s7348_s1 + $0x28] sm:$0xff]  ;;  %s7356_s11 = smov (!%p271_p3, %s270_s11), 49  ;;  %s7358_s26 = smov (!%p277_p4, %s276_s26), 5 }
   0xc   : > { %453 = vmatpush.bf16.msra.mxu0 %v5367_v0  ;;  %v5364_v3 = vld [vmem:[%s7348_s1 + $0x20] sm:$0xff]  ;;  %v5363_v4 = vld [vmem:[%s7348_s1 + $0x18] sm:$0xff]  ;;  %v5362_v5 = vld [vmem:[%s7348_s1 + $0x10] sm:$0xff]  ;;  %s4040_s18 = sshll.u32 %s7356_s11, 2  ;;  %s4041_s25 = sshll.u32 %s7358_s26, 3 }
   0xd   : > { %v5361_v6 = vld [vmem:[%s7348_s1 + $0x8] sm:$0xff]  ;;  %v5360_v7 = vld [vmem:[%s7348_s1] sm:$0xff]  ;;  %s5835_s23 = scalar_lea.vmem %s7347_s0, %s4040_s18  ;;  %s7335_s29 = scalar_lea.vmem %s7354_s7, %s4041_s25 }
   0xe   : > { %v5348_v8 = vld [vmem:[%s5835_s23] sm:$0xff]  ;;  %v5349_v9 = vld [vmem:[%s5835_s23 + $0x8] sm:$0xff]  ;;  %v5350_v10 = vld [vmem:[%s5835_s23 + $0x10] sm:$0xff] }
   0xf   : > { %v5351_v11 = vld [vmem:[%s5835_s23 + $0x18] sm:$0xff]  ;;  %v5352_v12 = vld [vmem:[%s5835_s23 + $0x20] sm:$0xff]  ;;  %v5353_v13 = vld [vmem:[%s5835_s23 + $0x28] sm:$0xff] }
  0x10   : > { %454 = vmatpush.bf16.msra.mxu0 %v5366_v1  ;;  %v5354_v14 = vld [vmem:[%s5835_s23 + $0x30] sm:$0xff]  ;;  %v5355_v15 = vld [vmem:[%s5835_s23 + $0x38] sm:$0xff]  ;;  %v5356_v16 = vld [vmem:[%s5835_s23 + $0x40] sm:$0xff] }
  0x11   : > { %v5849_v18 = vld [vmem:[%s7353_s6] ss:$0 sm:$0xff]  ;;  %v5357_v27 = vld [vmem:[%s5835_s23 + $0x48] sm:$0xff]  ;;  %v5358_v37 = vld [vmem:[%s5835_s23 + $0x50] sm:$0xff] }
  0x12   : > { %v5359_v47 = vld [vmem:[%s5835_s23 + $0x58] sm:$0xff]  ;;  %v311_v51 = vld [vmem:[%s5835_s23 + $0x60] sm:$0xf] }
  0x13   : > { %v378_v55 = vunpack.c.l.b16 %v311_v51 }
  0x14   : > { %455 = vmatpush.bf16.msra.mxu0 %v5365_v2 }
  0x15   : > { %v391_v59 = vpack.c.b16 %v378_v55, %v378_v55 }
  0x18   : > { %456 = vmatpush.bf16.msra.mxu0 %v5364_v3 }
  0x1c   : > { %457 = vmatpush.bf16.msra.mxu0 %v5363_v4 }
  0x20   : > { %458 = vmatpush.bf16.msra.mxu0 %v5362_v5 }
  0x24   : > { %459 = vmatpush.bf16.msra.mxu0 %v5361_v6 }
  0x28   : > { %460 = vmatpush.bf16.msra.mxu0 %v5360_v7 }
  0x2b   : > { %461 = vmatmul.bf16.vlgmr.msra.gmra.mxu0 %v5348_v8 }
  0x3b   : > { %466 = vmatmul.bf16.gmra.mxu0 %v5349_v9 }
  0x4b   : > { %471 = vmatmul.bf16.gmra.mxu0 %v5350_v10 }
  0x5b   : > { %476 = vmatmul.bf16.gmra.mxu0 %v5351_v11 }
  0x6b   : > { %481 = vmatmul.bf16.gmra.mxu0 %v5352_v12 }
  0x7b   : > { %486 = vmatmul.bf16.gmra.mxu0 %v5353_v13 }
  0x8b   : > { %491 = vmatmul.bf16.gmra.mxu0 %v5354_v14 }
  0x9b   : > { %496 = vmatmul.bf16.gmra.mxu0 %v5355_v15 }
  0xa8   : > { %v462_v17 = vpop.f32.mrf.mxu0 }
  0xa9   : > { %v463_v19 = vadd.f32 %v5849_v18, %v462_v17 }
  0xab   : > { %501 = vmatmul.bf16.gmra.mxu0 %v5356_v16  ;;  %v551_v21 = vmul.f32 0.1, %v463_v19  ;;  %vm526_vm0 = vcmp.gt.f32.partialorder %v463_v19, 0.0 }
  0xad   : > { %v576_v24 = vsel %vm526_vm0, %v463_v19, %v551_v21 }
  0xb0   : > { %v464_v20 = vpop.f32.mrf.mxu0 }
  0xb1   : > { %v465_v22 = vadd.f32 %v5849_v18, %v464_v20 }
  0xb3   : > { %vm527_vm1 = vcmp.gt.f32.partialorder %v465_v22, 0.0  ;;  %v552_v23 = vmul.f32 0.1, %v465_v22 }
  0xb5   : > { %v577_v25 = vsel %vm527_vm1, %v465_v22, %v552_v23 }
  0xb6   : > { %v5590_v26 = vpack.c.bf16 %v577_v25, %v576_v24 }
  0xb8   : > { %5591 = vst [vmem:[#allocation2] sm:$0xff] %v5590_v26   ;;  %v467_v28 = vpop.f32.mrf.mxu0 }
  0xb9   : > { %v468_v29 = vadd.f32 %v5849_v18, %v467_v28 }
  0xbb   : > { %506 = vmatmul.bf16.gmra.mxu0 %v5357_v27  ;;  %v553_v31 = vmul.f32 0.1, %v468_v29  ;;  %vm528_vm2 = vcmp.gt.f32.partialorder %v468_v29, 0.0 }
  0xbd   : > { %v578_v34 = vsel %vm528_vm2, %v468_v29, %v553_v31 }
  0xc0   : > { %v469_v30 = vpop.f32.mrf.mxu0 }
  0xc1   : > { %v470_v32 = vadd.f32 %v5849_v18, %v469_v30 }
  0xc3   : > { %vm529_vm3 = vcmp.gt.f32.partialorder %v470_v32, 0.0  ;;  %v554_v33 = vmul.f32 0.1, %v470_v32 }
  0xc5   : > { %v579_v35 = vsel %vm529_vm3, %v470_v32, %v554_v33 }
  0xc6   : > { %v5595_v36 = vpack.c.bf16 %v579_v35, %v578_v34 }
  0xc8   : > { %5701 = vst [vmem:[#allocation2 + $0x8] sm:$0xff] %v5595_v36   ;;  %v472_v38 = vpop.f32.mrf.mxu0 }
  0xc9   : > { %v473_v39 = vadd.f32 %v5849_v18, %v472_v38 }
  0xcb   : > { %511 = vmatmul.bf16.gmra.mxu0 %v5358_v37  ;;  %v555_v41 = vmul.f32 0.1, %v473_v39  ;;  %vm530_vm4 = vcmp.gt.f32.partialorder %v473_v39, 0.0 }
  0xcd   : > { %v580_v44 = vsel %vm530_vm4, %v473_v39, %v555_v41 }
  0xd0   : > { %v474_v40 = vpop.f32.mrf.mxu0 }
  0xd1   : > { %v475_v42 = vadd.f32 %v5849_v18, %v474_v40 }
  0xd3   : > { %vm531_vm5 = vcmp.gt.f32.partialorder %v475_v42, 0.0  ;;  %v556_v43 = vmul.f32 0.1, %v475_v42 }
  0xd5   : > { %v581_v45 = vsel %vm531_vm5, %v475_v42, %v556_v43 }
  0xd6   : > { %v5600_v46 = vpack.c.bf16 %v581_v45, %v580_v44 }
  0xd8   : > { %5702 = vst [vmem:[#allocation2 + $0x10] sm:$0xff] %v5600_v46   ;;  %v477_v48 = vpop.f32.mrf.mxu0 }
  0xd9   : > { %v478_v49 = vadd.f32 %v5849_v18, %v477_v48 }
  0xdb   : > { %516 = vmatmul.bf16.gmra.mxu0 %v5359_v47  ;;  %v557_v52 = vmul.f32 0.1, %v478_v49  ;;  %vm532_vm6 = vcmp.gt.f32.partialorder %v478_v49, 0.0 }
  0xdd   : > { %v582_v56 = vsel %vm532_vm6, %v478_v49, %v557_v52 }
  0xdf   : > { %v5900_v52 = vld [vmem:[#allocation2 + $0x10] sm:$0xff] }
  0xe0   : > { %v479_v50 = vpop.f32.mrf.mxu0 }
  0xe1   : > { %v480_v53 = vadd.f32 %v5849_v18, %v479_v50 }
  0xe3   : > { %vm533_vm7 = vcmp.gt.f32.partialorder %v480_v53, 0.0  ;;  %v558_v54 = vmul.f32 0.1, %v480_v53 }
  0xe5   : > { %v583_v57 = vsel %vm533_vm7, %v480_v53, %v558_v54 }
  0xe6   : > { %v5605_v58 = vpack.c.bf16 %v583_v57, %v582_v56  ;;  %v5905_v57 = vld [vmem:[#allocation2 + $0x8] sm:$0xff] }
  0xe8   : > { %5703 = vst [vmem:[#allocation2 + $0x18] sm:$0xff] %v5605_v58   ;;  %v482_v60 = vpop.f32.mrf.mxu0 }
  0xe9   : > { %v483_v61 = vadd.f32 %v5849_v18, %v482_v60  ;;  %v5381_v60 = vld [vmem:[%s7349_s2 + $0x4] sm:$0xf0] }
  0xeb   : > { %521 = vmatmul.bf16.gmra.mxu0 %v391_v59  ;;  %v559_v63 = vmul.f32 0.1, %v483_v61  ;;  %vm534_vm8 = vcmp.gt.f32.partialorder %v483_v61, 0.0  ;;  %v4124_v59 = vld [vmem:[%s7349_s2] sm:$0xf] }
  0xed   : > { %v584_v2 = vsel %vm534_vm8, %v483_v61, %v559_v63  ;;  %v4207_v61 = vld [vmem:[%s7349_s2 + $0x38] sm:$0xf]  ;;  %v5922_v63 = vld [vmem:[#allocation2] sm:$0xff] }
  0xef   : > { %v5894_v48 = vld [vmem:[#allocation2 + $0x18] sm:$0xff] }
  0xf0   : > { %v484_v62 = vpop.f32.mrf.mxu0 }
  0xf1   : > { %v485_v0 = vadd.f32 %v5849_v18, %v484_v62  ;;  %v5387_v62 = vld [vmem:[%s7349_s2 + $0x3c] sm:$0xf0] }
  0xf3   : > { %vm535_vm9 = vcmp.gt.f32.partialorder %v485_v0, 0.0  ;;  %v560_v1 = vmul.f32 0.1, %v485_v0 }
  0xf5   : > { %v585_v3 = vsel %vm535_vm9, %v485_v0, %v560_v1  ;;  %v4125_v0 = vor.u32 %v5381_v60, %v4124_v59  ;;  %v4208_v1 = vor.u32 %v5387_v62, %v4207_v61  ;;  %vm804_vm9 = vcmask 1043456   ;;  %v4242_v59 = vld [vmem:[%s7349_s2 + $0x70] sm:$0xf]  ;;  %v5393_v60 = vld [vmem:[%s7349_s2 + $0x74] sm:$0xf0] }
  0xf6   : > { %v5610_v4 = vpack.c.bf16 %v585_v3, %v584_v2  ;;  %v5392_v61 = vld [vmem:[%s7349_s2 + $0x74] sm:$0xf]  ;;  %v4244_v62 = vld [vmem:[%s7349_s2 + $0x78] sm:$0xf0] }
  0xf8   : > { %5704 = vst [vmem:[#allocation2 + $0x20] sm:$0xff] %v5610_v4   ;;  %v487_v5 = vpop.f32.mrf.mxu0 }
  0xf9   : > { %v488_v6 = vadd.f32 %v5849_v18, %v487_v5 }
  0xfb   : > { %v561_v8 = vmul.f32 0.1, %v488_v6  ;;  %vm536_vm10 = vcmp.gt.f32.partialorder %v488_v6, 0.0 }
  0xfd   : > { %v586_v11 = vsel %vm536_vm10, %v488_v6, %v561_v8  ;;  %vm791_vm10 = vcmask 588800  }
  0xff   : > { %v5888_v46 = vld [vmem:[#allocation2 + $0x20] sm:$0xff] }
 0x100   : > { %v489_v7 = vpop.f32.mrf.mxu0 }
 0x101   : > { %v490_v9 = vadd.f32 %v5849_v18, %v489_v7 }
 0x103   : > { %vm537_vm11 = vcmp.gt.f32.partialorder %v490_v9, 0.0  ;;  %v562_v10 = vmul.f32 0.1, %v490_v9 }
 0x105   : > { %v587_v12 = vsel %vm537_vm11, %v490_v9, %v562_v10 }
 0x106   : > { %v5615_v13 = vpack.c.bf16 %v587_v12, %v586_v11  ;;  %v4132_v11 = vld [vmem:[%s7349_s2 + $0x10] sm:$0xf]  ;;  %v5383_v12 = vld [vmem:[%s7349_s2 + $0x14] sm:$0xf0] }
 0x108   : > { %5705 = vst [vmem:[#allocation2 + $0x28] sm:$0xff] %v5615_v13   ;;  %v492_v14 = vpop.f32.mrf.mxu0  ;;  %v4215_v13 = vld [vmem:[%s7349_s2 + $0x48] sm:$0xf] }
 0x109   : > { %v493_v15 = vadd.f32 %v5849_v18, %v492_v14  ;;  %v5389_v14 = vld [vmem:[%s7349_s2 + $0x4c] sm:$0xf0] }
 0x10b   : > { %v563_v17 = vmul.f32 0.1, %v493_v15  ;;  %vm538_vm12 = vcmp.gt.f32.partialorder %v493_v15, 0.0 }
 0x10d   : > { %v588_v21 = vsel %vm538_vm12, %v493_v15, %v563_v17  ;;  %v4133_v15 = vor.u32 %v5383_v12, %v4132_v11 }
 0x10f   : > { %v5883_v44 = vld [vmem:[#allocation2 + $0x28] sm:$0xff] }
 0x110   : > { %v494_v16 = vpop.f32.mrf.mxu0 }
 0x111   : > { %v495_v19 = vadd.f32 %v5849_v18, %v494_v16  ;;  %v4216_v16 = vor.u32 %v5389_v14, %v4215_v13  ;;  %v5384_v13 = vld [vmem:[%s7349_s2 + $0x24] sm:$0xf]  ;;  %v4142_v14 = vld [vmem:[%s7349_s2 + $0x28] sm:$0xf0] }
 0x113   : > { %vm539_vm13 = vcmp.gt.f32.partialorder %v495_v19, 0.0  ;;  %v564_v20 = vmul.f32 0.1, %v495_v19 }
 0x115   : > { %v589_v22 = vsel %vm539_vm13, %v495_v19, %v564_v20 }
 0x116   : > { %v5620_v23 = vpack.c.bf16 %v589_v22, %v588_v21 }
 0x118   : > { %5706 = vst [vmem:[#allocation2 + $0x30] sm:$0xff] %v5620_v23   ;;  %v497_v24 = vpop.f32.mrf.mxu0 }
 0x119   : > { %v498_v25 = vadd.f32 %v5849_v18, %v497_v24 }
 0x11b   : > { %v565_v27 = vmul.f32 0.1, %v498_v25  ;;  %vm540_vm14 = vcmp.gt.f32.partialorder %v498_v25, 0.0 }
 0x11d   : > { %v590_v30 = vsel %vm540_vm14, %v498_v25, %v565_v27  ;;  %v4140_v27 = vld [vmem:[%s7349_s2 + $0x20] sm:$0xf] }
 0x11f   : > { %v5878_v39 = vld [vmem:[#allocation2 + $0x30] sm:$0xff] }
 0x120   : > { %v499_v26 = vpop.f32.mrf.mxu0 }
 0x121   : > { %v500_v28 = vadd.f32 %v5849_v18, %v499_v26 }
 0x123   : > { %vm541_vm15 = vcmp.gt.f32.partialorder %v500_v28, 0.0  ;;  %v566_v29 = vmul.f32 0.1, %v500_v28 }
 0x125   : > { %v591_v31 = vsel %vm541_vm15, %v500_v28, %v566_v29  ;;  %v5385_v29 = vld [vmem:[%s7349_s2 + $0x24] sm:$0xf0]  ;;  %vm2075_vm15 = vcmask 1046528  }
 0x126   : > { %v5625_v32 = vpack.c.bf16 %v591_v31, %v590_v30  ;;  %v4223_v30 = vld [vmem:[%s7349_s2 + $0x58] sm:$0xf]  ;;  %v5391_v31 = vld [vmem:[%s7349_s2 + $0x5c] sm:$0xf0] }
 0x128   : > { %5707 = vst [vmem:[#allocation2 + $0x38] sm:$0xff] %v5625_v32   ;;  %v502_v33 = vpop.f32.mrf.mxu0 }
 0x129   : > { %v503_v34 = vadd.f32 %v5849_v18, %v502_v33  ;;  %v4141_v33 = vor.u32 %v5385_v29, %v4140_v27 }
 0x12b   : > { %v567_v37 = vmul.f32 0.1, %v503_v34  ;;  %vm542_vm0 = vcmp.gt.f32.partialorder %v503_v34, 0.0 }
 0x12d   : > { %v592_v41 = vsel %vm542_vm0, %v503_v34, %v567_v37  ;;  %vm1881_vm0 = vsmask.f32 7424 }
 0x12f   : > { %v5872_v35 = vld [vmem:[#allocation2 + $0x38] sm:$0xff] }
 0x130   : > { %v504_v36 = vpop.f32.mrf.mxu0  ;;  %808 = vmatpush.bf16.msra.mxu1 %v5872_v35  ;;  %917 = vmatpush.bf16.msra.mxu3 %v5872_v35 }
 0x131   : > { %v505_v38 = vadd.f32 %v5849_v18, %v504_v36  ;;  %1497 = vmatpush.bf16.msrb.mxu0 %v5872_v35 }
 0x133   : > { %vm543_vm1 = vcmp.gt.f32.partialorder %v505_v38, 0.0  ;;  %v568_v40 = vmul.f32 0.1, %v505_v38 }
 0x134   : > { %809 = vmatpush.bf16.msra.mxu1 %v5878_v39  ;;  %918 = vmatpush.bf16.msra.mxu3 %v5878_v39 }
 0x135   : > { %v593_v42 = vsel %vm543_vm1, %v505_v38, %v568_v40  ;;  %1498 = vmatpush.bf16.msrb.mxu0 %v5878_v39  ;;  %v5975_v38 = vld [vmem:[%s7349_s2 + $0x30] sm:$0xff]  ;;  %v5980_v40 = vld [vmem:[%s7349_s2 + $0x68] sm:$0xff] }
 0x136   : > { %v5630_v43 = vpack.c.bf16 %v593_v42, %v592_v41 }
 0x138   : > { %5708 = vst [vmem:[#allocation2 + $0x40] sm:$0xff] %v5630_v43   ;;  %v507_v45 = vpop.f32.mrf.mxu0  ;;  %810 = vmatpush.bf16.msra.mxu1 %v5883_v44  ;;  %919 = vmatpush.bf16.msra.mxu3 %v5883_v44  ;;  %v702_v43 = vunpack.c.l.b16 %v5975_v38 }
 0x139   : > { %1499 = vmatpush.bf16.msrb.mxu0 %v5883_v44  ;;  %v508_v47 = vadd.f32 %v5849_v18, %v507_v45  ;;  %v891_v45 = vunpack.c.l.b16 %v5980_v40 }
 0x13b   : > { %v569_v50 = vmul.f32 0.1, %v508_v47  ;;  %vm544_vm2 = vcmp.gt.f32.partialorder %v508_v47, 0.0 }
 0x13c   : > { %811 = vmatpush.bf16.msra.mxu1 %v5888_v46  ;;  %920 = vmatpush.bf16.msra.mxu3 %v5888_v46 }
 0x13d   : > { %1500 = vmatpush.bf16.msrb.mxu0 %v5888_v46  ;;  %v594_v54 = vsel %vm544_vm2, %v508_v47, %v569_v50  ;;  %v710_v50 = vpack.c.b16 %v702_v43, %v702_v43 }
 0x140   : > { %v509_v49 = vpop.f32.mrf.mxu0  ;;  %812 = vmatpush.bf16.msra.mxu1 %v5894_v48  ;;  %921 = vmatpush.bf16.msra.mxu3 %v5894_v48 }
 0x141   : > { %v510_v51 = vadd.f32 %v5849_v18, %v509_v49  ;;  %1501 = vmatpush.bf16.msrb.mxu0 %v5894_v48 }
 0x143   : > { %vm545_vm3 = vcmp.gt.f32.partialorder %v510_v51, 0.0  ;;  %v570_v53 = vmul.f32 0.1, %v510_v51 }
 0x144   : > { %813 = vmatpush.bf16.msra.mxu1 %v5900_v52  ;;  %922 = vmatpush.bf16.msra.mxu3 %v5900_v52 }
 0x145   : > { %v595_v55 = vsel %vm545_vm3, %v510_v51, %v570_v53  ;;  %1502 = vmatpush.bf16.msrb.mxu0 %v5900_v52  ;;  %v899_v51 = vpack.c.b16 %v891_v45, %v891_v45 }
 0x146   : > { %v5635_v56 = vpack.c.bf16 %v595_v55, %v594_v54 }
 0x148   : > { %5709 = vst [vmem:[#allocation2 + $0x48] sm:$0xff] %v5635_v56   ;;  %v512_v58 = vpop.f32.mrf.mxu0  ;;  %814 = vmatpush.bf16.msra.mxu1 %v5905_v57  ;;  %923 = vmatpush.bf16.msra.mxu3 %v5905_v57  ;;  %v5380_v56 = vld [vmem:[%s7349_s2 + $0x4] sm:$0xf] }
 0x149   : > { %1503 = vmatpush.bf16.msrb.mxu0 %v5905_v57  ;;  %v513_v2 = vadd.f32 %v5849_v18, %v512_v58  ;;  %v4126_v58 = vld [vmem:[%s7349_s2 + $0x8] sm:$0xf0] }
 0x14b   : > { %v571_v4 = vmul.f32 0.1, %v513_v2  ;;  %vm546_vm4 = vcmp.gt.f32.partialorder %v513_v2, 0.0 }
 0x14c   : > { %815 = vmatpush.bf16.msra.mxu1 %v5922_v63  ;;  %924 = vmatpush.bf16.msra.mxu3 %v5922_v63 }
 0x14d   : > { %1504 = vmatpush.bf16.msrb.mxu0 %v5922_v63  ;;  %v596_v7 = vsel %vm546_vm4, %v513_v2, %v571_v4  ;;  %v4243_v2 = vor.u32 %v5393_v60, %v4242_v59  ;;  %v5382_v4 = vld [vmem:[%s7349_s2 + $0x14] sm:$0xf]  ;;  %vm2185_vm4 = vsmask.f32 4352 }
 0x14f   : > { %816 = vmatmul.bf16.vlgmr.msra.gmra.mxu1 %v4125_v0  ;;  %925 = vmatmul.bf16.vlgmr.msra.gmra.mxu3 %v4208_v1  ;;  %v5999_v55 = vld [vmem:[#allocation2 + $0x48] sm:$0xff]  ;;  %v6022_v0 = vld [vmem:[#allocation2 + $0x40] sm:$0xff]  ;;  %v4129_v1 = vor.u32 %v5380_v56, %v4126_v58 }
 0x150   : > { %1033 = vmatpush.bf16.msrb.mxu1 %v5872_v35  ;;  %v514_v3 = vpop.f32.mrf.mxu0  ;;  %v4287_v58 = vld [vmem:[%s7349_s2 + $0xc0] sm:$0xf0] }
 0x151   : > { %1729 = vmatpush.bf16.msra.mxu0 %v5872_v35  ;;  %v515_v5 = vadd.f32 %v5849_v18, %v514_v3  ;;  %v4247_v3 = vor.u32 %v5392_v61, %v4244_v62  ;;  %v4277_v61 = vld [vmem:[%s7349_s2 + $0xa8] sm:$0xf]  ;;  %v5399_v62 = vld [vmem:[%s7349_s2 + $0xac] sm:$0xf0] }
 0x153   : > { %vm547_vm5 = vcmp.gt.f32.partialorder %v515_v5, 0.0  ;;  %v572_v6 = vmul.f32 0.1, %v515_v5 }
 0x154   : > { %1034 = vmatpush.bf16.msrb.mxu1 %v5878_v39 }
 0x155   : > { %1730 = vmatpush.bf16.msra.mxu0 %v5878_v39  ;;  %v597_v8 = vsel %vm547_vm5, %v515_v5, %v572_v6  ;;  %v4134_v5 = vld [vmem:[%s7349_s2 + $0x18] sm:$0xf0]  ;;  %v4250_v6 = vld [vmem:[%s7349_s2 + $0x80] sm:$0xf]  ;;  %vm2550_vm5 = vcmask 1044480  }
 0x156   : > { %v5640_v9 = vpack.c.bf16 %v597_v8, %v596_v7  ;;  %v5395_v7 = vld [vmem:[%s7349_s2 + $0x84] sm:$0xf0]  ;;  %v5394_v8 = vld [vmem:[%s7349_s2 + $0x84] sm:$0xf] }
 0x157   : > { %v4251_v11 = vor.u32 %v5395_v7, %v4250_v6 }
 0x158   : > { %1035 = vmatpush.bf16.msrb.mxu1 %v5883_v44  ;;  %5710 = vst [vmem:[#allocation2 + $0x50] sm:$0xff] %v5640_v9   ;;  %v517_v10 = vpop.f32.mrf.mxu0  ;;  %v4252_v9 = vld [vmem:[%s7349_s2 + $0x88] sm:$0xf0] }
 0x159   : > { %1731 = vmatpush.bf16.msra.mxu0 %v5883_v44  ;;  %v518_v17 = vadd.f32 %v5849_v18, %v517_v10  ;;  %v4137_v10 = vor.u32 %v5382_v4, %v4134_v5  ;;  %v4255_v12 = vor.u32 %v5394_v8, %v4252_v9  ;;  %v4328_v4 = vld [vmem:[%s7349_s2 + $0x100] sm:$0xf]  ;;  %v5409_v5 = vld [vmem:[%s7349_s2 + $0x104] sm:$0xf0] }
 0x15a   : > { %v4329_v6 = vor.u32 %v5409_v5, %v4328_v4 }
 0x15b   : > { %v573_v20 = vmul.f32 0.1, %v518_v17  ;;  %vm548_vm6 = vcmp.gt.f32.partialorder %v518_v17, 0.0 }
 0x15c   : > { %1036 = vmatpush.bf16.msrb.mxu1 %v5888_v46 }
 0x15d   : > { %1732 = vmatpush.bf16.msra.mxu0 %v5888_v46  ;;  %v598_v23 = vsel %vm548_vm6, %v518_v17, %v573_v20  ;;  %v5396_v17 = vld [vmem:[%s7349_s2 + $0x94] sm:$0xf]  ;;  %v4145_v20 = vor.u32 %v5384_v13, %v4142_v14  ;;  %v4285_v14 = vld [vmem:[%s7349_s2 + $0xb8] sm:$0xf] }
 0x15f   : > { %821 = vmatmul.bf16.gmra.mxu1 %v4133_v15  ;;  %930 = vmatmul.bf16.gmra.mxu3 %v4216_v16  ;;  %v5994_v54 = vld [vmem:[#allocation2 + $0x50] sm:$0xff]  ;;  %v5397_v16 = vld [vmem:[%s7349_s2 + $0x94] sm:$0xf0] }
 0x160   : > { %1037 = vmatpush.bf16.msrb.mxu1 %v5894_v48  ;;  %v519_v19 = vpop.f32.mrf.mxu0  ;;  %v4258_v15 = vld [vmem:[%s7349_s2 + $0x90] sm:$0xf] }
 0x161   : > { %1733 = vmatpush.bf16.msra.mxu0 %v5894_v48  ;;  %v520_v21 = vadd.f32 %v5849_v18, %v519_v19  ;;  %v4260_v19 = vld [vmem:[%s7349_s2 + $0x98] sm:$0xf0] }
 0x163   : > { %vm549_vm7 = vcmp.gt.f32.partialorder %v520_v21, 0.0  ;;  %v574_v22 = vmul.f32 0.1, %v520_v21 }
 0x164   : > { %1038 = vmatpush.bf16.msrb.mxu1 %v5900_v52 }
 0x165   : > { %1734 = vmatpush.bf16.msra.mxu0 %v5900_v52  ;;  %v599_v24 = vsel %vm549_vm7, %v520_v21, %v574_v22  ;;  %v4259_v21 = vor.u32 %v5397_v16, %v4258_v15  ;;  %v4263_v22 = vor.u32 %v5396_v17, %v4260_v19  ;;  %v5401_v15 = vld [vmem:[%s7349_s2 + $0xbc] sm:$0xf0] }
 0x166   : > { %v5645_v25 = vpack.c.bf16 %v599_v24, %v598_v23  ;;  %v4239_v23 = vld [vmem:[%s7349_s2 + $0xa0] sm:$0xff]  ;;  %v703_v24 = vunpack.c.h.b16 %v5975_v38 }
 0x168   : > { %1039 = vmatpush.bf16.msrb.mxu1 %v5905_v57  ;;  %5711 = vst [vmem:[#allocation2 + $0x58] sm:$0xff] %v5645_v25   ;;  %v522_v26 = vpop.f32.mrf.mxu0  ;;  %v1007_v25 = vunpack.c.l.b16 %v4239_v23  ;;  %v711_v27 = vpack.c.b16 %v703_v24, %v703_v24  ;;  %v6227_v24 = vld [vmem:[%s7349_s2 + $0x110] sm:$0xff] }
 0x169   : > { %1735 = vmatpush.bf16.msra.mxu0 %v5905_v57  ;;  %v523_v28 = vadd.f32 %v5849_v18, %v522_v26  ;;  %v4224_v18 = vor.u32 %v5391_v31, %v4223_v30  ;;  %v1008_v26 = vunpack.c.h.b16 %v4239_v23  ;;  %v5386_v30 = vld [vmem:[%s7349_s2 + $0x3c] sm:$0xf]  ;;  %v4209_v31 = vld [vmem:[%s7349_s2 + $0x40] sm:$0xf0] }
 0x16b   : > { %vm550_vm8 = vcmp.gt.f32.partialorder %v523_v28, 0.0  ;;  %v575_v32 = vmul.f32 0.1, %v523_v28  ;;  %v1016_v29 = vpack.c.b16 %v1008_v26, %v1008_v26 }
 0x16c   : > { %1040 = vmatpush.bf16.msrb.mxu1 %v5922_v63 }
 0x16d   : > { %1736 = vmatpush.bf16.msra.mxu0 %v5922_v63  ;;  %v600_v34 = vsel %vm550_vm8, %v523_v28, %v575_v32  ;;  %v1015_v28 = vpack.c.b16 %v1007_v25, %v1007_v25  ;;  %v5398_v32 = vld [vmem:[%s7349_s2 + $0xac] sm:$0xf]  ;;  %v1239_v25 = vunpack.c.l.b16 %v6227_v24 }
 0x16e   : > { %v625_v36 = vpack.c.bf16 %v600_v34, %v600_v34  ;;  %v5405_v34 = vld [vmem:[%s7349_s2 + $0xe4] sm:$0xf0] }
 0x16f   : > { %826 = vmatmul.bf16.gmra.mxu1 %v4141_v33  ;;  %935 = vmatmul.bf16.gmra.mxu3 %v4224_v18  ;;  %v5989_v53 = vld [vmem:[#allocation2 + $0x58] sm:$0xff]  ;;  %v4279_v33 = vld [vmem:[%s7349_s2 + $0xb0] sm:$0xf0]  ;;  %v4312_v18 = vld [vmem:[%s7349_s2 + $0xe0] sm:$0xf] }
 0x170   : > { %650 = vst [vmem:[#allocation2 + $0x60] sm:$0xf] %v625_v36  ;;  %v524_v37 = vpop.f32.mrf.mxu0  ;;  %v4212_v36 = vor.u32 %v5386_v30, %v4209_v31  ;;  %v4313_v38 = vor.u32 %v5405_v34, %v4312_v18 }
 0x171   : > { %v4282_v37 = vor.u32 %v5398_v32, %v4279_v33  ;;  %v4293_v32 = vld [vmem:[%s7349_s2 + $0xc8] sm:$0xf]  ;;  %v5403_v33 = vld [vmem:[%s7349_s2 + $0xcc] sm:$0xf0] }
 0x177   : > { %v675_v41 = vld [vmem:[#allocation2 + $0x60] sm:$0xf] }
 0x178   : > { %v765_v42 = vunpack.c.l.b16 %v675_v41  ;;  %v5388_v41 = vld [vmem:[%s7349_s2 + $0x4c] sm:$0xf] }
 0x17a   : > { %v778_v47 = vpack.c.b16 %v765_v42, %v765_v42  ;;  %v4217_v42 = vld [vmem:[%s7349_s2 + $0x50] sm:$0xf0] }
 0x17c   : > { %v5984_v49 = vsel %vm804_vm9, %v778_v47, 0 }
 0x17d   : > { %839 = vmatpush.bf16.msra.mxu2 %v5984_v49  ;;  %1064 = vmatpush.bf16.msrb.mxu3 %v5984_v49 }
 0x17e   : > { %1180 = vmatpush.bf16.msra.mxu1 %v5984_v49 }
 0x17f   : > { %831 = vmatmul.bf16.gmra.mxu1 %v710_v50  ;;  %940 = vmatmul.bf16.gmra.mxu3 %v899_v51 }
 0x181   : > { %840 = vmatpush.bf16.msra.mxu2 %v5989_v53  ;;  %1065 = vmatpush.bf16.msrb.mxu3 %v5989_v53 }
 0x182   : > { %1181 = vmatpush.bf16.msra.mxu1 %v5989_v53 }
 0x185   : > { %841 = vmatpush.bf16.msra.mxu2 %v5994_v54  ;;  %1066 = vmatpush.bf16.msrb.mxu3 %v5994_v54 }
 0x186   : > { %1182 = vmatpush.bf16.msra.mxu1 %v5994_v54 }
 0x189   : > { %842 = vmatpush.bf16.msra.mxu2 %v5999_v55  ;;  %1067 = vmatpush.bf16.msrb.mxu3 %v5999_v55 }
 0x18a   : > { %1183 = vmatpush.bf16.msra.mxu1 %v5999_v55 }
 0x18d   : > { %843 = vmatpush.bf16.msra.mxu2 %v6022_v0  ;;  %1068 = vmatpush.bf16.msrb.mxu3 %v6022_v0 }
 0x18e   : > { %1184 = vmatpush.bf16.msra.mxu1 %v6022_v0 }
 0x18f   : > { %1041 = vmatmul.bf16.vlgmr.msrb.gmra.mxu1 %v4243_v2  ;;  %v4278_v2 = vor.u32 %v5399_v62, %v4277_v61  ;;  %v5412_v62 = vld [vmem:[%s7349_s2 + $0x12c] sm:$0xf] }
 0x190   : > { %4194 = vmatmul.msk.bf16.vlgmr.msra.gmra.mxu2 %vm791_vm10, %v4129_v1  ;;  %4264 = vmatmul.msk.bf16.vlgmr.msrb.gmra.mxu3 %vm791_vm10, %v4247_v3 }
 0x191   : > { %948 = vmatpush.bf16.msrb.mxu2 %v5984_v49  ;;  %1265 = vmatpush.bf16.msra.mxu3 %v5872_v35 }
 0x192   : > { %1381 = vmatpush.bf16.msrb.mxu1 %v5872_v35 }
 0x195   : > { %949 = vmatpush.bf16.msrb.mxu2 %v5989_v53  ;;  %1266 = vmatpush.bf16.msra.mxu3 %v5878_v39 }
 0x196   : > { %1382 = vmatpush.bf16.msrb.mxu1 %v5878_v39 }
 0x199   : > { %950 = vmatpush.bf16.msrb.mxu2 %v5994_v54  ;;  %1267 = vmatpush.bf16.msra.mxu3 %v5883_v44 }
 0x19a   : > { %1383 = vmatpush.bf16.msrb.mxu1 %v5883_v44 }
 0x19d   : > { %951 = vmatpush.bf16.msrb.mxu2 %v5999_v55  ;;  %1268 = vmatpush.bf16.msra.mxu3 %v5888_v46 }
 0x19e   : > { %1384 = vmatpush.bf16.msrb.mxu1 %v5888_v46 }
 0x19f   : > { %1046 = vmatmul.bf16.gmra.mxu1 %v4251_v11  ;;  %v4295_v11 = vld [vmem:[%s7349_s2 + $0xd0] sm:$0xf0] }
 0x1a0   : > { %4195 = vmatmul.msk.bf16.gmra.mxu2 %vm791_vm10, %v4137_v10  ;;  %4265 = vmatmul.msk.bf16.gmra.mxu3 %vm791_vm10, %v4255_v12  ;;  %v5402_v10 = vld [vmem:[%s7349_s2 + $0xcc] sm:$0xf] }
 0x1a1   : > { %952 = vmatpush.bf16.msrb.mxu2 %v6022_v0  ;;  %1269 = vmatpush.bf16.msra.mxu3 %v5894_v48  ;;  %v4298_v13 = vor.u32 %v5402_v10, %v4295_v11  ;;  %v4355_v10 = vld [vmem:[%s7349_s2 + $0x128] sm:$0xf]  ;;  %v5413_v11 = vld [vmem:[%s7349_s2 + $0x12c] sm:$0xf0] }
 0x1a2   : > { %1385 = vmatpush.bf16.msrb.mxu1 %v5894_v48 }
 0x1a5   : > { %1149 = vmatpush.bf16.msra.mxu2 %v5872_v35  ;;  %1270 = vmatpush.bf16.msra.mxu3 %v5900_v52 }
 0x1a6   : > { %1386 = vmatpush.bf16.msrb.mxu1 %v5900_v52 }
 0x1a9   : > { %1150 = vmatpush.bf16.msra.mxu2 %v5878_v39  ;;  %1271 = vmatpush.bf16.msra.mxu3 %v5905_v57 }
 0x1aa   : > { %1387 = vmatpush.bf16.msrb.mxu1 %v5905_v57 }
 0x1ad   : > { %1151 = vmatpush.bf16.msra.mxu2 %v5883_v44  ;;  %1272 = vmatpush.bf16.msra.mxu3 %v5922_v63 }
 0x1ae   : > { %1388 = vmatpush.bf16.msrb.mxu1 %v5922_v63 }
 0x1af   : > { %1051 = vmatmul.bf16.gmra.mxu1 %v4259_v21 }
 0x1b0   : > { %4196 = vmatmul.msk.bf16.gmra.mxu2 %vm791_vm10, %v4145_v20  ;;  %4266 = vmatmul.msk.bf16.gmra.mxu3 %vm791_vm10, %v4263_v22  ;;  %v4286_v20 = vor.u32 %v5401_v15, %v4285_v14  ;;  %v4274_v22 = vld [vmem:[%s7349_s2 + $0xd8] sm:$0xff]  ;;  %v4314_v14 = vld [vmem:[%s7349_s2 + $0xe8] sm:$0xf0]  ;;  %v4356_v15 = vor.u32 %v5413_v11, %v4355_v10 }
 0x1b1   : > { %1152 = vmatpush.bf16.msra.mxu2 %v5888_v46  ;;  %1412 = vmatpush.bf16.msrb.mxu3 %v5984_v49  ;;  %v1124_v23 = vunpack.c.h.b16 %v4274_v22 }
 0x1b3   : > { %v1132_v30 = vpack.c.b16 %v1124_v23, %v1124_v23 }
 0x1b5   : > { %1153 = vmatpush.bf16.msra.mxu2 %v5894_v48  ;;  %1413 = vmatpush.bf16.msrb.mxu3 %v5989_v53 }
 0x1b9   : > { %1154 = vmatpush.bf16.msra.mxu2 %v5900_v52  ;;  %1414 = vmatpush.bf16.msrb.mxu3 %v5994_v54 }
 0x1bd   : > { %1155 = vmatpush.bf16.msra.mxu2 %v5905_v57  ;;  %1415 = vmatpush.bf16.msrb.mxu3 %v5999_v55 }
 0x1bf   : > { %1056 = vmatmul.bf16.gmra.mxu1 %v1015_v28  ;;  %v1247_v28 = vpack.c.b16 %v1239_v25, %v1239_v25  ;;  %v5414_v25 = vld [vmem:[%s7349_s2 + $0x13c] sm:$0xf] }
 0x1c0   : > { %4197 = vmatmul.msk.bf16.gmra.mxu2 %vm791_vm10, %v711_v27  ;;  %4267 = vmatmul.msk.bf16.gmra.mxu3 %vm791_vm10, %v1016_v29 }
 0x1c1   : > { %1156 = vmatpush.bf16.msra.mxu2 %v5922_v63  ;;  %1416 = vmatpush.bf16.msrb.mxu3 %v6022_v0 }
 0x1cf   : > { %4299 = vmatmul.msk.bf16.vlgmr.msra.gmra.mxu1 %vm791_vm10, %v4282_v37  ;;  %v4294_v37 = vor.u32 %v5403_v33, %v4293_v32 }
 0x1d0   : > { %4229 = vmatmul.msk.bf16.vlgmr.msrb.gmra.mxu2 %vm791_vm10, %v4212_v36  ;;  %1273 = vmatmul.bf16.vlgmr.msra.gmra.mxu3 %v4313_v38 }
 0x1d1   : > { %1296 = vmatpush.bf16.msrb.mxu2 %v5984_v49  ;;  %1613 = vmatpush.bf16.msra.mxu1 %v5872_v35  ;;  %v4220_v35 = vor.u32 %v5388_v41, %v4217_v42  ;;  %v5410_v41 = vld [vmem:[%s7349_s2 + $0x11c] sm:$0xf]  ;;  %v4349_v42 = vld [vmem:[%s7349_s2 + $0x120] sm:$0xf0] }
 0x1d2   : > { %1644 = vmatpush.bf16.msra.mxu3 %v5984_v49  ;;  %v6161_v43 = vpop.f32.mrf.mxu3 }
 0x1d5   : > { %1297 = vmatpush.bf16.msrb.mxu2 %v5989_v53  ;;  %1614 = vmatpush.bf16.msra.mxu1 %v5878_v39  ;;  %v5390_v39 = vld [vmem:[%s7349_s2 + $0x5c] sm:$0xf] }
 0x1d6   : > { %1645 = vmatpush.bf16.msra.mxu3 %v5989_v53 }
 0x1d9   : > { %1298 = vmatpush.bf16.msrb.mxu2 %v5994_v54  ;;  %1615 = vmatpush.bf16.msra.mxu1 %v5883_v44  ;;  %v4225_v44 = vld [vmem:[%s7349_s2 + $0x60] sm:$0xf0] }
 0x1da   : > { %1646 = vmatpush.bf16.msra.mxu3 %v5994_v54  ;;  %v6164_v50 = vpop.f32.mrf.mxu3 }
 0x1dd   : > { %1299 = vmatpush.bf16.msrb.mxu2 %v5999_v55  ;;  %1616 = vmatpush.bf16.msra.mxu1 %v5888_v46  ;;  %v4228_v46 = vor.u32 %v5390_v39, %v4225_v44 }
 0x1de   : > { %1647 = vmatpush.bf16.msra.mxu3 %v5999_v55 }
 0x1e0   : > { %4230 = vmatmul.msk.bf16.gmra.mxu2 %vm791_vm10, %v4220_v35  ;;  %v4352_v35 = vor.u32 %v5410_v41, %v4349_v42 }
 0x1e1   : > { %1300 = vmatpush.bf16.msrb.mxu2 %v6022_v0  ;;  %1617 = vmatpush.bf16.msra.mxu1 %v5894_v48  ;;  %v817_v48 = vpop.f32.mrf.mxu1 }
 0x1e2   : > { %1648 = vmatpush.bf16.msra.mxu3 %v6022_v0  ;;  %v6179_v59 = vpop.f32.mrf.mxu3 }
 0x1e5   : > { %1618 = vmatpush.bf16.msra.mxu1 %v5900_v52  ;;  %v892_v52 = vunpack.c.h.b16 %v5980_v40  ;;  %v5400_v40 = vld [vmem:[%s7349_s2 + $0xbc] sm:$0xf] }
 0x1e6   : > { %v4290_v60 = vor.u32 %v5400_v40, %v4287_v58 }
 0x1e7   : > { %v900_v47 = vpack.c.b16 %v892_v52, %v892_v52 }
 0x1e8   : > { %4300 = vmatmul.msk.bf16.gmra.mxu1 %vm791_vm10, %v4290_v60 }
 0x1e9   : > { %1619 = vmatpush.bf16.msra.mxu1 %v5905_v57  ;;  %v819_v45 = vpop.f32.mrf.mxu1  ;;  %v4320_v57 = vld [vmem:[%s7349_s2 + $0xf0] sm:$0xf] }
 0x1ea   : > { %v6188_v3 = vpop.f32.mrf.mxu3 }
 0x1ed   : > { %1620 = vmatpush.bf16.msra.mxu1 %v5922_v63  ;;  %v5407_v63 = vld [vmem:[%s7349_s2 + $0xf4] sm:$0xf0] }
 0x1ee   : > { %v4321_v56 = vor.u32 %v5407_v63, %v4320_v57  ;;  %v5411_v57 = vld [vmem:[%s7349_s2 + $0x11c] sm:$0xf0] }
 0x1f0   : > { %4231 = vmatmul.msk.bf16.gmra.mxu2 %vm791_vm10, %v4228_v46  ;;  %1278 = vmatmul.bf16.gmra.mxu3 %v4321_v56 }
 0x1f1   : > { %v822_v51 = vpop.f32.mrf.mxu1 }
 0x1f2   : > { %v6206_v12 = vpop.f32.mrf.mxu3 }
 0x1f8   : > { %4301 = vmatmul.msk.bf16.gmra.mxu1 %vm791_vm10, %v4298_v13  ;;  %v5404_v13 = vld [vmem:[%s7349_s2 + $0xe4] sm:$0xf] }
 0x1f9   : > { %v824_v1 = vpop.f32.mrf.mxu1 }
 0x1fa   : > { %v6219_v21 = vpop.f32.mrf.mxu3 }
 0x200   : > { %4232 = vmatmul.msk.bf16.gmra.mxu2 %vm791_vm10, %v900_v47  ;;  %1283 = vmatmul.bf16.gmra.mxu3 %v4329_v6  ;;  %v4347_v47 = vld [vmem:[%s7349_s2 + $0x118] sm:$0xf] }
 0x201   : > { %v827_v7 = vpop.f32.mrf.mxu1  ;;  %v4348_v63 = vor.u32 %v5411_v57, %v4347_v47 }
 0x202   : > { %v6233_v31 = vpop.f32.mrf.mxu3 }
 0x208   : > { %4302 = vmatmul.msk.bf16.gmra.mxu1 %vm791_vm10, %v1132_v30 }
 0x209   : > { %v829_v16 = vpop.f32.mrf.mxu1 }
 0x20a   : > { %v943_v38 = vpop.f32.mrf.mxu3 }
 0x20b   : > { %v5415_v38 = vld [vmem:[%s7349_s2 + $0x13c] sm:$0xf0] }
 0x210   : > { %1157 = vmatmul.bf16.vlgmr.msra.gmra.mxu2 %v4278_v2  ;;  %1288 = vmatmul.bf16.gmra.mxu3 %v1247_v28 }
 0x211   : > { %1528 = vmatpush.bf16.msra.mxu2 %v5984_v49  ;;  %v832_v26 = vpop.f32.mrf.mxu1 }
 0x213   : > { %v845_v8 = vpop.f32.mrf.mxu2 }
 0x214   : > { %v6197_v9 = vadd.f32 %v845_v8, %v817_v48  ;;  %v1070_v48 = vpop.f32.mrf.mxu3 }
 0x215   : > { %1529 = vmatpush.bf16.msra.mxu2 %v5989_v53 }
 0x218   : > { %1389 = vmatmul.bf16.vlgmr.msrb.gmra.mxu1 %v4348_v63 }
 0x219   : > { %1530 = vmatpush.bf16.msra.mxu2 %v5994_v54  ;;  %v834_v18 = vpop.f32.mrf.mxu1 }
 0x21b   : > { %v847_v17 = vpop.f32.mrf.mxu2 }
 0x21c   : > { %v6216_v19 = vadd.f32 %v847_v17, %v819_v45  ;;  %v1123_v45 = vunpack.c.l.b16 %v4274_v22  ;;  %v1072_v60 = vpop.f32.mrf.mxu3  ;;  %v4317_v17 = vor.u32 %v5404_v13, %v4314_v14  ;;  %v5422_v13 = vld [vmem:[%s7349_s2 + $0x18c] sm:$0xf]  ;;  %v4419_v14 = vld [vmem:[%s7349_s2 + $0x190] sm:$0xf0] }
 0x21d   : > { %1531 = vmatpush.bf16.msra.mxu2 %v5999_v55 }
 0x21e   : > { %v1131_v40 = vpack.c.b16 %v1123_v45, %v1123_v45  ;;  %v4344_v45 = vld [vmem:[%s7349_s2 + $0x148] sm:$0xff] }
 0x21f   : > { %v1356_v47 = vunpack.c.h.b16 %v4344_v45 }
 0x220   : > { %1162 = vmatmul.bf16.gmra.mxu2 %v4286_v20  ;;  %4369 = vmatmul.msk.bf16.vlgmr.msrb.gmra.mxu3 %vm791_vm10, %v4352_v35 }
 0x221   : > { %1532 = vmatpush.bf16.msra.mxu2 %v6022_v0  ;;  %v1042_v46 = vpop.f32.mrf.mxu1  ;;  %v1364_v57 = vpack.c.b16 %v1356_v47, %v1356_v47 }
 0x222   : > { %v1071_v52 = vadd.f32 %v1070_v48, %v1042_v46 }
 0x223   : > { %v850_v27 = vpop.f32.mrf.mxu2 }
 0x224   : > { %v6231_v29 = vadd.f32 %v850_v27, %v822_v51 }
 0x228   : > { %1394 = vmatmul.bf16.gmra.mxu1 %v4356_v15 }
 0x229   : > { %v1044_v58 = vpop.f32.mrf.mxu1 }
 0x22a   : > { %v1073_v61 = vadd.f32 %v1072_v60, %v1044_v58  ;;  %v1355_v58 = vunpack.c.l.b16 %v4344_v45 }
 0x22b   : > { %v852_v34 = vpop.f32.mrf.mxu2 }
 0x22c   : > { %v6242_v36 = vadd.f32 %v852_v34, %v824_v1  ;;  %v4357_v1 = vld [vmem:[%s7349_s2 + $0x130] sm:$0xf0] }
 0x22d   : > { %v4360_v2 = vor.u32 %v5412_v62, %v4357_v1  ;;  %v1363_v62 = vpack.c.b16 %v1355_v58, %v1355_v58  ;;  %v5417_v1 = vld [vmem:[%s7349_s2 + $0x154] sm:$0xf0] }
 0x230   : > { %1167 = vmatmul.bf16.gmra.mxu2 %v4294_v37  ;;  %4370 = vmatmul.msk.bf16.gmra.mxu3 %vm791_vm10, %v4360_v2 }
 0x231   : > { %v1047_v6 = vpop.f32.mrf.mxu1 }
 0x233   : > { %v855_v39 = vpop.f32.mrf.mxu2 }
 0x234   : > { %v6250_v44 = vadd.f32 %v855_v39, %v827_v7  ;;  %v1075_v7 = vpop.f32.mrf.mxu3 }
 0x235   : > { %v1076_v8 = vadd.f32 %v1075_v7, %v1047_v6 }
 0x239   : > { %v1049_v20 = vpop.f32.mrf.mxu1 }
 0x23b   : > { %v857_v51 = vpop.f32.mrf.mxu2 }
 0x23c   : > { %v6259_v56 = vadd.f32 %v857_v51, %v829_v16  ;;  %v1077_v22 = vpop.f32.mrf.mxu3 }
 0x23d   : > { %v1078_v23 = vadd.f32 %v1077_v22, %v1049_v20  ;;  %v4417_v22 = vld [vmem:[%s7349_s2 + $0x188] sm:$0xf] }
 0x240   : > { %1172 = vmatmul.bf16.gmra.mxu2 %v1131_v40 }
 0x241   : > { %v1052_v33 = vpop.f32.mrf.mxu1 }
 0x243   : > { %v860_v4 = vpop.f32.mrf.mxu2 }
 0x244   : > { %v6267_v5 = vadd.f32 %v860_v4, %v832_v26  ;;  %v4365_v26 = vld [vmem:[%s7349_s2 + $0x140] sm:$0xf0]  ;;  %v1080_v18 = vpop.f32.mrf.mxu3 }
 0x245   : > { %v4368_v27 = vor.u32 %v5414_v25, %v4365_v26  ;;  %v1081_v34 = vadd.f32 %v1080_v18, %v1052_v33  ;;  %v1240_v26 = vunpack.c.h.b16 %v6227_v24  ;;  %v4390_v18 = vld [vmem:[%s7349_s2 + $0x160] sm:$0xf]  ;;  %v5419_v24 = vld [vmem:[%s7349_s2 + $0x164] sm:$0xf0] }
 0x247   : > { %4371 = vmatmul.msk.bf16.gmra.mxu3 %vm791_vm10, %v4368_v27 }
 0x249   : > { %v1054_v46 = vpop.f32.mrf.mxu1 }
 0x24b   : > { %v862_v16 = vpop.f32.mrf.mxu2 }
 0x250   : > { %4334 = vmatmul.msk.bf16.vlgmr.msrb.gmra.mxu2 %vm791_vm10, %v4317_v17 }
 0x251   : > { %1760 = vmatpush.bf16.msrb.mxu2 %v5984_v49  ;;  %v4363_v49 = vld [vmem:[%s7349_s2 + $0x138] sm:$0xf]  ;;  %v1057_v63 = vpop.f32.mrf.mxu1 }
 0x253   : > { %v954_v28 = vpop.f32.mrf.mxu2 }
 0x254   : > { %v955_v30 = vadd.f32 %v954_v28, %v6161_v43  ;;  %v4322_v43 = vld [vmem:[%s7349_s2 + $0xf8] sm:$0xf0]  ;;  %v1248_v28 = vpack.c.b16 %v1240_v26, %v1240_v26 }
 0x255   : > { %1761 = vmatpush.bf16.msrb.mxu2 %v5989_v53  ;;  %v5406_v53 = vld [vmem:[%s7349_s2 + $0xf4] sm:$0xf] }
 0x256   : > { %v973_v32 = vmax.f32 %v6197_v9, %v955_v30  ;;  %v4364_v9 = vor.u32 %v5415_v38, %v4363_v49  ;;  %v4325_v35 = vor.u32 %v5406_v53, %v4322_v43 }
 0x257   : > { %4372 = vmatmul.msk.bf16.gmra.mxu3 %vm791_vm10, %v1364_v57  ;;  %v5421_v57 = vld [vmem:[%s7349_s2 + $0x174] sm:$0xf0] }
 0x258   : > { %v6294_v37 = vmax.f32 %v973_v32, %v1071_v52  ;;  %1399 = vmatmul.bf16.gmra.mxu1 %v4364_v9 }
 0x259   : > { %1762 = vmatpush.bf16.msrb.mxu2 %v5994_v54  ;;  %v1082_v54 = vpop.f32.mrf.mxu3 }
 0x25a   : > { %v1083_v48 = vadd.f32 %v1082_v54, %v1054_v46 }
 0x25b   : > { %v956_v41 = vpop.f32.mrf.mxu2 }
 0x25c   : > { %v957_v42 = vadd.f32 %v956_v41, %v6164_v50 }
 0x25d   : > { %1763 = vmatpush.bf16.msrb.mxu2 %v5999_v55 }
 0x25e   : > { %v974_v39 = vmax.f32 %v6216_v19, %v957_v42  ;;  %v4425_v42 = vld [vmem:[%s7349_s2 + $0x198] sm:$0xf] }
 0x260   : > { %v6312_v52 = vmax.f32 %v974_v39, %v1073_v61  ;;  %4335 = vmatmul.msk.bf16.gmra.mxu2 %vm791_vm10, %v4325_v35  ;;  %v5408_v61 = vld [vmem:[%s7349_s2 + $0x104] sm:$0xf]  ;;  %v5425_v35 = vld [vmem:[%s7349_s2 + $0x19c] sm:$0xf0] }
 0x261   : > { %1764 = vmatpush.bf16.msrb.mxu2 %v6022_v0  ;;  %v1085_v51 = vpop.f32.mrf.mxu3  ;;  %v4330_v0 = vld [vmem:[%s7349_s2 + $0x108] sm:$0xf0]  ;;  %v4426_v46 = vor.u32 %v5425_v35, %v4425_v42 }
 0x262   : > { %v1086_v40 = vadd.f32 %v1085_v51, %v1057_v63  ;;  %v4333_v4 = vor.u32 %v5408_v61, %v4330_v0  ;;  %v5426_v63 = vld [vmem:[%s7349_s2 + $0x1ac] sm:$0xf]  ;;  %v4435_v51 = vld [vmem:[%s7349_s2 + $0x1b0] sm:$0xf0] }
 0x263   : > { %v959_v50 = vpop.f32.mrf.mxu2 }
 0x264   : > { %v960_v55 = vadd.f32 %v959_v50, %v6179_v59  ;;  %v4398_v50 = vld [vmem:[%s7349_s2 + $0x170] sm:$0xf] }
 0x266   : > { %v975_v19 = vmax.f32 %v6231_v29, %v960_v55  ;;  %v4382_v29 = vld [vmem:[%s7349_s2 + $0x150] sm:$0xf] }
 0x267   : > { %v4383_v6 = vor.u32 %v5417_v1, %v4382_v29  ;;  %v5427_v29 = vld [vmem:[%s7349_s2 + $0x1ac] sm:$0xf0] }
 0x268   : > { %v6322_v60 = vmax.f32 %v975_v19, %v1076_v8  ;;  %1404 = vmatmul.bf16.gmra.mxu1 %v1363_v62  ;;  %v1059_v8 = vpop.f32.mrf.mxu1  ;;  %v4399_v19 = vor.u32 %v5421_v57, %v4398_v50 }
 0x269   : > { %v1087_v10 = vpop.f32.mrf.mxu3  ;;  %1505 = vmatmul.bf16.vlgmr.msrb.gmra.mxu0 %v4383_v6  ;;  %v4392_v6 = vld [vmem:[%s7349_s2 + $0x168] sm:$0xf0] }
 0x26b   : > { %v961_v59 = vpop.f32.mrf.mxu2 }
 0x26c   : > { %v962_v2 = vadd.f32 %v961_v59, %v6188_v3  ;;  %v4422_v3 = vor.u32 %v5422_v13, %v4419_v14  ;;  %v4433_v59 = vld [vmem:[%s7349_s2 + $0x1a8] sm:$0xf]  ;;  %v4379_v13 = vld [vmem:[%s7349_s2 + $0x180] sm:$0xff] }
 0x26d   : > { %v1471_v14 = vunpack.c.l.b16 %v4379_v13 }
 0x26e   : > { %v976_v7 = vmax.f32 %v6242_v36, %v962_v2  ;;  %4439 = vmatmul.msk.bf16.vlgmr.msra.gmra.mxu3 %vm791_vm10, %v4422_v3  ;;  %v4434_v2 = vor.u32 %v5427_v29, %v4433_v59 }
 0x270   : > { %v6338_v11 = vmax.f32 %v976_v7, %v1078_v23  ;;  %4336 = vmatmul.msk.bf16.gmra.mxu2 %vm791_vm10, %v4333_v4  ;;  %v1186_v17 = vpop.f32.mrf.mxu1  ;;  %v5423_v23 = vld [vmem:[%s7349_s2 + $0x18c] sm:$0xf0]  ;;  %v5418_v4 = vld [vmem:[%s7349_s2 + $0x164] sm:$0xf] }
 0x271   : > { %v6350_v20 = vpop.f32.mrf.mxu3  ;;  %v4418_v25 = vor.u32 %v5423_v23, %v4417_v22  ;;  %v4395_v10 = vor.u32 %v5418_v4, %v4392_v6 }
 0x273   : > { %v964_v15 = vpop.f32.mrf.mxu2 }
 0x274   : > { %v965_v16 = vadd.f32 %v964_v15, %v6206_v12 }
 0x276   : > { %v977_v36 = vmax.f32 %v6250_v44, %v965_v16 }
 0x278   : > { %v6359_v27 = vmax.f32 %v977_v36, %v1081_v34  ;;  %1621 = vmatmul.bf16.vlgmr.msra.gmra.mxu1 %v4418_v25  ;;  %v1188_v32 = vpop.f32.mrf.mxu1  ;;  %v4391_v34 = vor.u32 %v5419_v24, %v4390_v18  ;;  %v1479_v36 = vpack.c.b16 %v1471_v14, %v1471_v14  ;;  %v5420_v18 = vld [vmem:[%s7349_s2 + $0x174] sm:$0xf]  ;;  %v4400_v24 = vld [vmem:[%s7349_s2 + $0x178] sm:$0xf0] }
 0x279   : > { %v6363_v33 = vpop.f32.mrf.mxu3 }
 0x27a   : > { %1510 = vmatmul.bf16.gmra.mxu0 %v4391_v34 }
 0x27b   : > { %v966_v12 = vpop.f32.mrf.mxu2 }
 0x27c   : > { %v967_v44 = vadd.f32 %v966_v12, %v6219_v21  ;;  %v5424_v21 = vld [vmem:[%s7349_s2 + $0x19c] sm:$0xf] }
 0x27e   : > { %v978_v30 = vmax.f32 %v6259_v56, %v967_v44  ;;  %v4427_v56 = vld [vmem:[%s7349_s2 + $0x1a0] sm:$0xf0] }
 0x27f   : > { %v4430_v38 = vor.u32 %v5424_v21, %v4427_v56  ;;  %v4452_v21 = vld [vmem:[%s7349_s2 + $0x1c0] sm:$0xf]  ;;  %v5429_v56 = vld [vmem:[%s7349_s2 + $0x1c4] sm:$0xf0] }
 0x280   : > { %v6371_v49 = vmax.f32 %v978_v30, %v1083_v48  ;;  %4337 = vmatmul.msk.bf16.gmra.mxu2 %vm791_vm10, %v1248_v28  ;;  %v1191_v41 = vpop.f32.mrf.mxu1 }
 0x281   : > { %4440 = vmatmul.msk.bf16.gmra.mxu3 %vm791_vm10, %v4430_v38  ;;  %v6389_v39 = vpop.f32.mrf.mxu3 }
 0x283   : > { %v969_v53 = vpop.f32.mrf.mxu2 }
 0x284   : > { %v970_v43 = vadd.f32 %v969_v53, %v6233_v31  ;;  %v5416_v31 = vld [vmem:[%s7349_s2 + $0x154] sm:$0xf]  ;;  %v4403_v53 = vor.u32 %v5420_v18, %v4400_v24 }
 0x286   : > { %v979_v9 = vmax.f32 %v6267_v5, %v970_v43  ;;  %v4384_v5 = vld [vmem:[%s7349_s2 + $0x158] sm:$0xf0]  ;;  %v4453_v43 = vor.u32 %v5429_v56, %v4452_v21  ;;  %v5430_v56 = vld [vmem:[%s7349_s2 + $0x1d4] sm:$0xf] }
 0x287   : > { %v4387_v45 = vor.u32 %v5416_v31, %v4384_v5  ;;  %v1472_v5 = vunpack.c.h.b16 %v4379_v13  ;;  %v4454_v13 = vld [vmem:[%s7349_s2 + $0x1c8] sm:$0xf0] }
 0x288   : > { %v6391_v54 = vmax.f32 %v979_v9, %v1086_v40  ;;  %1626 = vmatmul.bf16.gmra.mxu1 %v4426_v46  ;;  %v1193_v47 = vpop.f32.mrf.mxu1  ;;  %v4438_v40 = vor.u32 %v5426_v63, %v4435_v51  ;;  %v4460_v51 = vld [vmem:[%s7349_s2 + $0x1d0] sm:$0xf] }
 0x289   : > { %v6405_v55 = vpop.f32.mrf.mxu3 }
 0x28a   : > { %1515 = vmatmul.bf16.gmra.mxu0 %v4399_v19  ;;  %v1480_v19 = vpack.c.b16 %v1472_v5, %v1472_v5 }
 0x28b   : > { %v971_v48 = vpop.f32.mrf.mxu2 }
 0x290   : > { %4404 = vmatmul.msk.bf16.vlgmr.msra.gmra.mxu2 %vm791_vm10, %v4387_v45  ;;  %v1196_v62 = vpop.f32.mrf.mxu1 }
 0x291   : > { %4441 = vmatmul.msk.bf16.gmra.mxu3 %vm791_vm10, %v4438_v40  ;;  %v6425_v1 = vpop.f32.mrf.mxu3  ;;  %v5431_v40 = vld [vmem:[%s7349_s2 + $0x1d4] sm:$0xf0] }
 0x293   : > { %v1158_v58 = vpop.f32.mrf.mxu2 }
 0x294   : > { %v6414_v61 = vadd.f32 %v1186_v17, %v1158_v58  ;;  %v4414_v17 = vld [vmem:[%s7349_s2 + $0x1b8] sm:$0xff]  ;;  %v4461_v58 = vor.u32 %v5431_v40, %v4460_v51  ;;  %v5432_v51 = vld [vmem:[%s7349_s2 + $0x1e4] sm:$0xf] }
 0x295   : > { %v1588_v22 = vunpack.c.h.b16 %v4414_v17  ;;  %v1587_v44 = vunpack.c.l.b16 %v4414_v17  ;;  %v4468_v17 = vld [vmem:[%s7349_s2 + $0x1e0] sm:$0xf] }
 0x296   : > { %v1205_v0 = vmax.f32 %v6294_v37, %v6414_v61 }
 0x297   : > { %v1596_v25 = vpack.c.b16 %v1588_v22, %v1588_v22  ;;  %v5433_v22 = vld [vmem:[%s7349_s2 + $0x1e4] sm:$0xf0] }
 0x298   : > { %1631 = vmatmul.bf16.gmra.mxu1 %v4434_v2  ;;  %v1198_v15 = vpop.f32.mrf.mxu1 }
 0x299   : > { %v6440_v16 = vpop.f32.mrf.mxu3 }
 0x29a   : > { %1520 = vmatmul.bf16.gmra.mxu0 %v1479_v36 }
 0x29b   : > { %v1160_v7 = vpop.f32.mrf.mxu2 }
 0x29c   : > { %v6433_v8 = vadd.f32 %v1188_v32, %v1160_v7  ;;  %v1595_v32 = vpack.c.b16 %v1587_v44, %v1587_v44 }
 0x29e   : > { %v1206_v3 = vmax.f32 %v6312_v52, %v6433_v8  ;;  %v5481_v52 = vld [vmem:[%s7350_s3 + $0x178] sm:$0xff] }
 0x29f   : > { %2497 = vmatpush.bf16.msra.mxu2 %v5481_v52 }
 0x2a0   : > { %4405 = vmatmul.msk.bf16.gmra.mxu2 %vm791_vm10, %v4395_v10  ;;  %v1201_v28 = vpop.f32.mrf.mxu1  ;;  %v5428_v10 = vld [vmem:[%s7349_s2 + $0x1c4] sm:$0xf] }
 0x2a1   : > { %4442 = vmatmul.msk.bf16.gmra.mxu3 %vm791_vm10, %v1596_v25  ;;  %v6451_v30 = vpop.f32.mrf.mxu3  ;;  %v4457_v36 = vor.u32 %v5428_v10, %v4454_v13 }
 0x2a3   : > { %v1163_v23 = vpop.f32.mrf.mxu2 }
 0x2a4   : > { %v6446_v26 = vadd.f32 %v1191_v41, %v1163_v23  ;;  %v4469_v23 = vor.u32 %v5433_v22, %v4468_v17 }
 0x2a6   : > { %v1207_v12 = vmax.f32 %v6322_v60, %v6446_v26 }
 0x2a8   : > { %1636 = vmatmul.bf16.gmra.mxu1 %v1595_v32  ;;  %v1203_v41 = vpop.f32.mrf.mxu1 }
 0x2a9   : > { %v1291_v42 = vpop.f32.mrf.mxu3 }
 0x2aa   : > { %1737 = vmatmul.bf16.vlgmr.msra.gmra.mxu0 %v4453_v43 }
 0x2ab   : > { %v1165_v34 = vpop.f32.mrf.mxu2 }
 0x2ac   : > { %v6465_v38 = vadd.f32 %v1193_v47, %v1165_v34 }
 0x2ae   : > { %v1208_v9 = vmax.f32 %v6338_v11, %v6465_v38  ;;  %v5477_v11 = vld [vmem:[%s7350_s3 + $0x158] sm:$0xff] }
 0x2b0   : > { %4406 = vmatmul.msk.bf16.gmra.mxu2 %vm791_vm10, %v4403_v53  ;;  %v1390_v48 = vpop.f32.mrf.mxu1  ;;  %v4462_v53 = vld [vmem:[%s7349_s2 + $0x1d8] sm:$0xf0] }
 0x2b1   : > { %v1418_v45 = vpop.f32.mrf.mxu3 }
 0x2b2   : > { %v6474_v47 = vadd.f32 %v1418_v45, %v1390_v48 }
 0x2b3   : > { %v1168_v35 = vpop.f32.mrf.mxu2 }
 0x2b4   : > { %v6470_v46 = vadd.f32 %v1196_v62, %v1168_v35  ;;  %v4449_v35 = vld [vmem:[%s7349_s2 + $0x1f0] sm:$0xff] }
 0x2b5   : > { %v1703_v5 = vunpack.c.l.b16 %v4449_v35 }
 0x2b6   : > { %v1209_v31 = vmax.f32 %v6359_v27, %v6470_v46 }
 0x2b7   : > { %v1711_v45 = vpack.c.b16 %v1703_v5, %v1703_v5 }
 0x2b8   : > { %v6487_v62 = vpop.f32.mrf.mxu1 }
 0x2b9   : > { %v6489_v59 = vpop.f32.mrf.mxu3 }
 0x2ba   : > { %1742 = vmatmul.bf16.gmra.mxu0 %v4461_v58 }
 0x2bb   : > { %v1170_v50 = vpop.f32.mrf.mxu2 }
 0x2bc   : > { %v6476_v57 = vadd.f32 %v1198_v15, %v1170_v50 }
 0x2be   : > { %v1210_v63 = vmax.f32 %v6371_v49, %v6476_v57  ;;  %v5463_v49 = vld [vmem:[%s7350_s3 + $0xe8] sm:$0xff] }
 0x2c0   : > { %4407 = vmatmul.msk.bf16.gmra.mxu2 %vm791_vm10, %v1480_v19  ;;  %v1395_v6 = vpop.f32.mrf.mxu1 }
 0x2c1   : > { %v1423_v7 = vpop.f32.mrf.mxu3 }
 0x2c2   : > { %v6501_v14 = vadd.f32 %v1423_v7, %v1395_v6 }
 0x2c3   : > { %v1173_v29 = vpop.f32.mrf.mxu2 }
 0x2c4   : > { %v6491_v2 = vadd.f32 %v1201_v28, %v1173_v29 }
 0x2c6   : > { %v1211_v4 = vmax.f32 %v6391_v54, %v6491_v2 }
 0x2c8   : > { %v6510_v25 = vpop.f32.mrf.mxu1 }
 0x2c9   : > { %v6512_v28 = vpop.f32.mrf.mxu3 }
 0x2ca   : > { %1747 = vmatmul.bf16.gmra.mxu0 %v4469_v23 }
 0x2cb   : > { %v1175_v15 = vpop.f32.mrf.mxu2 }
 0x2cc   : > { %v1704_v15 = vunpack.c.h.b16 %v4449_v35 }
 0x2d0   : > { %4474 = vmatmul.msk.bf16.vlgmr.msrb.gmra.mxu2 %vm791_vm10, %v4457_v36 }
 0x2d1   : > { %v1428_v21 = vpop.f32.mrf.mxu3 }
 0x2d3   : > { %v1302_v44 = vpop.f32.mrf.mxu2 }
 0x2d4   : > { %v1303_v32 = vadd.f32 %v1302_v44, %v6350_v20  ;;  %v4465_v20 = vor.u32 %v5430_v56, %v4462_v53  ;;  %v1712_v44 = vpack.c.b16 %v1704_v15, %v1704_v15 }
 0x2d5   : > { %v1400_v34 = vpop.f32.mrf.mxu1 }
 0x2d6   : > { %v1321_v18 = vmax.f32 %v1205_v0, %v1303_v32  ;;  %v6525_v43 = vadd.f32 %v1428_v21, %v1400_v34 }
 0x2d8   : > { %v1437_v24 = vmax.f32 %v1321_v18, %v6474_v47 }
 0x2d9   : > { %v6532_v61 = vpop.f32.mrf.mxu3 }
 0x2da   : > { %1752 = vmatmul.bf16.gmra.mxu0 %v1711_v45 }
 0x2db   : > { %v6527_v41 = vpop.f32.mrf.mxu2 }
 0x2dd   : > { %v6530_v37 = vpop.f32.mrf.mxu1 }
 0x2e0   : > { %4475 = vmatmul.msk.bf16.gmra.mxu2 %vm791_vm10, %v4465_v20 }
 0x2e1   : > { %v1433_v19 = vpop.f32.mrf.mxu3 }
 0x2e3   : > { %v1307_v0 = vpop.f32.mrf.mxu2 }
 0x2e4   : > { %v1308_v42 = vadd.f32 %v1307_v0, %v6389_v39  ;;  %v4470_v39 = vld [vmem:[%s7349_s2 + $0x1e8] sm:$0xf0] }
 0x2e5   : > { %v1405_v50 = vpop.f32.mrf.mxu1  ;;  %v4473_v26 = vor.u32 %v5432_v51, %v4470_v39 }
 0x2e6   : > { %v1323_v48 = vmax.f32 %v1207_v12, %v1308_v42  ;;  %v6548_v40 = vadd.f32 %v1433_v19, %v1405_v50  ;;  %v1506_v60 = vpop.f32.mrf.mxu0 }
 0x2e8   : > { %v1439_v47 = vmax.f32 %v1323_v48, %v6501_v14 }
 0x2e9   : > { %v1435_v29 = vpop.f32.mrf.mxu3 }
 0x2eb   : > { %v6550_v58 = vpop.f32.mrf.mxu2 }
 0x2ed   : > { %v1407_v12 = vpop.f32.mrf.mxu1 }
 0x2ee   : > { %v6554_v10 = vpop.f32.mrf.mxu0 }
 0x2f0   : > { %4476 = vmatmul.msk.bf16.gmra.mxu2 %vm791_vm10, %v4473_v26 }
 0x2f1   : > { %v1650_v17 = vpop.f32.mrf.mxu3 }
 0x2f3   : > { %v1312_v6 = vpop.f32.mrf.mxu2 }
 0x2f4   : > { %v1313_v7 = vadd.f32 %v1312_v6, %v6425_v1 }
 0x2f5   : > { %v1622_v36 = vpop.f32.mrf.mxu1 }
 0x2f6   : > { %v6559_v13 = vmax.f32 %v1209_v31, %v1313_v7  ;;  %v6563_v22 = vadd.f32 %v1650_v17, %v1622_v36  ;;  %v5449_v36 = vld [vmem:[%s7350_s3 + $0x78] sm:$0xff]  ;;  %v5440_v17 = vld [vmem:[%s7350_s3 + $0x30] sm:$0xff] }
 0x2f7   : > { %v1511_v32 = vpop.f32.mrf.mxu0  ;;  %1956 = vmatpush.bf16.msrb.mxu1 %v5449_v36 }
 0x2f8   : > { %v1441_v14 = vmax.f32 %v6559_v13, %v6525_v43 }
 0x2f9   : > { %v6570_v18 = vpop.f32.mrf.mxu3 }
 0x2fb   : > { %v6565_v23 = vpop.f32.mrf.mxu2 }
 0x2fd   : > { %v6568_v1 = vpop.f32.mrf.mxu1 }
 0x2ff   : > { %v6578_v34 = vpop.f32.mrf.mxu0 }
 0x300   : > { %4477 = vmatmul.msk.bf16.gmra.mxu2 %vm791_vm10, %v1712_v44 }
 0x303   : > { %v1317_v27 = vpop.f32.mrf.mxu2 }
 0x304   : > { %v1318_v46 = vadd.f32 %v1317_v27, %v6451_v30  ;;  %v1655_v53 = vpop.f32.mrf.mxu3  ;;  %v5439_v27 = vld [vmem:[%s7350_s3 + $0x28] sm:$0xff] }
 0x305   : > { %v1627_v56 = vpop.f32.mrf.mxu1 }
 0x306   : > { %v6576_v31 = vmax.f32 %v1211_v4, %v1318_v46  ;;  %v6582_v43 = vadd.f32 %v1655_v53, %v1627_v56 }
 0x307   : > { %v1516_v0 = vpop.f32.mrf.mxu0 }
 0x308   : > { %v1443_v21 = vmax.f32 %v6576_v31, %v6548_v40  ;;  %v5453_v40 = vld [vmem:[%s7350_s3 + $0x98] sm:$0xff] }
 0x30b   : > { %v1319_v20 = vpop.f32.mrf.mxu2 }
 0x30c   : > { %v6586_v35 = vpop.f32.mrf.mxu3 }
 0x30d   : > { %v6584_v42 = vpop.f32.mrf.mxu1 }
 0x30f   : > { %v6590_v2 = vpop.f32.mrf.mxu0 }
 0x313   : > { %v1534_v30 = vpop.f32.mrf.mxu2 }
 0x314   : > { %v1535_v5 = vadd.f32 %v1534_v30, %v1506_v60  ;;  %v1660_v45 = vpop.f32.mrf.mxu3  ;;  %v5438_v30 = vld [vmem:[%s7350_s3 + $0x20] sm:$0xff] }
 0x315   : > { %v1632_v48 = vpop.f32.mrf.mxu1 }
 0x316   : > { %v6588_v54 = vmax.f32 %v1437_v24, %v1535_v5  ;;  %v6594_v50 = vadd.f32 %v1660_v45, %v1632_v48  ;;  %v5441_v24 = vld [vmem:[%s7350_s3 + $0x38] sm:$0xff] }
 0x317   : > { %v1521_v51 = vpop.f32.mrf.mxu0  ;;  %2031 = vmatpush.bf16.msrb.mxu3 %v5441_v24  ;;  %v5437_v24 = vld [vmem:[%s7350_s3 + $0x18] sm:$0xff] }
 0x318   : > { %v1669_v4 = vmax.f32 %v6588_v54, %v6563_v22  ;;  %v5478_v54 = vld [vmem:[%s7350_s3 + $0x160] sm:$0xff] }
 0x31b   : > { %v6596_v19 = vpop.f32.mrf.mxu2  ;;  %2032 = vmatpush.bf16.msrb.mxu3 %v5440_v17  ;;  %v5455_v17 = vld [vmem:[%s7350_s3 + $0xa8] sm:$0xff] }
 0x31c   : > { %v6600_v26 = vpop.f32.mrf.mxu3 }
 0x31d   : > { %v6598_v39 = vpop.f32.mrf.mxu1 }
 0x31f   : > { %v1523_v6 = vpop.f32.mrf.mxu0  ;;  %2033 = vmatpush.bf16.msrb.mxu3 %v5439_v27  ;;  %v5434_v27 = vld [vmem:[%s7350_s3] sm:$0xff] }
 0x320   : > { %v5436_v6 = vld [vmem:[%s7350_s3 + $0x10] sm:$0xff] }
 0x323   : > { %v1539_v60 = vpop.f32.mrf.mxu2  ;;  %2034 = vmatpush.bf16.msrb.mxu3 %v5438_v30  ;;  %v5454_v30 = vld [vmem:[%s7350_s3 + $0xa0] sm:$0xff] }
 0x324   : > { %v1540_v12 = vadd.f32 %v1539_v60, %v1511_v32  ;;  %v1665_v15 = vpop.f32.mrf.mxu3  ;;  %v5448_v32 = vld [vmem:[%s7350_s3 + $0x70] sm:$0xff] }
 0x325   : > { %v1637_v13 = vpop.f32.mrf.mxu1  ;;  %1957 = vmatpush.bf16.msrb.mxu1 %v5448_v32 }
 0x326   : > { %v6605_v29 = vmax.f32 %v1439_v47, %v1540_v12  ;;  %v6615_v44 = vadd.f32 %v1665_v15, %v1637_v13  ;;  %v5447_v12 = vld [vmem:[%s7350_s3 + $0x68] sm:$0xff]  ;;  %v5456_v13 = vld [vmem:[%s7350_s3 + $0xb0] sm:$0xff] }
 0x327   : > { %v1738_v46 = vpop.f32.mrf.mxu0  ;;  %2035 = vmatpush.bf16.msrb.mxu3 %v5437_v24  ;;  %v5435_v15 = vld [vmem:[%s7350_s3 + $0x8] sm:$0xff]  ;;  %v5445_v24 = vld [vmem:[%s7350_s3 + $0x58] sm:$0xff] }
 0x328   : > { %v1671_v7 = vmax.f32 %v6605_v29, %v6582_v43  ;;  %v5475_v43 = vld [vmem:[%s7350_s3 + $0x148] sm:$0xff]  ;;  %v1315_v29 = vadd.f32 %v6565_v23, %v6440_v16 }
 0x329   : > { %1958 = vmatpush.bf16.msrb.mxu1 %v5447_v12  ;;  %v5452_v12 = vld [vmem:[%s7350_s3 + $0x90] sm:$0xff] }
 0x32b   : > { %v6617_v47 = vpop.f32.mrf.mxu2  ;;  %2036 = vmatpush.bf16.msrb.mxu3 %v5436_v6 }
 0x32c   : > { %v1667_v53 = vpop.f32.mrf.mxu3 }
 0x32d   : > { %v1639_v56 = vpop.f32.mrf.mxu1  ;;  %v5446_v53 = vld [vmem:[%s7350_s3 + $0x60] sm:$0xff] }
 0x32e   : > { %1959 = vmatpush.bf16.msrb.mxu1 %v5446_v53 }
 0x32f   : > { %v6630_v45 = vpop.f32.mrf.mxu0  ;;  %2037 = vmatpush.bf16.msrb.mxu3 %v5435_v15  ;;  %v1537_v15 = vadd.f32 %v6596_v19, %v6554_v10  ;;  %v1653_v10 = vadd.f32 %v6570_v18, %v6568_v1  ;;  %v5442_v19 = vld [vmem:[%s7350_s3 + $0x40] sm:$0xff]  ;;  %v5479_v1 = vld [vmem:[%s7350_s3 + $0x168] sm:$0xff]  ;;  %v1310_v18 = vadd.f32 %v6550_v58, %v6405_v55 }
 0x332   : > { %1960 = vmatpush.bf16.msrb.mxu1 %v5445_v24 }
 0x333   : > { %v1544_v20 = vpop.f32.mrf.mxu2  ;;  %2038 = vmatpush.bf16.msrb.mxu3 %v5434_v27  ;;  %v5480_v27 = vld [vmem:[%s7350_s3 + $0x170] sm:$0xff] }
 0x334   : > { %v1545_v5 = vadd.f32 %v1544_v20, %v1516_v0  ;;  %v5457_v0 = vld [vmem:[%s7350_s3 + $0xb8] sm:$0xff]  ;;  %2498 = vmatpush.bf16.msra.mxu2 %v5480_v27  ;;  %v1326_v27 = vmax.f32 %v1210_v63, %v1315_v29 }
 0x335   : > { %2132 = vmatpush.bf16.msrb.mxu0 %v5457_v0  ;;  %v5444_v0 = vld [vmem:[%s7350_s3 + $0x50] sm:$0xff]  ;;  %v5489_v63 = vld [vmem:[%s7350_s3 + $0x1b8] sm:$0xff] }
 0x336   : > { %v6628_v48 = vmax.f32 %v1441_v14, %v1545_v5  ;;  %1961 = vmatpush.bf16.msrb.mxu1 %v5444_v0  ;;  %v5473_v0 = vld [vmem:[%s7350_s3 + $0x138] sm:$0xff] }
 0x337   : > { %v6654_v36 = vpop.f32.mrf.mxu0  ;;  %2357 = vmatpush.bf16.msra.mxu3 %v5473_v0 }
 0x338   : > { %v1673_v60 = vmax.f32 %v6628_v48, %v6594_v50  ;;  %2499 = vmatpush.bf16.msra.mxu2 %v5479_v1 }
 0x339   : > { %2133 = vmatpush.bf16.msrb.mxu0 %v5456_v13  ;;  %v1421_v13 = vadd.f32 %v6489_v59, %v6487_v62  ;;  %v5450_v62 = vld [vmem:[%s7350_s3 + $0x80] sm:$0xff] }
 0x33b   : > { %v6643_v14 = vpop.f32.mrf.mxu2 }
 0x33c   : > { %2500 = vmatpush.bf16.msra.mxu2 %v5478_v54  ;;  %v1547_v57 = vadd.f32 %v6643_v14, %v6590_v2  ;;  %v5468_v2 = vld [vmem:[%s7350_s3 + $0x110] sm:$0xff] }
 0x33d   : > { %2134 = vmatpush.bf16.msrb.mxu0 %v5455_v17 }
 0x340   : > { %2501 = vmatpush.bf16.msra.mxu2 %v5477_v11  ;;  %v5467_v11 = vld [vmem:[%s7350_s3 + $0x108] sm:$0xff] }
 0x341   : > { %2135 = vmatpush.bf16.msrb.mxu0 %v5454_v30 }
 0x343   : > { %v1549_v32 = vpop.f32.mrf.mxu2 }
 0x344   : > { %v1550_v56 = vadd.f32 %v1549_v32, %v1521_v51  ;;  %v6675_v51 = vpop.f32.mrf.mxu0  ;;  %v5443_v32 = vld [vmem:[%s7350_s3 + $0x48] sm:$0xff] }
 0x345   : > { %2136 = vmatpush.bf16.msrb.mxu0 %v5453_v40  ;;  %1962 = vmatpush.bf16.msrb.mxu1 %v5443_v32 }
 0x346   : > { %v6668_v20 = vmax.f32 %v1443_v21, %v1550_v56  ;;  %v1305_v21 = vadd.f32 %v6527_v41, %v6363_v33  ;;  %v5451_v33 = vld [vmem:[%s7350_s3 + $0x88] sm:$0xff] }
 0x348   : > { %v1675_v5 = vmax.f32 %v6668_v20, %v6615_v44  ;;  %v1322_v6 = vmax.f32 %v1206_v3, %v1305_v21  ;;  %v5458_v44 = vld [vmem:[%s7350_s3 + $0xc0] sm:$0xff] }
 0x349   : > { %2137 = vmatpush.bf16.msrb.mxu0 %v5452_v12  ;;  %1963 = vmatpush.bf16.msrb.mxu1 %v5442_v19  ;;  %v5474_v19 = vld [vmem:[%s7350_s3 + $0x140] sm:$0xff] }
 0x34a   : > { %v1438_v8 = vmax.f32 %v1322_v6, %v1421_v13  ;;  %v1542_v6 = vadd.f32 %v6617_v47, %v6578_v34  ;;  %v1658_v47 = vadd.f32 %v6586_v35, %v6584_v42  ;;  %v5476_v13 = vld [vmem:[%s7350_s3 + $0x150] sm:$0xff]  ;;  %v5465_v35 = vld [vmem:[%s7350_s3 + $0xf8] sm:$0xff] }
 0x34b   : > { %v1551_v31 = vpop.f32.mrf.mxu2  ;;  %2502 = vmatpush.bf16.msra.mxu2 %v5476_v13 }
 0x34c   : > { %v6701_v17 = vpop.f32.mrf.mxu0  ;;  %v1554_v59 = vmax.f32 %v1438_v8, %v1537_v15 }
 0x34d   : > { %2138 = vmatpush.bf16.msrb.mxu0 %v5451_v33  ;;  %2258 = vmatpush.bf16.msra.mxu1 %v5465_v35  ;;  %v5460_v35 = vld [vmem:[%s7350_s3 + $0xd0] sm:$0xff] }
 0x34e   : > { %v1670_v53 = vmax.f32 %v1554_v59, %v1653_v10  ;;  %v5464_v10 = vld [vmem:[%s7350_s3 + $0xf0] sm:$0xff] }
 0x34f   : > { %2503 = vmatpush.bf16.msra.mxu2 %v5475_v43  ;;  %v5485_v43 = vld [vmem:[%s7350_s3 + $0x198] sm:$0xff] }
 0x351   : > { %2139 = vmatpush.bf16.msrb.mxu0 %v5450_v62  ;;  %2259 = vmatpush.bf16.msra.mxu1 %v5464_v10 }
 0x353   : > { %v1766_v41 = vpop.f32.mrf.mxu2  ;;  %2504 = vmatpush.bf16.msra.mxu2 %v5474_v19 }
 0x354   : > { %v1767_v3 = vadd.f32 %v1766_v41, %v1738_v46  ;;  %v6729_v31 = vpop.f32.mrf.mxu0  ;;  %v5471_v41 = vld [vmem:[%s7350_s3 + $0x128] sm:$0xff] }
 0x355   : > { %2607 = vmatpush.bf16.msra.mxu0 %v5489_v63  ;;  %2260 = vmatpush.bf16.msra.mxu1 %v5463_v49 }
 0x356   : > { %v1785_v46 = vmax.f32 %v1669_v4, %v1767_v3  ;;  %v1324_v4 = vmax.f32 %v1208_v9, %v1310_v18 }
 0x358   : > { %v1799_v24 = vmul.f32 0.1, %v1785_v46  ;;  %vm1792_vm11 = vcmp.gt.f32.partialorder %v1785_v46, 0.0 }
 0x35a   : > { %v1806_v55 = vsel %vm1792_vm11, %v1785_v46, %v1799_v24  ;;  %v1431_v46 = vadd.f32 %v6532_v61, %v6530_v37 }
 0x35b   : > { %v1768_v56 = vpop.f32.mrf.mxu2 }
 0x35c   : > { %v1769_v30 = vadd.f32 %v1768_v56, %v6630_v45  ;;  %v1426_v45 = vadd.f32 %v6512_v28, %v6510_v25  ;;  %v6752_v25 = vpop.f32.mrf.mxu0  ;;  %v5472_v28 = vld [vmem:[%s7350_s3 + $0x130] sm:$0xff]  ;;  %v1442_v54 = vmax.f32 %v1326_v27, %v1431_v46 }
 0x35d   : > { %2358 = vmatpush.bf16.msra.mxu3 %v5472_v28  ;;  %v5466_v28 = vld [vmem:[%s7350_s3 + $0x100] sm:$0xff] }
 0x35e   : > { %v1786_v40 = vmax.f32 %v1670_v53, %v1769_v30  ;;  %v1440_v38 = vmax.f32 %v1324_v4, %v1426_v45  ;;  %v5469_v30 = vld [vmem:[%s7350_s3 + $0x118] sm:$0xff] }
 0x360   : > { %vm1793_vm12 = vcmp.gt.f32.partialorder %v1786_v40, 0.0  ;;  %v1800_v22 = vmul.f32 0.1, %v1786_v40  ;;  %v1556_v34 = vmax.f32 %v1440_v38, %v1542_v6 }
 0x361   : > { %2359 = vmatpush.bf16.msra.mxu3 %v5471_v41 }
 0x362   : > { %v1807_v58 = vsel %vm1793_vm12, %v1786_v40, %v1800_v22  ;;  %v1672_v15 = vmax.f32 %v1556_v34, %v1658_v47 }
 0x363   : > { %v6739_v21 = vpack.c.bf16 %v1807_v58, %v1806_v55  ;;  %v1771_v12 = vpop.f32.mrf.mxu2  ;;  %v5488_v58 = vld [vmem:[%s7350_s3 + $0x1b0] sm:$0xff] }
 0x364   : > { %v1772_v9 = vadd.f32 %v1771_v12, %v6654_v36  ;;  %v1755_v3 = vpop.f32.mrf.mxu0  ;;  %v1663_v12 = vadd.f32 %v6600_v26, %v6598_v39  ;;  %2608 = vmatpush.bf16.msra.mxu0 %v5488_v58  ;;  %v5487_v39 = vld [vmem:[%s7350_s3 + $0x1a8] sm:$0xff]  ;;  %v5461_v26 = vld [vmem:[%s7350_s3 + $0xd8] sm:$0xff] }
 0x365   : > { %5651 = vst [vmem:[#allocation3] sm:$0xff] %v6739_v21   ;;  %2039 = vmatmul.bf16.vlgmr.msrb.gmra.mxu3 %v6739_v21  ;;  %v6781_v62 = vunpack.c.h.b16 %v6739_v21  ;;  %v1885_v59 = vshll.u32 %v6739_v21, 16  ;;  %v1883_v37 = vshrl.u32 %v6739_v21, 16  ;;  %v1558_v21 = vmax.f32 %v1442_v54, %v1547_v57 }
 0x366   : > { %v1787_v36 = vmax.f32 %v1671_v7, %v1772_v9 }
 0x367   : > { %v1887_v18 = vrot.slane %v1885_v59, 1  ;;  %v1674_v9 = vmax.f32 %v1558_v21, %v1663_v12 }
 0x368   : > { %v1801_v7 = vmul.f32 0.1, %v1787_v36  ;;  %vm1794_vm13 = vcmp.gt.f32.partialorder %v1787_v36, 0.0  ;;  %2609 = vmatpush.bf16.msra.mxu0 %v5487_v39 }
 0x369   : > { %v1888_v45 = vor.u32 %v1887_v18, %v1883_v37 }
 0x36a   : > { %v1808_v56 = vsel %vm1794_vm13, %v1787_v36, %v1801_v7  ;;  %v5484_v7 = vld [vmem:[%s7350_s3 + $0x190] sm:$0xff] }
 0x36b   : > { %v1773_v33 = vpop.f32.mrf.mxu2 }
 0x36c   : > { %v1774_v32 = vadd.f32 %v1773_v33, %v6675_v51  ;;  %v2054_v52 = vld [vmem:[#allocation3] sm:$0xe]  ;;  %v2385_v34 = vld [vmem:[#allocation3 + $0x4] sm:$0xf] }
 0x36d   : > { %v2073_v42 = vunpack.c.l.b16 %v2054_v52  ;;  %v5470_v51 = vld [vmem:[%s7350_s3 + $0x120] sm:$0xff]  ;;  %v2414_v41 = vunpack.c.l.b16 %v2385_v34 }
 0x36e   : > { %v1788_v8 = vmax.f32 %v1672_v15, %v1774_v32  ;;  %2360 = vmatpush.bf16.msra.mxu3 %v5470_v51 }
 0x36f   : > { %v2074_v23 = vpack.c.b16 %v6781_v62, %v2073_v42 }
 0x370   : > { %vm1795_vm14 = vcmp.gt.f32.partialorder %v1788_v8, 0.0  ;;  %v1802_v16 = vmul.f32 0.1, %v1788_v8 }
 0x371   : > { %v2076_v61 = vrot.slane %v2074_v23, 1 }
 0x372   : > { %v1809_v53 = vsel %vm1795_vm14, %v1788_v8, %v1802_v16  ;;  %2361 = vmatpush.bf16.msra.mxu3 %v5469_v30 }
 0x373   : > { %v6799_v1 = vpack.c.bf16 %v1809_v53, %v1808_v56  ;;  %v1776_v24 = vpop.f32.mrf.mxu2 }
 0x374   : > { %v1777_v4 = vadd.f32 %v1776_v24, %v6701_v17  ;;  %v5462_v17 = vld [vmem:[%s7350_s3 + $0xe0] sm:$0xff] }
 0x375   : > { %5712 = vst [vmem:[#allocation3 + $0x8] sm:$0xff] %v6799_v1   ;;  %2044 = vmatmul.bf16.gmra.mxu3 %v6799_v1  ;;  %v2077_v40 = vrot.slane %v6799_v1, 1  ;;  %v1890_v22 = vshll.u32 %v6799_v1, 16  ;;  %2261 = vmatpush.bf16.msra.mxu1 %v5462_v17  ;;  %v6852_v13 = vunpack.c.l.b16 %v6799_v1 }
 0x376   : > { %v1789_v6 = vmax.f32 %v1673_v60, %v1777_v4  ;;  %2362 = vmatpush.bf16.msra.mxu3 %v5468_v2  ;;  %v5482_v4 = vld [vmem:[%s7350_s3 + $0x180] sm:$0xff]  ;;  %v5505_v2 = vld [vmem:[%s7350_s3 + $0x238] sm:$0xff] }
 0x377   : > { %v2078_v14 = vsel %vm2075_vm15, %v2076_v61, %v2077_v40  ;;  %v6823_v55 = vrot.slane %v1890_v22, 1  ;;  %v2420_v42 = vpack.c.b16 %v6852_v13, %v2414_v41  ;;  %v1894_v61 = vshrl.u32 %v6799_v1, 16 }
 0x378   : > { %2140 = vmatmul.bf16.vlgmr.msrb.gmra.mxu0 %v2078_v14  ;;  %v1803_v48 = vmul.f32 0.1, %v1789_v6  ;;  %vm1796_vm1 = vcmp.gt.f32.partialorder %v1789_v6, 0.0 }
 0x379   : > { %v1893_v0 = vsel %vm1881_vm0, %v1888_v45, %v6823_v55  ;;  %2262 = vmatpush.bf16.msra.mxu1 %v5461_v26  ;;  %v2426_v51 = vshll.u32 %v2420_v42, 16  ;;  %v2424_v56 = vshrl.u32 %v2420_v42, 16  ;;  %v1896_v58 = vor.u32 %v1894_v61, %v6823_v55  ;;  %v5504_v55 = vld [vmem:[%s7350_s3 + $0x230] sm:$0xff] }
 0x37a   : > { %1964 = vmatmul.bf16.vlgmr.msrb.gmra.mxu1 %v1893_v0  ;;  %2363 = vmatpush.bf16.msra.mxu3 %v5467_v11  ;;  %v1810_v36 = vsel %vm1796_vm1, %v1789_v6, %v1803_v48  ;;  %v5496_v48 = vld [vmem:[%s7350_s3 + $0x1f0] sm:$0xff]  ;;  %v2303_v42 = vpack.c.b16 %v6852_v13, %v6781_v62 }
 0x37b   : > { %v1778_v38 = vpop.f32.mrf.mxu2  ;;  %v2428_v19 = vrot.slane %v2426_v51, 1 }
 0x37c   : > { %v1779_v50 = vadd.f32 %v1778_v38, %v6729_v31  ;;  %v5486_v31 = vld [vmem:[%s7350_s3 + $0x1a0] sm:$0xff] }
 0x37d   : > { %2610 = vmatpush.bf16.msra.mxu0 %v5486_v31  ;;  %2263 = vmatpush.bf16.msra.mxu1 %v5460_v35  ;;  %v2429_v49 = vor.u32 %v2428_v19, %v2424_v56  ;;  %v5502_v31 = vld [vmem:[%s7350_s3 + $0x220] sm:$0xff] }
 0x37e   : > { %v1790_v60 = vmax.f32 %v1674_v9, %v1779_v50  ;;  %2364 = vmatpush.bf16.msra.mxu3 %v5466_v28  ;;  %v5503_v50 = vld [vmem:[%s7350_s3 + $0x228] sm:$0xff] }
 0x380   : > { %vm1797_vm2 = vcmp.gt.f32.partialorder %v1790_v60, 0.0  ;;  %v1804_v47 = vmul.f32 0.1, %v1790_v60 }
 0x381   : > { %2611 = vmatpush.bf16.msra.mxu0 %v5485_v43 }
 0x382   : > { %v1811_v33 = vsel %vm1797_vm2, %v1790_v60, %v1804_v47  ;;  %2827 = vmatpush.bf16.msrb.mxu3 %v5505_v2 }
 0x383   : > { %v6857_v15 = vpack.c.bf16 %v1811_v33, %v1810_v36  ;;  %v1781_v32 = vpop.f32.mrf.mxu2 }
 0x384   : > { %v1782_v52 = vadd.f32 %v1781_v32, %v6752_v25  ;;  %v5459_v25 = vld [vmem:[%s7350_s3 + $0xc8] sm:$0xff] }
 0x385   : > { %5713 = vst [vmem:[#allocation3 + $0x10] sm:$0xff] %v6857_v15   ;;  %2264 = vmatpush.bf16.msra.mxu1 %v5459_v25  ;;  %2612 = vmatpush.bf16.msra.mxu0 %v5484_v7  ;;  %v6913_v11 = vunpack.c.h.b16 %v6857_v15  ;;  %v5501_v25 = vld [vmem:[%s7350_s3 + $0x218] sm:$0xff] }
 0x386   : > { %v1791_v29 = vmax.f32 %v1675_v5, %v1782_v52  ;;  %v5483_v5 = vld [vmem:[%s7350_s3 + $0x188] sm:$0xff]  ;;  %2828 = vmatpush.bf16.msrb.mxu3 %v5504_v55  ;;  %v2160_v52 = vld [vmem:[#allocation3] sm:$0x8] }
 0x387   : > { %v2181_v7 = vunpack.c.l.b16 %v2160_v52 }
 0x388   : > { %vm1798_vm3 = vcmp.gt.f32.partialorder %v1791_v29, 0.0  ;;  %v1805_v8 = vmul.f32 0.1, %v1791_v29 }
 0x389   : > { %2265 = vmatpush.bf16.msra.mxu1 %v5458_v44  ;;  %2613 = vmatpush.bf16.msra.mxu0 %v5483_v5  ;;  %v2183_v44 = vpack.c.b16 %v6781_v62, %v2181_v7  ;;  %v5494_v5 = vld [vmem:[%s7350_s3 + $0x1e0] sm:$0xff]  ;;  %v5493_v62 = vld [vmem:[%s7350_s3 + $0x1d8] sm:$0xff] }
 0x38a   : > { %v1812_v3 = vsel %vm1798_vm3, %v1791_v29, %v1805_v8  ;;  %2829 = vmatpush.bf16.msrb.mxu3 %v5503_v50  ;;  %v5495_v29 = vld [vmem:[%s7350_s3 + $0x1e8] sm:$0xff] }
 0x38b   : > { %v1819_v20 = vpack.c.bf16 %v1812_v3, %v1812_v3  ;;  %v1783_v59 = vpop.f32.mrf.mxu2  ;;  %v2187_v19 = vshrl.u32 %v2183_v44, 16  ;;  %v2190_v56 = vshll.u32 %v2183_v44, 16 }
 0x38c   : > { %v6883_v10 = vld [vmem:[#allocation3 + $0x10] sm:$0xff]   ;;  %v2525_v59 = vld [vmem:[#allocation3 + $0x4] sm:$0x8] }
 0x38d   : > { %v1848_v16 = vld [vmem:[#allocation3 + $0x14] sm:$0x1]  ;;  %v6885_v23 = vld [vmem:[#allocation3 + $0xc] sm:$0xff]   ;;  %1826 = vst [vmem:[#allocation3 + $0x18] sm:$0xf] %v1819_v20  ;;  %v6888_v27 = vunpack.c.l.b16 %v6883_v10  ;;  %2614 = vmatpush.bf16.msra.mxu0 %v5482_v4  ;;  %v2192_v4 = vrot.slane %v2190_v56, 4 }
 0x38e   : > { %v1877_v46 = vunpack.c.l.b16 %v1848_v16  ;;  %v2431_v53 = vshll.u32 %v6885_v23, 16  ;;  %v2435_v30 = vshrl.u32 %v6885_v23, 16  ;;  %2830 = vmatpush.bf16.msrb.mxu3 %v5502_v31  ;;  %v5500_v20 = vld [vmem:[%s7350_s3 + $0x210] sm:$0xff]  ;;  %v5499_v16 = vld [vmem:[%s7350_s3 + $0x208] sm:$0xff] }
 0x38f   : > { %v1979_v18 = vpack.c.b16 %v6888_v27, %v6888_v27 }
 0x390   : > { %v1880_v24 = vpack.c.b16 %v1877_v46, %v6888_v27  ;;  %v2433_v57 = vrot.slane %v2431_v53, 1  ;;  %v2664_v63 = vrot.slane %v2435_v30, 3  ;;  %v2665_v45 = vrot.slane %v2431_v53, 4  ;;  %v5498_v53 = vld [vmem:[%s7350_s3 + $0x200] sm:$0xff] }
 0x391   : > { %2049 = vmatmul.bf16.gmra.mxu3 %v1979_v18  ;;  %v2546_v46 = vunpack.c.l.b16 %v2525_v59  ;;  %v5669_v18 = vunpack.c.h.b16 %v6799_v1 }
 0x392   : > { %v2079_v37 = vrot.slane %v1880_v24, 1  ;;  %v1898_v54 = vshll.u32 %v1880_v24, 16  ;;  %v2434_v14 = vsel %vm1881_vm0, %v2429_v49, %v2433_v57  ;;  %v6909_v0 = vor.u32 %v2665_v45, %v2664_v63  ;;  %2831 = vmatpush.bf16.msrb.mxu3 %v5501_v25 }
 0x393   : > { %2505 = vmatmul.bf16.vlgmr.msra.gmra.mxu2 %v2434_v14  ;;  %v2437_v35 = vor.u32 %v2435_v30, %v2433_v57  ;;  %v1902_v51 = vshrl.u32 %v1880_v24, 16  ;;  %v2194_v30 = vrot.slane %v1894_v61, 3  ;;  %v2548_v24 = vpack.c.b16 %v6852_v13, %v2546_v46 }
 0x394   : > { %v2080_v17 = vsel %vm2075_vm15, %v2077_v40, %v2079_v37  ;;  %v1900_v21 = vrot.slane %v1898_v54, 1  ;;  %v2390_v12 = vld [vmem:[#allocation3 + $0x18] sm:$0x1]  ;;  %v2195_v49 = vrot.slane %v1890_v22, 4  ;;  %v2189_v57 = vrot.slane %v2187_v19, 3 }
 0x395   : > { %2145 = vmatmul.bf16.gmra.mxu0 %v2080_v17  ;;  %v2419_v38 = vunpack.c.l.b16 %v2390_v12  ;;  %v2635_v39 = vld [vmem:[#allocation3 + $0x18] sm:$0xf]  ;;  %v2304_v63 = vpack.c.b16 %v6888_v27, %v5669_v18  ;;  %v2552_v54 = vrot.slane %v6885_v23, 3  ;;  %v2551_v14 = vrot.slane %v2548_v24, 3  ;;  %v5492_v27 = vld [vmem:[%s7350_s3 + $0x1d0] sm:$0xff] }
 0x396   : > { %v1901_v6 = vsel %vm1881_vm0, %v1896_v58, %v1900_v21  ;;  %v5497_v40 = vld [vmem:[%s7350_s3 + $0x1f8] sm:$0xff]  ;;  %v6921_v26 = vunpack.c.l.b16 %v2635_v39  ;;  %v1904_v3 = vor.u32 %v1902_v51, %v1900_v21  ;;  %2832 = vmatpush.bf16.msrb.mxu3 %v5500_v20  ;;  %v2196_v61 = vor.u32 %v2195_v49, %v2194_v30  ;;  %v5491_v21 = vld [vmem:[%s7350_s3 + $0x1c8] sm:$0xff]  ;;  %v5490_v39 = vld [vmem:[%s7350_s3 + $0x1c0] sm:$0xff] }
 0x397   : > { %1969 = vmatmul.bf16.gmra.mxu1 %v1901_v6  ;;  %v2422_v9 = vpack.c.b16 %v2419_v38, %v6913_v11  ;;  %v2182_v45 = vunpack.c.h.b16 %v6883_v10  ;;  %v2553_v13 = vsel %vm2550_vm5, %v2551_v14, %v2552_v54  ;;  %v2193_v17 = vor.u32 %v2192_v4, %v2189_v57  ;;  %v2526_v22 = vld [vmem:[#allocation3 + $0x18] sm:$0x7] }
 0x398   : > { %2728 = vmatpush.bf16.msrb.mxu1 %v5497_v40  ;;  %v2655_v60 = vpack.c.b16 %v6921_v26, %v6913_v11  ;;  %v2547_v58 = vunpack.c.l.b16 %v2526_v22  ;;  %v2199_v12 = vshrl.u32 %v6883_v10, 16  ;;  %v2202_v6 = vshll.u32 %v6883_v10, 16  ;;  %v5513_v22 = vld [vmem:[%s7351_s4 + $0x38] sm:$0xff] }
 0x399   : > { %v2439_v28 = vshll.u32 %v2422_v9, 16  ;;  %v2197_v23 = vsel %vm2185_vm4, %v2193_v17, %v2196_v61  ;;  %v2657_v10 = vshrl.u32 %v2548_v24, 16  ;;  %3067 = vmatpush.bf16.msrb.mxu0 %v5513_v22  ;;  %v5535_v22 = vld [vmem:[%s7351_s4 + $0xe8] sm:$0xff] }
 0x39a   : > { %v2669_v34 = vshrl.u32 %v2655_v60, 16  ;;  %v2672_v47 = vshll.u32 %v2655_v60, 16  ;;  %2833 = vmatpush.bf16.msrb.mxu3 %v5499_v16  ;;  %v2549_v38 = vpack.c.b16 %v2547_v58, %v6913_v11  ;;  %v2201_v40 = vrot.slane %v2199_v12, 3  ;;  %v5512_v12 = vld [vmem:[%s7351_s4 + $0x30] sm:$0xff] }
 0x39b   : > { %v2441_v41 = vrot.slane %v2439_v28, 1  ;;  %v2204_v55 = vrot.slane %v2202_v6, 4  ;;  %v2660_v11 = vshll.u32 %v2548_v24, 16 }
 0x39c   : > { %2729 = vmatpush.bf16.msrb.mxu1 %v5496_v48  ;;  %v2671_v36 = vrot.slane %v2669_v34, 3  ;;  %v2674_v33 = vrot.slane %v2672_v47, 4  ;;  %v2554_v50 = vrot.slane %v2549_v38, 3  ;;  %v2659_v34 = vrot.slane %v2657_v10, 3 }
 0x39d   : > { %v2442_v8 = vsel %vm1881_vm0, %v2437_v35, %v2441_v41  ;;  %v2205_v48 = vor.u32 %v2204_v55, %v2201_v40  ;;  %v2662_v47 = vrot.slane %v2660_v11, 4  ;;  %3068 = vmatpush.bf16.msrb.mxu0 %v5512_v12  ;;  %v5511_v55 = vld [vmem:[%s7351_s4 + $0x28] sm:$0xff]  ;;  %v5538_v12 = vld [vmem:[%s7351_s4 + $0x100] sm:$0xff] }
 0x39e   : > { %v6935_v32 = vor.u32 %v2674_v33, %v2671_v36  ;;  %2834 = vmatpush.bf16.msrb.mxu3 %v5498_v53  ;;  %v2555_v60 = vsel %vm2550_vm5, %v2552_v54, %v2554_v50 }
 0x39f   : > { %v2206_v28 = vsel %vm2185_vm4, %v2196_v61, %v2205_v48  ;;  %v2663_v31 = vor.u32 %v2662_v47, %v2659_v34  ;;  %v5509_v34 = vld [vmem:[%s7351_s4 + $0x18] sm:$0xff] }
 0x3a0   : > { %v6942_v43 = vsel %vm2185_vm4, %v6909_v0, %v6935_v32  ;;  %2730 = vmatpush.bf16.msrb.mxu1 %v5495_v29 }
 0x3a1   : > { %2365 = vmatmul.bf16.vlgmr.msra.gmra.mxu3 %v2303_v42  ;;  %v2667_v36 = vsel %vm2185_vm4, %v2663_v31, %v6909_v0  ;;  %3069 = vmatpush.bf16.msrb.mxu0 %v5511_v55  ;;  %v5549_v55 = vld [vmem:[%s7351_s4 + $0x158] sm:$0xff] }
 0x3a3   : > { %2510 = vmatmul.bf16.gmra.mxu2 %v2442_v8 }
 0x3a4   : > { %2731 = vmatpush.bf16.msrb.mxu1 %v5494_v5 }
 0x3a5   : > { %2150 = vmatmul.bf16.gmra.mxu0 %v2079_v37  ;;  %v2443_v37 = vshrl.u32 %v2422_v9, 16  ;;  %v2305_v9 = vpack.c.b16 %v2182_v45, %v2182_v45 }
 0x3a7   : > { %1974 = vmatmul.bf16.gmra.mxu1 %v1904_v3  ;;  %v2445_v2 = vor.u32 %v2443_v37, %v2441_v41  ;;  %v2775_v41 = vpack.c.b16 %v6921_v26, %v6921_v26 }
 0x3a8   : > { %2732 = vmatpush.bf16.msrb.mxu1 %v5493_v62 }
 0x3ac   : > { %2733 = vmatpush.bf16.msrb.mxu1 %v5492_v27 }
 0x3b0   : > { %2734 = vmatpush.bf16.msrb.mxu1 %v5491_v21 }
 0x3b1   : > { %2370 = vmatmul.bf16.gmra.mxu3 %v2304_v63 }
 0x3b3   : > { %2515 = vmatmul.bf16.gmra.mxu2 %v2445_v2 }
 0x3b4   : > { %2735 = vmatpush.bf16.msrb.mxu1 %v5490_v39 }
 0x3b5   : > { %2615 = vmatmul.bf16.vlgmr.msra.gmra.mxu0 %v2553_v13 }
 0x3b7   : > { %2266 = vmatmul.bf16.vlgmr.msra.gmra.mxu1 %v2197_v23 }
 0x3c1   : > { %2375 = vmatmul.bf16.gmra.mxu3 %v2305_v9 }
 0x3c5   : > { %2620 = vmatmul.bf16.gmra.mxu0 %v2555_v60  ;;  %v5510_v60 = vld [vmem:[%s7351_s4 + $0x20] sm:$0xff] }
 0x3c6   : > { %3070 = vmatpush.bf16.msrb.mxu0 %v5510_v60  ;;  %v5577_v60 = vld [vmem:[%s7351_s4 + $0x238] sm:$0xff] }
 0x3c7   : > { %2271 = vmatmul.bf16.gmra.mxu1 %v2206_v28 }
 0x3ca   : > { %3071 = vmatpush.bf16.msrb.mxu0 %v5509_v34 }
 0x3d1   : > { %2835 = vmatmul.bf16.vlgmr.msrb.gmra.mxu3 %v6799_v1 }
 0x3d5   : > { %2625 = vmatmul.bf16.gmra.mxu0 %v2554_v50 }
 0x3d7   : > { %2276 = vmatmul.bf16.gmra.mxu1 %v2205_v48 }
 0x3e1   : > { %2840 = vmatmul.bf16.gmra.mxu3 %v6857_v15 }
 0x3e7   : > { %2736 = vmatmul.bf16.vlgmr.msrb.gmra.mxu1 %v2667_v36 }
 0x3e8   : > { %v2040_v33 = vpop.f32.mrf.mxu3 }
 0x3f0   : > { %v2042_v52 = vpop.f32.mrf.mxu3 }
 0x3f1   : > { %2845 = vmatmul.bf16.gmra.mxu3 %v2775_v41  ;;  %v5508_v41 = vld [vmem:[%s7351_s4 + $0x10] sm:$0xff] }
 0x3f2   : > { %3072 = vmatpush.bf16.msrb.mxu0 %v5508_v41 }
 0x3f5   : > { %v2141_v35 = vpop.f32.mrf.mxu0 }
 0x3f7   : > { %2741 = vmatmul.bf16.gmra.mxu1 %v6942_v43  ;;  %v1965_v1 = vpop.f32.mrf.mxu1 }
 0x3f8   : > { %v2041_v42 = vadd.f32 %v2040_v33, %v1965_v1  ;;  %v2045_v25 = vpop.f32.mrf.mxu3  ;;  %v5521_v33 = vld [vmem:[%s7351_s4 + $0x78] sm:$0xff] }
 0x3f9   : > { %2998 = vmatpush.bf16.msrb.mxu2 %v5521_v33  ;;  %v5548_v33 = vld [vmem:[%s7351_s4 + $0x150] sm:$0xff] }
 0x3fa   : > { %v2155_v29 = vadd.f32 %v2141_v35, %v2041_v42  ;;  %v5507_v35 = vld [vmem:[%s7351_s4 + $0x8] sm:$0xff] }
 0x3fb   : > { %3073 = vmatpush.bf16.msrb.mxu0 %v5507_v35  ;;  %v5532_v35 = vld [vmem:[%s7351_s4 + $0xd0] sm:$0xff] }
 0x3fd   : > { %v2143_v15 = vpop.f32.mrf.mxu0 }
 0x3ff   : > { %v1967_v7 = vpop.f32.mrf.mxu1 }
 0x400   : > { %v2047_v8 = vpop.f32.mrf.mxu3  ;;  %v2043_v14 = vadd.f32 %v2042_v52, %v1967_v7  ;;  %v5545_v7 = vld [vmem:[%s7351_s4 + $0x138] sm:$0xff] }
 0x401   : > { %3362 = vmatpush.bf16.msra.mxu1 %v5545_v7  ;;  %v5528_v7 = vld [vmem:[%s7351_s4 + $0xb0] sm:$0xff] }
 0x402   : > { %v2156_v27 = vadd.f32 %v2143_v15, %v2043_v14 }
 0x407   : > { %2746 = vmatmul.bf16.gmra.mxu1 %v6935_v32 }
 0x412   : > { %v2146_v0 = vpop.f32.mrf.mxu0 }
 0x414   : > { %v1970_v51 = vpop.f32.mrf.mxu1  ;;  %v2050_v44 = vpop.f32.mrf.mxu3 }
 0x415   : > { %v2046_v3 = vadd.f32 %v2045_v25, %v1970_v51  ;;  %v5520_v51 = vld [vmem:[%s7351_s4 + $0x70] sm:$0xff] }
 0x416   : > { %v2506_v20 = vpop.f32.mrf.mxu2  ;;  %2999 = vmatpush.bf16.msrb.mxu2 %v5520_v51 }
 0x417   : > { %v2157_v26 = vadd.f32 %v2146_v0, %v2046_v3 }
 0x41a   : > { %v2148_v5 = vpop.f32.mrf.mxu0 }
 0x41c   : > { %v1972_v59 = vpop.f32.mrf.mxu1  ;;  %v2052_v16 = vpop.f32.mrf.mxu3 }
 0x41d   : > { %v2048_v43 = vadd.f32 %v2047_v8, %v1972_v59  ;;  %v5506_v8 = vld [vmem:[%s7351_s4] sm:$0xff]  ;;  %v5519_v59 = vld [vmem:[%s7351_s4 + $0x68] sm:$0xff] }
 0x41e   : > { %v2508_v62 = vpop.f32.mrf.mxu2  ;;  %3074 = vmatpush.bf16.msrb.mxu0 %v5506_v8  ;;  %3000 = vmatpush.bf16.msrb.mxu2 %v5519_v59  ;;  %v5518_v16 = vld [vmem:[%s7351_s4 + $0x60] sm:$0xff]  ;;  %v5575_v8 = vld [vmem:[%s7351_s4 + $0x228] sm:$0xff] }
 0x41f   : > { %v2158_v19 = vadd.f32 %v2148_v5, %v2048_v43  ;;  %v5543_v43 = vld [vmem:[%s7351_s4 + $0x128] sm:$0xff] }
 0x422   : > { %v2151_v46 = vpop.f32.mrf.mxu0  ;;  %3001 = vmatpush.bf16.msrb.mxu2 %v5518_v16  ;;  %v5530_v16 = vld [vmem:[%s7351_s4 + $0xc0] sm:$0xff] }
 0x424   : > { %v1975_v56 = vpop.f32.mrf.mxu1  ;;  %v2366_v30 = vpop.f32.mrf.mxu3 }
 0x425   : > { %v2051_v53 = vadd.f32 %v2050_v44, %v1975_v56 }
 0x426   : > { %v2511_v32 = vpop.f32.mrf.mxu2 }
 0x427   : > { %v2159_v18 = vadd.f32 %v2151_v46, %v2051_v53  ;;  %v5553_v46 = vld [vmem:[%s7351_s4 + $0x178] sm:$0xff] }
 0x428   : > { %3479 = vmatpush.bf16.msra.mxu3 %v5553_v46 }
 0x42a   : > { %v2153_v24 = vpop.f32.mrf.mxu0 }
 0x42b   : > { %v5552_v24 = vld [vmem:[%s7351_s4 + $0x170] sm:$0xff] }
 0x42c   : > { %v1977_v49 = vpop.f32.mrf.mxu1  ;;  %v2368_v57 = vpop.f32.mrf.mxu3  ;;  %3480 = vmatpush.bf16.msra.mxu3 %v5552_v24 }
 0x42d   : > { %v5517_v49 = vld [vmem:[%s7351_s4 + $0x58] sm:$0xff] }
 0x42e   : > { %v2513_v63 = vpop.f32.mrf.mxu2  ;;  %3002 = vmatpush.bf16.msrb.mxu2 %v5517_v49 }
 0x432   : > { %v7000_v37 = vpop.f32.mrf.mxu0 }
 0x434   : > { %v2267_v54 = vpop.f32.mrf.mxu1  ;;  %v2371_v2 = vpop.f32.mrf.mxu3 }
 0x435   : > { %v2281_v4 = vadd.f32 %v2267_v54, %v2155_v29  ;;  %v5540_v54 = vld [vmem:[%s7351_s4 + $0x110] sm:$0xff] }
 0x436   : > { %v2516_v45 = vpop.f32.mrf.mxu2 }
 0x437   : > { %v2380_v61 = vadd.f32 %v2366_v30, %v2281_v4 }
 0x439   : > { %v2520_v13 = vadd.f32 %v2506_v20, %v2380_v61  ;;  %v5544_v20 = vld [vmem:[%s7351_s4 + $0x130] sm:$0xff] }
 0x43a   : > { %v7002_v17 = vpop.f32.mrf.mxu0  ;;  %3363 = vmatpush.bf16.msra.mxu1 %v5544_v20 }
 0x43c   : > { %v2269_v23 = vpop.f32.mrf.mxu1  ;;  %v2373_v21 = vpop.f32.mrf.mxu3 }
 0x43d   : > { %v2282_v58 = vadd.f32 %v2269_v23, %v2156_v27  ;;  %v5516_v23 = vld [vmem:[%s7351_s4 + $0x50] sm:$0xff] }
 0x43e   : > { %v2518_v38 = vpop.f32.mrf.mxu2  ;;  %3364 = vmatpush.bf16.msra.mxu1 %v5543_v43  ;;  %3003 = vmatpush.bf16.msrb.mxu2 %v5516_v23 }
 0x43f   : > { %v2381_v6 = vadd.f32 %v2368_v57, %v2282_v58  ;;  %v5550_v58 = vld [vmem:[%s7351_s4 + $0x160] sm:$0xff] }
 0x441   : > { %v7010_v39 = vadd.f32 %v2508_v62, %v2381_v6  ;;  %v5542_v62 = vld [vmem:[%s7351_s4 + $0x120] sm:$0xff] }
 0x442   : > { %v7012_v40 = vpop.f32.mrf.mxu0  ;;  %3365 = vmatpush.bf16.msra.mxu1 %v5542_v62  ;;  %v5574_v62 = vld [vmem:[%s7351_s4 + $0x220] sm:$0xff] }
 0x443   : > { %v2631_v4 = vadd.f32 %v7002_v17, %v7010_v39  ;;  %v5539_v17 = vld [vmem:[%s7351_s4 + $0x108] sm:$0xff] }
 0x444   : > { %v2272_v9 = vpop.f32.mrf.mxu1  ;;  %v2376_v48 = vpop.f32.mrf.mxu3  ;;  %v5515_v39 = vld [vmem:[%s7351_s4 + $0x48] sm:$0xff] }
 0x445   : > { %v2283_v50 = vadd.f32 %v2272_v9, %v2157_v26  ;;  %3004 = vmatpush.bf16.msrb.mxu2 %v5515_v39 }
 0x447   : > { %v2382_v28 = vadd.f32 %v2371_v2, %v2283_v50  ;;  %v5551_v2 = vld [vmem:[%s7351_s4 + $0x168] sm:$0xff] }
 0x448   : > { %3481 = vmatpush.bf16.msra.mxu3 %v5551_v2 }
 0x449   : > { %v7020_v10 = vadd.f32 %v2511_v32, %v2382_v28  ;;  %v5537_v32 = vld [vmem:[%s7351_s4 + $0xf8] sm:$0xff] }
 0x44a   : > { %v7022_v11 = vpop.f32.mrf.mxu0  ;;  %3272 = vmatpush.bf16.msra.mxu0 %v5537_v32  ;;  %v5573_v32 = vld [vmem:[%s7351_s4 + $0x218] sm:$0xff] }
 0x44b   : > { %v2632_v50 = vadd.f32 %v7012_v40, %v7020_v10  ;;  %v5533_v40 = vld [vmem:[%s7351_s4 + $0xd8] sm:$0xff] }
 0x44c   : > { %v2274_v47 = vpop.f32.mrf.mxu1  ;;  %v2378_v36 = vpop.f32.mrf.mxu3  ;;  %3482 = vmatpush.bf16.msra.mxu3 %v5550_v58 }
 0x44d   : > { %v2284_v31 = vadd.f32 %v2274_v47, %v2158_v19  ;;  %v2630_v19 = vadd.f32 %v7000_v37, %v2520_v13  ;;  %v5536_v37 = vld [vmem:[%s7351_s4 + $0xf0] sm:$0xff]  ;;  %v5514_v36 = vld [vmem:[%s7351_s4 + $0x40] sm:$0xff] }
 0x44e   : > { %3273 = vmatpush.bf16.msra.mxu0 %v5536_v37  ;;  %3005 = vmatpush.bf16.msrb.mxu2 %v5514_v36  ;;  %v5525_v37 = vld [vmem:[%s7351_s4 + $0x98] sm:$0xff] }
 0x44f   : > { %v2383_v1 = vadd.f32 %v2373_v21, %v2284_v31  ;;  %v5534_v21 = vld [vmem:[%s7351_s4 + $0xe0] sm:$0xff] }
 0x450   : > { %3483 = vmatpush.bf16.msra.mxu3 %v5549_v55 }
 0x451   : > { %v7033_v52 = vadd.f32 %v2513_v63, %v2383_v1  ;;  %v7085_v63 = vld [vmem:[%s7353_s6 + $0x1] ss:$0 sm:$0xff]  ;;  %v5529_v1 = vld [vmem:[%s7351_s4 + $0xb8] sm:$0xff] }
 0x452   : > { %v7035_v42 = vpop.f32.mrf.mxu0  ;;  %3274 = vmatpush.bf16.msra.mxu0 %v5535_v22  ;;  %3159 = vmatpush.bf16.msra.mxu2 %v5529_v1  ;;  %v5522_v1 = vld [vmem:[%s7351_s4 + $0x80] sm:$0xff] }
 0x454   : > { %v2277_v29 = vpop.f32.mrf.mxu1  ;;  %v2836_v15 = vpop.f32.mrf.mxu3  ;;  %3484 = vmatpush.bf16.msra.mxu3 %v5548_v33 }
 0x455   : > { %v2285_v25 = vadd.f32 %v2277_v29, %v2159_v18  ;;  %v5541_v18 = vld [vmem:[%s7351_s4 + $0x118] sm:$0xff]  ;;  %v5576_v29 = vld [vmem:[%s7351_s4 + $0x230] sm:$0xff] }
 0x456   : > { %3366 = vmatpush.bf16.msra.mxu1 %v5541_v18  ;;  %3275 = vmatpush.bf16.msra.mxu0 %v5534_v21 }
 0x457   : > { %v2384_v0 = vadd.f32 %v2376_v48, %v2285_v25  ;;  %v5547_v25 = vld [vmem:[%s7351_s4 + $0x148] sm:$0xff]  ;;  %3160 = vmatpush.bf16.msra.mxu2 %v5528_v7 }
 0x458   : > { %3485 = vmatpush.bf16.msra.mxu3 %v5547_v25 }
 0x459   : > { %v7049_v3 = vadd.f32 %v2516_v45, %v2384_v0 }
 0x45a   : > { %v2628_v44 = vpop.f32.mrf.mxu0  ;;  %3367 = vmatpush.bf16.msra.mxu1 %v5540_v54  ;;  %3276 = vmatpush.bf16.msra.mxu0 %v5533_v40  ;;  %v5568_v54 = vld [vmem:[%s7351_s4 + $0x1f0] sm:$0xff] }
 0x45b   : > { %v2634_v46 = vadd.f32 %v7035_v42, %v7049_v3 }
 0x45c   : > { %v2279_v26 = vpop.f32.mrf.mxu1  ;;  %v2838_v5 = vpop.f32.mrf.mxu3 }
 0x45e   : > { %3368 = vmatpush.bf16.msra.mxu1 %v5539_v17  ;;  %3277 = vmatpush.bf16.msra.mxu0 %v5532_v35  ;;  %v5565_v35 = vld [vmem:[%s7351_s4 + $0x1d8] sm:$0xff] }
 0x462   : > { %3369 = vmatpush.bf16.msra.mxu1 %v5538_v12 }
 0x464   : > { %v2737_v56 = vpop.f32.mrf.mxu1  ;;  %v2841_v30 = vpop.f32.mrf.mxu3 }
 0x465   : > { %v2751_v53 = vadd.f32 %v2737_v56, %v2630_v19 }
 0x466   : > { %3777 = vmatpush.bf16.msrb.mxu1 %v5577_v60 }
 0x467   : > { %v2850_v57 = vadd.f32 %v2836_v15, %v2751_v53  ;;  %v2633_v15 = vadd.f32 %v7022_v11, %v7033_v52  ;;  %v5531_v11 = vld [vmem:[%s7351_s4 + $0xc8] sm:$0xff]  ;;  %v5546_v52 = vld [vmem:[%s7351_s4 + $0x140] sm:$0xff] }
 0x468   : > { %3278 = vmatpush.bf16.msra.mxu0 %v5531_v11  ;;  %3486 = vmatpush.bf16.msra.mxu3 %v5546_v52  ;;  %v5526_v53 = vld [vmem:[%s7351_s4 + $0xa0] sm:$0xff] }
 0x469   : > { %v2856_v61 = vadd.f32 %v7085_v63, %v2850_v57 }
 0x46a   : > { %3778 = vmatpush.bf16.msrb.mxu1 %v5576_v29 }
 0x46b   : > { %v2866_v6 = vmul.f32 0.1, %v2856_v61  ;;  %vm2861_vm6 = vcmp.gt.f32.partialorder %v2856_v61, 0.0 }
 0x46c   : > { %v2739_v14 = vpop.f32.mrf.mxu1  ;;  %v2843_v13 = vpop.f32.mrf.mxu3  ;;  %3279 = vmatpush.bf16.msra.mxu0 %v5530_v16 }
 0x46d   : > { %v2752_v45 = vadd.f32 %v2739_v14, %v2631_v4  ;;  %v2871_v28 = vsel %vm2861_vm6, %v2856_v61, %v2866_v6  ;;  %v5572_v4 = vld [vmem:[%s7351_s4 + $0x210] sm:$0xff]  ;;  %v5567_v14 = vld [vmem:[%s7351_s4 + $0x1e8] sm:$0xff] }
 0x46e   : > { %3779 = vmatpush.bf16.msrb.mxu1 %v5575_v8 }
 0x46f   : > { %v2851_v27 = vadd.f32 %v2838_v5, %v2752_v45  ;;  %v5527_v5 = vld [vmem:[%s7351_s4 + $0xa8] sm:$0xff] }
 0x470   : > { %3161 = vmatpush.bf16.msra.mxu2 %v5527_v5  ;;  %v5571_v45 = vld [vmem:[%s7351_s4 + $0x208] sm:$0xff]  ;;  %v5564_v5 = vld [vmem:[%s7351_s4 + $0x1d0] sm:$0xff] }
 0x471   : > { %v2857_v38 = vadd.f32 %v7085_v63, %v2851_v27 }
 0x472   : > { %3780 = vmatpush.bf16.msrb.mxu1 %v5574_v62 }
 0x473   : > { %vm2862_vm7 = vcmp.gt.f32.partialorder %v2857_v38, 0.0  ;;  %v2867_v9 = vmul.f32 0.1, %v2857_v38 }
 0x474   : > { %v2742_v48 = vpop.f32.mrf.mxu1  ;;  %v2846_v31 = vpop.f32.mrf.mxu3  ;;  %3162 = vmatpush.bf16.msra.mxu2 %v5526_v53 }
 0x475   : > { %v2872_v34 = vsel %vm2862_vm7, %v2857_v38, %v2867_v9  ;;  %v2753_v47 = vadd.f32 %v2742_v48, %v2632_v50  ;;  %v5523_v38 = vld [vmem:[%s7351_s4 + $0x88] sm:$0xff] }
 0x476   : > { %v7135_v10 = vpack.c.bf16 %v2872_v34, %v2871_v28  ;;  %3781 = vmatpush.bf16.msrb.mxu1 %v5573_v32  ;;  %v5566_v28 = vld [vmem:[%s7351_s4 + $0x1e0] sm:$0xff] }
 0x477   : > { %v2852_v41 = vadd.f32 %v2841_v30, %v2753_v47  ;;  %v5569_v30 = vld [vmem:[%s7351_s4 + $0x1f8] sm:$0xff]  ;;  %v5570_v34 = vld [vmem:[%s7351_s4 + $0x200] sm:$0xff] }
 0x478   : > { %5682 = vst [vmem:[#allocation4] sm:$0xff] %v7135_v10   ;;  %3075 = vmatmul.bf16.vlgmr.msrb.gmra.mxu0 %v7135_v10  ;;  %3163 = vmatpush.bf16.msra.mxu2 %v5525_v37  ;;  %v7215_v21 = vunpack.c.h.b16 %v7135_v10  ;;  %v2934_v33 = vshrl.u32 %v7135_v10, 16 }
 0x479   : > { %v2858_v51 = vadd.f32 %v7085_v63, %v2852_v41  ;;  %3687 = vmatpush.bf16.msrb.mxu0 %v5569_v30 }
 0x47a   : > { %3782 = vmatpush.bf16.msrb.mxu1 %v5572_v4 }
 0x47b   : > { %v2868_v59 = vmul.f32 0.1, %v2858_v51  ;;  %vm2863_vm8 = vcmp.gt.f32.partialorder %v2858_v51, 0.0 }
 0x47c   : > { %v2744_v0 = vpop.f32.mrf.mxu1  ;;  %v2848_v20 = vpop.f32.mrf.mxu3 }
 0x47d   : > { %v2754_v44 = vadd.f32 %v2744_v0, %v2633_v15  ;;  %v2873_v18 = vsel %vm2863_vm8, %v2858_v51, %v2868_v59  ;;  %3688 = vmatpush.bf16.msrb.mxu0 %v5568_v54 }
 0x47e   : > { %3783 = vmatpush.bf16.msrb.mxu1 %v5571_v45  ;;  %v5557_v45 = vld [vmem:[%s7351_s4 + $0x198] sm:$0xff] }
 0x47f   : > { %v2853_v26 = vadd.f32 %v2843_v13, %v2754_v44  ;;  %v2936_v13 = vshll.u32 %v7135_v10, 16  ;;  %v3383_v17 = vld [vmem:[#allocation4 + $0x4] sm:$0xf]  ;;  %v3180_v27 = vld [vmem:[#allocation4] sm:$0x8] }
 0x480   : > { %v3408_v9 = vunpack.c.l.b16 %v3383_v17  ;;  %v3201_v60 = vunpack.c.l.b16 %v3180_v27 }
 0x481   : > { %v2859_v43 = vadd.f32 %v7085_v63, %v2853_v26  ;;  %3689 = vmatpush.bf16.msrb.mxu0 %v5567_v14  ;;  %v2938_v48 = vrot.slane %v2936_v13, 1  ;;  %v5561_v26 = vld [vmem:[%s7351_s4 + $0x1b8] sm:$0xff]  ;;  %v3085_v13 = vld [vmem:[#allocation4] sm:$0xe] }
 0x482   : > { %v3203_v29 = vpack.c.b16 %v7215_v21, %v3201_v60  ;;  %3784 = vmatpush.bf16.msrb.mxu1 %v5570_v34  ;;  %v5554_v60 = vld [vmem:[%s7351_s4 + $0x180] sm:$0xff] }
 0x483   : > { %vm2864_vm9 = vcmp.gt.f32.partialorder %v2859_v43, 0.0  ;;  %v2869_v19 = vmul.f32 0.1, %v2859_v43  ;;  %v2939_v25 = vor.u32 %v2938_v48, %v2934_v33 }
 0x484   : > { %v2747_v56 = vpop.f32.mrf.mxu1  ;;  %v3206_v11 = vshrl.u32 %v3203_v29, 16  ;;  %v3209_v52 = vshll.u32 %v3203_v29, 16 }
 0x485   : > { %v2874_v24 = vsel %vm2864_vm9, %v2859_v43, %v2869_v19  ;;  %v2755_v49 = vadd.f32 %v2747_v56, %v2634_v46  ;;  %3690 = vmatpush.bf16.msrb.mxu0 %v5566_v28  ;;  %v5560_v19 = vld [vmem:[%s7351_s4 + $0x1b0] sm:$0xff]  ;;  %v5563_v46 = vld [vmem:[%s7351_s4 + $0x1c8] sm:$0xff] }
 0x486   : > { %v7190_v42 = vpack.c.bf16 %v2874_v24, %v2873_v18  ;;  %v3208_v30 = vrot.slane %v3206_v11, 3  ;;  %v3211_v32 = vrot.slane %v3209_v52, 4 }
 0x487   : > { %v2854_v3 = vadd.f32 %v2846_v31, %v2755_v49 }
 0x488   : > { %5717 = vst [vmem:[#allocation4 + $0x8] sm:$0xff] %v7190_v42   ;;  %v5694_v58 = vunpack.c.l.b16 %v7190_v42  ;;  %v7248_v44 = vunpack.c.h.b16 %v7190_v42  ;;  %v3212_v54 = vor.u32 %v3211_v32, %v3208_v30 }
 0x489   : > { %v2860_v57 = vadd.f32 %v7085_v63, %v2854_v3  ;;  %v5524_v63 = vld [vmem:[%s7351_s4 + $0x90] sm:$0xff]  ;;  %3691 = vmatpush.bf16.msrb.mxu0 %v5565_v35  ;;  %v5559_v3 = vld [vmem:[%s7351_s4 + $0x1a8] sm:$0xff] }
 0x48a   : > { %3164 = vmatpush.bf16.msra.mxu2 %v5524_v63  ;;  %v3412_v40 = vpack.c.b16 %v5694_v58, %v3408_v9  ;;  %v5558_v63 = vld [vmem:[%s7351_s4 + $0x1a0] sm:$0xff] }
 0x48b   : > { %vm2865_vm10 = vcmp.gt.f32.partialorder %v2860_v57, 0.0  ;;  %v2870_v2 = vmul.f32 0.1, %v2860_v57 }
 0x48c   : > { %v2749_v61 = vpop.f32.mrf.mxu1  ;;  %v3417_v7 = vshll.u32 %v3412_v40, 16  ;;  %v3415_v56 = vshrl.u32 %v3412_v40, 16 }
 0x48d   : > { %v2875_v22 = vsel %vm2865_vm10, %v2860_v57, %v2870_v2  ;;  %3692 = vmatpush.bf16.msrb.mxu0 %v5564_v5  ;;  %v5562_v57 = vld [vmem:[%s7351_s4 + $0x1c0] sm:$0xff] }
 0x48e   : > { %v2880_v23 = vpack.c.bf16 %v2875_v22, %v2875_v22  ;;  %3165 = vmatpush.bf16.msra.mxu2 %v5523_v38  ;;  %v3419_v43 = vrot.slane %v3417_v7, 1  ;;  %v5556_v22 = vld [vmem:[%s7351_s4 + $0x190] sm:$0xff]  ;;  %v5555_v38 = vld [vmem:[%s7351_s4 + $0x188] sm:$0xff] }
 0x48f   : > { %v7217_v12 = vld [vmem:[#allocation4 + $0x8] sm:$0xff]  }
 0x490   : > { %v2905_v6 = vld [vmem:[#allocation4 + $0xc] sm:$0x1]  ;;  %2885 = vst [vmem:[#allocation4 + $0x10] sm:$0xf] %v2880_v23  ;;  %v2929_v39 = vunpack.c.l.b16 %v7217_v12  ;;  %v3202_v50 = vunpack.c.h.b16 %v7217_v12  ;;  %v3214_v10 = vshrl.u32 %v7217_v12, 16  ;;  %v3217_v0 = vshll.u32 %v7217_v12, 16 }
 0x491   : > { %v2930_v55 = vunpack.c.l.b16 %v2905_v6  ;;  %v3420_v18 = vor.u32 %v3419_v43, %v3415_v56  ;;  %3693 = vmatpush.bf16.msrb.mxu0 %v5563_v46  ;;  %v3104_v23 = vunpack.c.l.b16 %v3085_v13 }
 0x492   : > { %v3016_v47 = vpack.c.b16 %v2929_v39, %v2929_v39  ;;  %v3310_v31 = vpack.c.b16 %v2929_v39, %v7215_v21  ;;  %3166 = vmatpush.bf16.msra.mxu2 %v5522_v1  ;;  %v3216_v16 = vrot.slane %v3214_v10, 3  ;;  %v3219_v62 = vrot.slane %v3217_v0, 4 }
 0x493   : > { %v7231_v36 = vpack.c.b16 %v2930_v55, %v2929_v39  ;;  %v3311_v4 = vpack.c.b16 %v3202_v50, %v3202_v50  ;;  %v3500_v39 = vld [vmem:[#allocation4 + $0x4] sm:$0x8]  ;;  %v3105_v55 = vpack.c.b16 %v7215_v21, %v3104_v23 }
 0x494   : > { %3080 = vmatmul.bf16.gmra.mxu0 %v3016_v47  ;;  %3370 = vmatmul.bf16.vlgmr.msra.gmra.mxu1 %v3310_v31  ;;  %v3220_v49 = vor.u32 %v3219_v62, %v3216_v16  ;;  %v3521_v9 = vunpack.c.l.b16 %v3500_v39 }
 0x495   : > { %v2941_v41 = vshll.u32 %v7231_v36, 16  ;;  %3694 = vmatpush.bf16.msrb.mxu0 %v5562_v57  ;;  %v2945_v14 = vshrl.u32 %v7231_v36, 16  ;;  %v3107_v48 = vrot.slane %v7231_v36, 1  ;;  %v3106_v34 = vrot.slane %v3105_v55, 1 }
 0x496   : > { %v3221_v2 = vsel %vm2185_vm4, %v3212_v54, %v3220_v49  ;;  %v3523_v28 = vpack.c.b16 %v5694_v58, %v3521_v9  ;;  %v5583_v9 = vld [vmem:[%s7352_s5 + $0x20] sm:$0xff] }
 0x497   : > { %v2943_v15 = vrot.slane %v2941_v41, 1  ;;  %v3386_v8 = vld [vmem:[#allocation4 + $0x10] sm:$0x1]  ;;  %v3108_v21 = vsel %vm2075_vm15, %v3106_v34, %v3107_v48 }
 0x498   : > { %v3411_v20 = vunpack.c.l.b16 %v3386_v8  ;;  %v3599_v17 = vld [vmem:[#allocation4 + $0x10] sm:$0xf]  ;;  %v3621_v40 = vshrl.u32 %v3523_v28, 16  ;;  %v3624_v33 = vshll.u32 %v3523_v28, 16  ;;  %v3525_v0 = vrot.slane %v3523_v28, 3  ;;  %v5582_v28 = vld [vmem:[%s7352_s5 + $0x18] sm:$0xff] }
 0x499   : > { %v2944_v51 = vsel %vm1881_vm0, %v2939_v25, %v2943_v15  ;;  %v2947_v61 = vor.u32 %v2945_v14, %v2943_v15  ;;  %v3618_v6 = vunpack.c.l.b16 %v3599_v17 }
 0x49a   : > { %3006 = vmatmul.bf16.vlgmr.msrb.gmra.mxu2 %v2944_v51  ;;  %v3413_v59 = vpack.c.b16 %v3411_v20, %v7248_v44  ;;  %v3623_v35 = vrot.slane %v3621_v40, 3  ;;  %v3626_v36 = vrot.slane %v3624_v33, 4  ;;  %v5580_v33 = vld [vmem:[%s7352_s5 + $0x8] sm:$0xff] }
 0x49b   : > { %3578 = vmatpush.bf16.msrb.mxu2 %v5561_v26  ;;  %v3619_v50 = vpack.c.b16 %v3618_v6, %v7248_v44  ;;  %v3726_v15 = vpack.c.b16 %v3618_v6, %v3618_v6 }
 0x49c   : > { %v3422_v53 = vshll.u32 %v3413_v59, 16  ;;  %v3426_v27 = vshrl.u32 %v3413_v59, 16  ;;  %v3627_v25 = vor.u32 %v3626_v36, %v3623_v35 }
 0x49d   : > { %v3629_v47 = vshrl.u32 %v3619_v50, 16  ;;  %v3632_v31 = vshll.u32 %v3619_v50, 16 }
 0x49e   : > { %v3424_v24 = vrot.slane %v3422_v53, 1 }
 0x49f   : > { %3579 = vmatpush.bf16.msrb.mxu2 %v5560_v19  ;;  %v3631_v41 = vrot.slane %v3629_v47, 3  ;;  %v3634_v1 = vrot.slane %v3632_v31, 4 }
 0x4a0   : > { %v3425_v37 = vsel %vm1881_vm0, %v3420_v18, %v3424_v24  ;;  %v3428_v12 = vor.u32 %v3426_v27, %v3424_v24 }
 0x4a1   : > { %3487 = vmatmul.bf16.vlgmr.msra.gmra.mxu3 %v3425_v37  ;;  %v3635_v29 = vor.u32 %v3634_v1, %v3631_v41  ;;  %v5579_v1 = vld [vmem:[%s7352_s5] sm:$0xff] }
 0x4a3   : > { %3580 = vmatpush.bf16.msrb.mxu2 %v5559_v3  ;;  %v3636_v7 = vsel %vm2185_vm4, %v3627_v25, %v3635_v29 }
 0x4a4   : > { %3280 = vmatmul.bf16.vlgmr.msra.gmra.mxu0 %v3221_v2  ;;  %3375 = vmatmul.bf16.gmra.mxu1 %v3311_v4 }
 0x4a7   : > { %3581 = vmatpush.bf16.msrb.mxu2 %v5558_v63  ;;  %v5586_v63 = vld [vmem:[%s7352_s5 + $0x38] sm:$0xff] }
 0x4a8   : > { %3895 = vmatpush.bf16.msrb.mxu3 %v5586_v63 }
 0x4aa   : > { %3011 = vmatmul.bf16.gmra.mxu2 %v2947_v61 }
 0x4ab   : > { %3582 = vmatpush.bf16.msrb.mxu2 %v5557_v45 }
 0x4af   : > { %3583 = vmatpush.bf16.msrb.mxu2 %v5556_v22  ;;  %v5585_v22 = vld [vmem:[%s7352_s5 + $0x30] sm:$0xff] }
 0x4b0   : > { %3896 = vmatpush.bf16.msrb.mxu3 %v5585_v22 }
 0x4b1   : > { %3492 = vmatmul.bf16.gmra.mxu3 %v3428_v12  ;;  %v5584_v12 = vld [vmem:[%s7352_s5 + $0x28] sm:$0xff] }
 0x4b3   : > { %3584 = vmatpush.bf16.msrb.mxu2 %v5555_v38 }
 0x4b4   : > { %3285 = vmatmul.bf16.gmra.mxu0 %v3220_v49  ;;  %3785 = vmatmul.bf16.vlgmr.msrb.gmra.mxu1 %v7190_v42  ;;  %v3501_v42 = vld [vmem:[#allocation4 + $0x10] sm:$0x7] }
 0x4b5   : > { %v3522_v58 = vunpack.c.l.b16 %v3501_v42  ;;  %3897 = vmatpush.bf16.msrb.mxu3 %v5584_v12 }
 0x4b7   : > { %3585 = vmatpush.bf16.msrb.mxu2 %v5554_v60  ;;  %v3524_v8 = vpack.c.b16 %v3522_v58, %v7248_v44 }
 0x4b9   : > { %v3526_v10 = vrot.slane %v3524_v8, 3  ;;  %3898 = vmatpush.bf16.msrb.mxu3 %v5583_v9 }
 0x4ba   : > { %3167 = vmatmul.bf16.vlgmr.msra.gmra.mxu2 %v3108_v21  ;;  %v5581_v21 = vld [vmem:[%s7352_s5 + $0x10] sm:$0xff] }
 0x4bb   : > { %v3527_v51 = vsel %vm2550_vm5, %v3525_v0, %v3526_v10 }
 0x4bd   : > { %3899 = vmatpush.bf16.msrb.mxu3 %v5582_v28 }
 0x4c1   : > { %3900 = vmatpush.bf16.msrb.mxu3 %v5581_v21 }
 0x4c4   : > { %3695 = vmatmul.bf16.vlgmr.msrb.gmra.mxu0 %v3636_v7  ;;  %3790 = vmatmul.bf16.gmra.mxu1 %v3726_v15  ;;  %v5736_v7 = vld [vmem:[%s7353_s6 + $0x2] ss:$0 sm:$0xff] }
 0x4c5   : > { %3901 = vmatpush.bf16.msrb.mxu3 %v5580_v33 }
 0x4c9   : > { %3902 = vmatpush.bf16.msrb.mxu3 %v5579_v1 }
 0x4ca   : > { %3172 = vmatmul.bf16.gmra.mxu2 %v3107_v48 }
 0x4d4   : > { %3700 = vmatmul.bf16.gmra.mxu0 %v3635_v29 }
 0x4da   : > { %3586 = vmatmul.bf16.vlgmr.msrb.gmra.mxu2 %v3527_v51 }
 0x4ea   : > { %3591 = vmatmul.bf16.gmra.mxu2 %v3526_v10 }
 0x4f5   : > { %v3076_v20 = vpop.f32.mrf.mxu0 }
 0x4fd   : > { %v3078_v11 = vpop.f32.mrf.mxu0 }
 0x511   : > { %v3081_v52 = vpop.f32.mrf.mxu0  ;;  %v3371_v26 = vpop.f32.mrf.mxu1 }
 0x519   : > { %v3083_v5 = vpop.f32.mrf.mxu0  ;;  %v3373_v59 = vpop.f32.mrf.mxu1 }
 0x51d   : > { %v3007_v43 = vpop.f32.mrf.mxu2 }
 0x51e   : > { %v3077_v37 = vadd.f32 %v3076_v20, %v3007_v43 }
 0x521   : > { %v3281_v16 = vpop.f32.mrf.mxu0  ;;  %v3376_v62 = vpop.f32.mrf.mxu1 }
 0x524   : > { %v3488_v46 = vpop.f32.mrf.mxu3 }
 0x525   : > { %v3009_v19 = vpop.f32.mrf.mxu2 }
 0x526   : > { %v3079_v17 = vadd.f32 %v3078_v11, %v3009_v19 }
 0x529   : > { %v3283_v56 = vpop.f32.mrf.mxu0  ;;  %v3378_v44 = vpop.f32.mrf.mxu1 }
 0x52c   : > { %v3490_v30 = vpop.f32.mrf.mxu3 }
 0x52d   : > { %v3012_v53 = vpop.f32.mrf.mxu2 }
 0x52e   : > { %v3082_v50 = vadd.f32 %v3081_v52, %v3012_v53 }
 0x531   : > { %v3286_v32 = vpop.f32.mrf.mxu0  ;;  %v3786_v18 = vpop.f32.mrf.mxu1 }
 0x534   : > { %v3493_v49 = vpop.f32.mrf.mxu3 }
 0x535   : > { %v3014_v24 = vpop.f32.mrf.mxu2 }
 0x539   : > { %v3288_v3 = vpop.f32.mrf.mxu0  ;;  %v3788_v57 = vpop.f32.mrf.mxu1 }
 0x53c   : > { %v3495_v4 = vpop.f32.mrf.mxu3 }
 0x53d   : > { %v3168_v54 = vpop.f32.mrf.mxu2 }
 0x53e   : > { %v3177_v2 = vadd.f32 %v3168_v54, %v3077_v37 }
 0x540   : > { %v3290_v14 = vadd.f32 %v3281_v16, %v3177_v2 }
 0x541   : > { %v3696_v61 = vpop.f32.mrf.mxu0  ;;  %v3791_v45 = vpop.f32.mrf.mxu1 }
 0x542   : > { %v3380_v13 = vadd.f32 %v3371_v26, %v3290_v14 }
 0x544   : > { %v3497_v35 = vadd.f32 %v3488_v46, %v3380_v13 }
 0x545   : > { %v3170_v27 = vpop.f32.mrf.mxu2 }
 0x546   : > { %v3178_v23 = vadd.f32 %v3170_v27, %v3079_v17 }
 0x548   : > { %v3291_v6 = vadd.f32 %v3283_v56, %v3178_v23 }
 0x549   : > { %v3698_v38 = vpop.f32.mrf.mxu0  ;;  %v3793_v39 = vpop.f32.mrf.mxu1 }
 0x54a   : > { %v3381_v55 = vadd.f32 %v3373_v59, %v3291_v6  ;;  %v3913_v39 = vlaneseq }
 0x54c   : > { %v3498_v42 = vadd.f32 %v3490_v30, %v3381_v55 }
 0x54d   : > { %v3173_v48 = vpop.f32.mrf.mxu2 }
 0x54e   : > { %v3179_v60 = vadd.f32 %v3173_v48, %v3082_v50 }
 0x550   : > { %v3292_v34 = vadd.f32 %v3286_v32, %v3179_v60  ;;  %v3914_v60 = vand.u32 127, %v3913_v39 }
 0x551   : > { %v3701_v47 = vpop.f32.mrf.mxu0 }
 0x552   : > { %v3382_v31 = vadd.f32 %v3376_v62, %v3292_v34  ;;  %vm3972_vm1 = vcmp.eq.s32.totalorder %v3914_v60, 0 }
 0x554   : > { %v3499_v52 = vadd.f32 %v3493_v49, %v3382_v31 }
 0x555   : > { %v3175_v40 = vpop.f32.mrf.mxu2 }
 0x559   : > { %v3703_v41 = vpop.f32.mrf.mxu0 }
 0x55d   : > { %v3587_v36 = vpop.f32.mrf.mxu2 }
 0x55e   : > { %v3596_v29 = vadd.f32 %v3587_v36, %v3497_v35 }
 0x560   : > { %v3705_v25 = vadd.f32 %v3696_v61, %v3596_v29 }
 0x562   : > { %v3795_v15 = vadd.f32 %v3786_v18, %v3705_v25 }
 0x564   : > { %v3799_v10 = vadd.f32 %v5736_v7, %v3795_v15 }
 0x565   : > { %v3589_v58 = vpop.f32.mrf.mxu2 }
 0x566   : > { %v3597_v8 = vadd.f32 %v3589_v58, %v3498_v42  ;;  %v3805_v20 = vmul.f32 0.1, %v3799_v10  ;;  %vm3802_vm11 = vcmp.gt.f32.partialorder %v3799_v10, 0.0 }
 0x568   : > { %v3706_v0 = vadd.f32 %v3698_v38, %v3597_v8  ;;  %v3808_v43 = vsel %vm3802_vm11, %v3799_v10, %v3805_v20 }
 0x56a   : > { %v3796_v51 = vadd.f32 %v3788_v57, %v3706_v0  ;;  %v5737_v57 = vld [vmem:[%s7353_s6 + $0x3] ss:$0 sm:$0xff] }
 0x56c   : > { %v3800_v11 = vadd.f32 %v5736_v7, %v3796_v51 }
 0x56d   : > { %v3592_v26 = vpop.f32.mrf.mxu2 }
 0x56e   : > { %vm3803_vm12 = vcmp.gt.f32.partialorder %v3800_v11, 0.0  ;;  %v3806_v5 = vmul.f32 0.1, %v3800_v11  ;;  %v3598_v59 = vadd.f32 %v3592_v26, %v3499_v52 }
 0x570   : > { %v3809_v16 = vsel %vm3803_vm12, %v3800_v11, %v3806_v5  ;;  %v3707_v62 = vadd.f32 %v3701_v47, %v3598_v59 }
 0x571   : > { %v5699_v19 = vpack.c.bf16 %v3809_v16, %v3808_v43 }
 0x572   : > { %v3797_v46 = vadd.f32 %v3791_v45, %v3707_v62 }
 0x573   : > { %5700 = vst [vmem:[#allocation5] sm:$0xff] %v5699_v19  }
 0x574   : > { %v3801_v56 = vadd.f32 %v5736_v7, %v3797_v46 }
 0x575   : > { %v3594_v44 = vpop.f32.mrf.mxu2 }
 0x576   : > { %vm3804_vm13 = vcmp.gt.f32.partialorder %v3801_v56, 0.0  ;;  %v3807_v53 = vmul.f32 0.1, %v3801_v56 }
 0x578   : > { %v3810_v30 = vsel %vm3804_vm13, %v3801_v56, %v3807_v53 }
 0x579   : > { %v3813_v32 = vpack.c.bf16 %v3810_v30, %v3810_v30 }
 0x57a   : > { %v5578_v18 = vld [vmem:[#allocation5] sm:$0xff] }
 0x57b   : > { %3816 = vst [vmem:[#allocation5 + $0x8] sm:$0xf] %v3813_v32  ;;  %3903 = vmatmul.bf16.vlgmr.msrb.gmra.mxu3 %v5578_v18 }
 0x582   : > { %v3819_v24 = vld [vmem:[#allocation5 + $0x8] sm:$0xf] }
 0x583   : > { %v3842_v49 = vunpack.c.l.b16 %v3819_v24 }
 0x585   : > { %v3844_v3 = vpack.c.b16 %v3842_v49, %v3842_v49 }
 0x58b   : > { %3908 = vmatmul.bf16.gmra.mxu3 %v3844_v3 }
 0x5fe   : > { %v3904_v37 = vpop.f32.mrf.mxu3 }
 0x5ff   : > { %v3905_v54 = vadd.f32 %v5737_v57, %v3904_v37 }
 0x601   : > { %v3915_v4 = vsub.f32 0.0, %v3905_v54 }
 0x603   : > { %v3918_v2 = vmul.f32 1.442695, %v3915_v4 }
 0x605   : > { %5738 = vpow2.f32 %v3918_v2 }
 0x606   : > { %v3906_v63 = vpop.f32.mrf.mxu3 }
 0x607   : > { %v3907_v14 = vadd.f32 %v5737_v57, %v3906_v63 }
 0x609   : > { %v3916_v61 = vsub.f32 0.0, %v3907_v14 }
 0x60b   : > { %v5739_v45 = vpop.eup %5738  ;;  %v3920_v13 = vmul.f32 1.442695, %v3916_v61 }
 0x60c   : > { %v3924_v22 = vadd.f32 1.0, %v5739_v45 }
 0x60d   : > { %5740 = vpow2.f32 %v3920_v13 }
 0x60e   : > { %5742 = vrcp.f32 %v3924_v22  ;;  %v3909_v17 = vpop.f32.mrf.mxu3  ;;  %v3938_v28 = vand.u32 2147483648, %v3924_v22  ;;  %v3936_v47 = vand.u32 2147483647, %v3924_v22  ;;  %vm3932_vm15 = vweird.f32 %v3924_v22 }
 0x60f   : > { %v7329_v27 = vadd.f32 %v5737_v57, %v3909_v17 }
 0x610   : > { %v3939_v33 = vor.u32 1.1754944e-38, %v3938_v28  ;;  %vm3937_vm2 = vcmp.eq.f32.partialorder %v3936_v47, 8.507059e+37 }
 0x611   : > { %v3917_v23 = vsub.f32 0.0, %v7329_v27 }
 0x613   : > { %v5741_v12 = vpop.eup %5740  ;;  %v3922_v6 = vmul.f32 1.442695, %v3917_v23 }
 0x614   : > { %v5743_v38 = vpop.eup %5742  ;;  %v3925_v55 = vadd.f32 1.0, %v5741_v12 }
 0x615   : > { %v3928_v9 = vmul.f32 %v5743_v38, %v3924_v22  ;;  %5744 = vpow2.f32 %v3922_v6  ;;  %vm3933_vm14 = vweird.f32 %v5743_v38 }
 0x616   : > { %5746 = vrcp.f32 %v3925_v55  ;;  %v3911_v50 = vpop.f32.mrf.mxu3  ;;  %vm3934_vm0 = vmor %vm3932_vm15, %vm3933_vm14  ;;  %v3953_v15 = vand.u32 2147483648, %v3925_v55  ;;  %v3951_v42 = vand.u32 2147483647, %v3925_v55  ;;  %vm3947_vm4 = vweird.f32 %v3925_v55 }
 0x617   : > { %v3929_v48 = vsub.f32 1.0, %v3928_v9 }
 0x618   : > { %v3954_v10 = vor.u32 1.1754944e-38, %v3953_v15  ;;  %vm3952_vm6 = vcmp.eq.f32.partialorder %v3951_v42, 8.507059e+37 }
 0x619   : > { %v3930_v34 = vmul.f32 %v5743_v38, %v3929_v48 }
 0x61b   : > { %v5745_v31 = vpop.eup %5744  ;;  %v3931_v21 = vadd.f32 %v5743_v38, %v3930_v34 }
 0x61c   : > { %v5747_v40 = vpop.eup %5746  ;;  %v3926_v41 = vadd.f32 1.0, %v5745_v31 }
 0x61d   : > { %v3935_v1 = vsel %vm3934_vm0, %v5743_v38, %v3931_v21  ;;  %v3943_v35 = vmul.f32 %v5747_v40, %v3925_v55  ;;  %vm3948_vm3 = vweird.f32 %v5747_v40 }
 0x61e   : > { %v3940_v36 = vsel %vm3937_vm2, %v3939_v33, %v3935_v1  ;;  %5748 = vrcp.f32 %v3926_v41  ;;  %vm3949_vm5 = vmor %vm3947_vm4, %vm3948_vm3  ;;  %v3968_v26 = vand.u32 2147483648, %v3926_v41  ;;  %v3966_v59 = vand.u32 2147483647, %v3926_v41 }
 0x61f   : > { %v3973_v29 = vsel %vm3972_vm1, %v3940_v36, %v3905_v54  ;;  %v3944_v25 = vsub.f32 1.0, %v3943_v35  ;;  %vm3962_vm8 = vweird.f32 %v3926_v41 }
 0x620   : > { %3976 = vst [vmem:[%s7335_s29] sm:$0xff] %v3973_v29  ;;  %v3969_v16 = vor.u32 1.1754944e-38, %v3968_v26  ;;  %vm3967_vm10 = vcmp.eq.f32.partialorder %v3966_v59, 8.507059e+37 }
 0x621   : > { %v3945_v7 = vmul.f32 %v5747_v40, %v3944_v25 }
 0x623   : > { %v3946_v58 = vadd.f32 %v5747_v40, %v3945_v7 }
 0x624   : > { %v5749_v8 = vpop.eup %5748 }
 0x625   : > { %v3950_v0 = vsel %vm3949_vm5, %v5747_v40, %v3946_v58  ;;  %v3958_v51 = vmul.f32 %v5749_v8, %v3926_v41  ;;  %vm3963_vm7 = vweird.f32 %v5749_v8 }
 0x626   : > { %v3955_v20 = vsel %vm3952_vm6, %v3954_v10, %v3950_v0  ;;  %vm3964_vm9 = vmor %vm3962_vm8, %vm3963_vm7 }
 0x627   : > { %v3974_v11 = vsel %vm3972_vm1, %v3955_v20, %v3907_v14  ;;  %v3959_v52 = vsub.f32 1.0, %v3958_v51 }
 0x628   : > { %3977 = vst [vmem:[%s7335_s29 + $0x8] sm:$0xff] %v3974_v11 }
 0x629   : > { %v3960_v5 = vmul.f32 %v5749_v8, %v3959_v52 }
 0x62b   : > { %v3961_v43 = vadd.f32 %v5749_v8, %v3960_v5 }
 0x62d   : > { %v3965_v62 = vsel %vm3964_vm9, %v5749_v8, %v3961_v43 }
 0x62e   : > { %v3970_v19 = vsel %vm3967_vm10, %v3969_v16, %v3965_v62 }
 0x62f   : > { %v3975_v46 = vsel %vm3972_vm1, %v3970_v19, %v7329_v27 }
 0x630   : > { %3978 = vst [vmem:[%s7335_s29 + $0x10] sm:$0xff] %v3975_v46 }
 0x631 PF: > { %s17_s24 = sadd.s32 1, %s5756_s24  }
 0x632   : > { %p14_p5 = scmp.ge.s32.totalorder %s17_s24, 4  }
 0x634   :  { %16 = sbr.rel (!%p14_p5) target bundleno = 1 (0x1), region = 102 }

</bundles_post_ra>
